<compile_context>
chip_gen: v5e
topology: v5e:2x2
jax: 0.10.0
libtpu: 0.0.40
codegen_flags: <defaults>
</compile_context>

<pallas_src>
from functools import partial

import jax
import jax.numpy as jnp
from jax.experimental import pallas as pl
from jax.experimental.pallas import tpu as pltpu

INPUT = 2
HIDDEN = 128
NCLS = 11
CLS_PAD = 128  # lane-dense padded classifier width


def lstm2_kernel(T, B, x_ref, wih0_ref, b0_ref, whh0_ref, wih1_ref, whh1_ref,
                 b1_ref, fcw_ref, fcb_ref, cls_ref, h_out_ref):
    """Full 2-layer LSTM recurrence + FC head in one invocation.

    Gate column order (wrapper-reordered): [i, f, o, g].
      x_ref    : (T*B, INPUT) f32   time-major, flattened
      wih0_ref : (INPUT, 4H)  f32   layer-0 input weights (used on VPU)
      b0_ref   : (1, 4H)      f32   layer-0 bias (b_ih + b_hh)
      whh0_ref : (H, 4H)      bf16  layer-0 recurrent weights
      wih1_ref : (H, 4H)      bf16  layer-1 input weights
      whh1_ref : (H, 4H)      bf16  layer-1 recurrent weights
      b1_ref   : (1, 4H)      f32   layer-1 bias
      fcw_ref  : (H, CLS_PAD) bf16  FC weight, zero-padded to 128 lanes
      fcb_ref  : (1, CLS_PAD) f32
    """
    H = HIDDEN

    # ---- hoisted, non-recurrent work -------------------------------------
    # Layer-0 input projection for ALL timesteps as a VPU outer-product
    # (K=2 would waste an entire MXU contraction tile).
    xf = x_ref[...]                                              # (T*B, 2)
    w0 = wih0_ref[...]                                           # (2, 4H)
    gates_x = (xf[:, 0:1] * w0[0:1, :]
               + xf[:, 1:2] * w0[1:2, :]
               + b0_ref[...])                                    # (T*B, 4H) f32

    whh0 = whh0_ref[...]                                         # bf16
    wih1 = wih1_ref[...]                                         # bf16
    whh1 = whh1_ref[...]                                         # bf16
    b1_full = jnp.broadcast_to(b1_ref[...], (B, 4 * H))          # hoisted broadcast

    def activate(gates, c_prev):
        # columns are [i | f | o | g]: one contiguous tanh-based sigmoid slab + one tanh
        ifo = 0.5 * jnp.tanh(0.5 * gates[:, :3 * H]) + 0.5       # sigmoid via tanh identity
        g = jnp.tanh(gates[:, 3 * H:])
        i = ifo[:, :H]
        f = ifo[:, H:2 * H]
        o = ifo[:, 2 * H:3 * H]
        c_new = f * c_prev + i * g
        h_new = o * jnp.tanh(c_new)
        return h_new, c_new

    zeros = jnp.zeros((B, H), jnp.float32)
    h1, c1, h2, c2 = zeros, zeros, zeros, zeros

    # ---- fully unrolled time loop (T is small & static) -------------------
    # dot(h2_{t-1}, whh1) is issued first each step so it overlaps layer-0's
    # matmul + activation (it has no dependency on h1_t).
    for t in range(T):
        h2_b = h2.astype(jnp.bfloat16)
        rec1 = jnp.dot(h2_b, whh1, preferred_element_type=jnp.float32)     # (B, 4H)

        gx = gates_x[t * B:(t + 1) * B, :]                                  # static slice
        gates0 = gx + jnp.dot(h1.astype(jnp.bfloat16), whh0,
                              preferred_element_type=jnp.float32)
        h1, c1 = activate(gates0, c1)

        gates1 = (rec1
                  + jnp.dot(h1.astype(jnp.bfloat16), wih1,
                            preferred_element_type=jnp.float32)
                  + b1_full)
        h2, c2 = activate(gates1, c2)

    # ---- outputs ----------------------------------------------------------
    h_out_ref[...] = h2
    cls_ref[...] = (jnp.dot(h2.astype(jnp.bfloat16), fcw_ref[...],
                            preferred_element_type=jnp.float32)
                    + fcb_ref[...])


def _reorder_gates(w):
    """Reorder the last-axis gate blocks from PyTorch's [i,f,g,o] to [i,f,o,g]."""
    i, f, g, o = jnp.split(w, 4, axis=-1)
    return jnp.concatenate([i, f, o, g], axis=-1)


def lstm2_forward(x, params):
    """x: (B, T, INPUT) float32, batch_first like PyTorch.
       Returns (cls (B, 11), h_layer2_final (B, 128))."""
    (wih0, whh0, b0, wih1, whh1, b1, fcw, fcb) = params
    B, T, _ = x.shape

    # time-major, flattened to (T*B, INPUT) so the kernel needs no reshapes
    x_flat = jnp.transpose(x, (1, 0, 2)).reshape(T * B, INPUT).astype(jnp.float32)

    # wrapper-side weight prep (free, done once per call under jit)
    wih0_r = _reorder_gates(wih0).astype(jnp.float32)            # VPU path stays f32
    whh0_r = _reorder_gates(whh0).astype(jnp.bfloat16)
    wih1_r = _reorder_gates(wih1).astype(jnp.bfloat16)
    whh1_r = _reorder_gates(whh1).astype(jnp.bfloat16)
    b0_r = _reorder_gates(b0).astype(jnp.float32)
    b1_r = _reorder_gates(b1).astype(jnp.float32)

    fcw_pad = jnp.pad(fcw, ((0, 0), (0, CLS_PAD - NCLS))).astype(jnp.bfloat16)
    fcb_pad = jnp.pad(fcb, ((0, 0), (0, CLS_PAD - NCLS))).astype(jnp.float32)

    vmem = pl.BlockSpec(memory_space=pltpu.MemorySpace.VMEM)
    cls_pad, h_final = pl.pallas_call(
        partial(lstm2_kernel, T, B),
        out_shape=[
            jax.ShapeDtypeStruct((B, CLS_PAD), jnp.float32),
            jax.ShapeDtypeStruct((B, HIDDEN), jnp.float32),
        ],
        in_specs=[vmem] * 9,
        out_specs=[vmem, vmem],
        compiler_params=pltpu.CompilerParams(vmem_limit_bytes=32 * 1024 * 1024),
    )(x_flat, wih0_r, b0_r, whh0_r, wih1_r, whh1_r, b1_r, fcw_pad, fcb_pad)

    return cls_pad[:, :NCLS], h_final


# ---------------- deterministic parameter init (mirrors the PyTorch __init__) -------------
def init_params(key):
    ks = jax.random.split(key, 8)

    def xavier_uniform(k, shape_out_in):
        fan_out, fan_in = shape_out_in
        a = jnp.sqrt(6.0 / (fan_in + fan_out))
        w = jax.random.uniform(k, shape_out_in, jnp.float32, -a, a)
        return jnp.transpose(w)  # store as (in, out) for x @ W in the kernel

    # nn.LSTM weights: xavier_uniform(gain=1); biases: zeros.
    wih0 = xavier_uniform(ks[0], (4 * HIDDEN, INPUT))    # -> (INPUT, 4H)
    whh0 = xavier_uniform(ks[1], (4 * HIDDEN, HIDDEN))   # -> (H, 4H)
    wih1 = xavier_uniform(ks[2], (4 * HIDDEN, HIDDEN))
    whh1 = xavier_uniform(ks[3], (4 * HIDDEN, HIDDEN))
    b0 = jnp.zeros((1, 4 * HIDDEN), jnp.float32)         # b_ih_l0 + b_hh_l0 (both zero)
    b1 = jnp.zeros((1, 4 * HIDDEN), jnp.float32)

    # nn.Linear(128, 11): weight xavier_normal, bias default uniform(-1/sqrt(128), 1/sqrt(128)).
    std = jnp.sqrt(2.0 / (NCLS + HIDDEN))
    fcw = (jax.random.normal(ks[4], (NCLS, HIDDEN), jnp.float32) * std).T  # (128, 11)
    bound = 1.0 / jnp.sqrt(float(HIDDEN))
    fcb = jax.random.uniform(ks[5], (1, NCLS), jnp.float32, -bound, bound)

    return (wih0, whh0, b0, wih1, whh1, b1, fcw, fcb)


# ---------------- pure-JAX f32 reference (for correctness check) --------------------------
def reference_forward(x, params):
    (wih0, whh0, b0, wih1, whh1, b1, fcw, fcb) = params
    B, T, _ = x.shape
    h1 = jnp.zeros((B, HIDDEN)); c1 = jnp.zeros((B, HIDDEN))
    h2 = jnp.zeros((B, HIDDEN)); c2 = jnp.zeros((B, HIDDEN))

    def cell(x_in, wih, whh, b, h, c):
        g = x_in @ wih + h @ whh + b
        i = jax.nn.sigmoid(g[:, :HIDDEN])
        f = jax.nn.sigmoid(g[:, HIDDEN:2 * HIDDEN])
        gg = jnp.tanh(g[:, 2 * HIDDEN:3 * HIDDEN])
        o = jax.nn.sigmoid(g[:, 3 * HIDDEN:])
        c_new = f * c + i * gg
        return o * jnp.tanh(c_new), c_new

    for t in range(T):
        h1, c1 = cell(x[:, t, :], wih0, whh0, b0, h1, c1)
        h2, c2 = cell(h1, wih1, whh1, b1, h2, c2)
    cls = h2 @ fcw + fcb
    return cls, h2


if __name__ == "__main__":
    key = jax.random.PRNGKey(0)
    k_param, k_x = jax.random.split(key)

    B, T = 8, 8
    x = jax.random.normal(k_x, (B, T, INPUT), jnp.float32)
    params = init_params(k_param)

    cls, h_final = jax.block_until_ready(lstm2_forward(x, params))

    # Tolerance relaxed vs. f32 reference because MXU operands are bf16.
    cls_ref, h_ref = reference_forward(x, params)
    assert jnp.allclose(cls, cls_ref, atol=5e-2, rtol=5e-2), "cls mismatch vs reference"
    assert jnp.allclose(h_final, h_ref, atol=5e-2, rtol=5e-2), "hidden mismatch vs reference"

    print("KERNEL_OK")
</pallas_src>

<mosaic_0001>
module attributes {stable_mosaic.version = 11 : i64} {
  func.func @lstm2_kernel(%arg0: memref<64x2xf32, #tpu.memory_space<vmem>>, %arg1: memref<2x512xf32, #tpu.memory_space<vmem>>, %arg2: memref<1x512xf32, #tpu.memory_space<vmem>>, %arg3: memref<128x512xbf16, #tpu.memory_space<vmem>>, %arg4: memref<128x512xbf16, #tpu.memory_space<vmem>>, %arg5: memref<128x512xbf16, #tpu.memory_space<vmem>>, %arg6: memref<1x512xf32, #tpu.memory_space<vmem>>, %arg7: memref<128x128xbf16, #tpu.memory_space<vmem>>, %arg8: memref<1x128xf32, #tpu.memory_space<vmem>>, %arg9: memref<8x128xf32, #tpu.memory_space<vmem>>, %arg10: memref<8x128xf32, #tpu.memory_space<vmem>>) attributes {dimension_semantics = [], scalar_prefetch = 0 : i64, scratch_operands = 0 : i64, tpu.core_type = #tpu.core_type<tc>} {
    %c0 = arith.constant 0 : index
    %c0_0 = arith.constant 0 : index
    %0 = vector.load %arg0[%c0, %c0_0] : memref<64x2xf32, #tpu.memory_space<vmem>>, vector<64x2xf32>
    %c0_1 = arith.constant 0 : index
    %c0_2 = arith.constant 0 : index
    %1 = vector.load %arg1[%c0_1, %c0_2] : memref<2x512xf32, #tpu.memory_space<vmem>>, vector<2x512xf32>
    %2 = vector.extract_strided_slice %0 {offsets = [0, 0], sizes = [64, 1], strides = [1, 1]} : vector<64x2xf32> to vector<64x1xf32>
    %3 = vector.extract_strided_slice %1 {offsets = [0, 0], sizes = [1, 512], strides = [1, 1]} : vector<2x512xf32> to vector<1x512xf32>
    %4 = vector.broadcast %2 : vector<64x1xf32> to vector<64x512xf32>
    %5 = vector.broadcast %3 : vector<1x512xf32> to vector<64x512xf32>
    %6 = arith.mulf %4, %5 : vector<64x512xf32>
    %7 = vector.extract_strided_slice %0 {offsets = [0, 1], sizes = [64, 1], strides = [1, 1]} : vector<64x2xf32> to vector<64x1xf32>
    %8 = vector.extract_strided_slice %1 {offsets = [1, 0], sizes = [1, 512], strides = [1, 1]} : vector<2x512xf32> to vector<1x512xf32>
    %9 = vector.broadcast %7 : vector<64x1xf32> to vector<64x512xf32>
    %10 = vector.broadcast %8 : vector<1x512xf32> to vector<64x512xf32>
    %11 = arith.mulf %9, %10 : vector<64x512xf32>
    %12 = arith.addf %6, %11 : vector<64x512xf32>
    %c0_3 = arith.constant 0 : index
    %c0_4 = arith.constant 0 : index
    %13 = vector.load %arg2[%c0_3, %c0_4] : memref<1x512xf32, #tpu.memory_space<vmem>>, vector<1x512xf32>
    %14 = vector.broadcast %13 : vector<1x512xf32> to vector<64x512xf32>
    %15 = arith.addf %12, %14 : vector<64x512xf32>
    %c0_5 = arith.constant 0 : index
    %c0_6 = arith.constant 0 : index
    %16 = vector.load %arg3[%c0_5, %c0_6] : memref<128x512xbf16, #tpu.memory_space<vmem>>, vector<128x512xbf16>
    %c0_7 = arith.constant 0 : index
    %c0_8 = arith.constant 0 : index
    %17 = vector.load %arg4[%c0_7, %c0_8] : memref<128x512xbf16, #tpu.memory_space<vmem>>, vector<128x512xbf16>
    %c0_9 = arith.constant 0 : index
    %c0_10 = arith.constant 0 : index
    %18 = vector.load %arg5[%c0_9, %c0_10] : memref<128x512xbf16, #tpu.memory_space<vmem>>, vector<128x512xbf16>
    %c0_11 = arith.constant 0 : index
    %c0_12 = arith.constant 0 : index
    %19 = vector.load %arg6[%c0_11, %c0_12] : memref<1x512xf32, #tpu.memory_space<vmem>>, vector<1x512xf32>
    %20 = vector.shape_cast %19 : vector<1x512xf32> to vector<1x512xf32>
    %21 = vector.broadcast %20 : vector<1x512xf32> to vector<8x512xf32>
    %cst = arith.constant 0.000000e+00 : f32
    %22 = vector.broadcast %cst : f32 to vector<8x128xf32>
    %23 = arith.truncf %22 : vector<8x128xf32> to vector<8x128xbf16>
    %cst_13 = arith.constant dense<0.000000e+00> : vector<8x512xf32>
    %24 = tpu.matmul %23, %18, %cst_13 {dimension_numbers = #tpu.dot_dimension_numbers<[1], [0], [0], [1], [0, 0, 1, 1], [], []>} : vector<8x128xbf16>, vector<128x512xbf16>, vector<8x512xf32> -> vector<8x512xf32>
    %25 = vector.extract_strided_slice %15 {offsets = [0, 0], sizes = [8, 512], strides = [1, 1]} : vector<64x512xf32> to vector<8x512xf32>
    %26 = arith.truncf %22 : vector<8x128xf32> to vector<8x128xbf16>
    %cst_14 = arith.constant dense<0.000000e+00> : vector<8x512xf32>
    %27 = tpu.matmul %26, %16, %cst_14 {dimension_numbers = #tpu.dot_dimension_numbers<[1], [0], [0], [1], [0, 0, 1, 1], [], []>} : vector<8x128xbf16>, vector<128x512xbf16>, vector<8x512xf32> -> vector<8x512xf32>
    %28 = arith.addf %25, %27 : vector<8x512xf32>
    %29 = vector.extract_strided_slice %28 {offsets = [0, 0], sizes = [8, 384], strides = [1, 1]} : vector<8x512xf32> to vector<8x384xf32>
    %cst_15 = arith.constant 5.000000e-01 : f32
    %30 = vector.broadcast %cst_15 : f32 to vector<8x384xf32>
    %31 = arith.mulf %30, %29 : vector<8x384xf32>
    %32 = math.tanh %31 : vector<8x384xf32>
    %cst_16 = arith.constant 5.000000e-01 : f32
    %33 = vector.broadcast %cst_16 : f32 to vector<8x384xf32>
    %34 = arith.mulf %33, %32 : vector<8x384xf32>
    %cst_17 = arith.constant 5.000000e-01 : f32
    %35 = vector.broadcast %cst_17 : f32 to vector<8x384xf32>
    %36 = arith.addf %34, %35 : vector<8x384xf32>
    %37 = vector.extract_strided_slice %28 {offsets = [0, 384], sizes = [8, 128], strides = [1, 1]} : vector<8x512xf32> to vector<8x128xf32>
    %38 = math.tanh %37 : vector<8x128xf32>
    %39 = vector.extract_strided_slice %36 {offsets = [0, 0], sizes = [8, 128], strides = [1, 1]} : vector<8x384xf32> to vector<8x128xf32>
    %40 = vector.extract_strided_slice %36 {offsets = [0, 128], sizes = [8, 128], strides = [1, 1]} : vector<8x384xf32> to vector<8x128xf32>
    %41 = vector.extract_strided_slice %36 {offsets = [0, 256], sizes = [8, 128], strides = [1, 1]} : vector<8x384xf32> to vector<8x128xf32>
    %42 = arith.mulf %40, %22 : vector<8x128xf32>
    %43 = arith.mulf %39, %38 : vector<8x128xf32>
    %44 = arith.addf %42, %43 : vector<8x128xf32>
    %45 = math.tanh %44 : vector<8x128xf32>
    %46 = arith.mulf %41, %45 : vector<8x128xf32>
    %47 = arith.truncf %46 : vector<8x128xf32> to vector<8x128xbf16>
    %cst_18 = arith.constant dense<0.000000e+00> : vector<8x512xf32>
    %48 = tpu.matmul %47, %17, %cst_18 {dimension_numbers = #tpu.dot_dimension_numbers<[1], [0], [0], [1], [0, 0, 1, 1], [], []>} : vector<8x128xbf16>, vector<128x512xbf16>, vector<8x512xf32> -> vector<8x512xf32>
    %49 = arith.addf %24, %48 : vector<8x512xf32>
    %50 = arith.addf %49, %21 : vector<8x512xf32>
    %51 = vector.extract_strided_slice %50 {offsets = [0, 0], sizes = [8, 384], strides = [1, 1]} : vector<8x512xf32> to vector<8x384xf32>
    %cst_19 = arith.constant 5.000000e-01 : f32
    %52 = vector.broadcast %cst_19 : f32 to vector<8x384xf32>
    %53 = arith.mulf %52, %51 : vector<8x384xf32>
    %54 = math.tanh %53 : vector<8x384xf32>
    %cst_20 = arith.constant 5.000000e-01 : f32
    %55 = vector.broadcast %cst_20 : f32 to vector<8x384xf32>
    %56 = arith.mulf %55, %54 : vector<8x384xf32>
    %cst_21 = arith.constant 5.000000e-01 : f32
    %57 = vector.broadcast %cst_21 : f32 to vector<8x384xf32>
    %58 = arith.addf %56, %57 : vector<8x384xf32>
    %59 = vector.extract_strided_slice %50 {offsets = [0, 384], sizes = [8, 128], strides = [1, 1]} : vector<8x512xf32> to vector<8x128xf32>
    %60 = math.tanh %59 : vector<8x128xf32>
    %61 = vector.extract_strided_slice %58 {offsets = [0, 0], sizes = [8, 128], strides = [1, 1]} : vector<8x384xf32> to vector<8x128xf32>
    %62 = vector.extract_strided_slice %58 {offsets = [0, 128], sizes = [8, 128], strides = [1, 1]} : vector<8x384xf32> to vector<8x128xf32>
    %63 = vector.extract_strided_slice %58 {offsets = [0, 256], sizes = [8, 128], strides = [1, 1]} : vector<8x384xf32> to vector<8x128xf32>
    %64 = arith.mulf %62, %22 : vector<8x128xf32>
    %65 = arith.mulf %61, %60 : vector<8x128xf32>
    %66 = arith.addf %64, %65 : vector<8x128xf32>
    %67 = math.tanh %66 : vector<8x128xf32>
    %68 = arith.mulf %63, %67 : vector<8x128xf32>
    %69 = arith.truncf %68 : vector<8x128xf32> to vector<8x128xbf16>
    %cst_22 = arith.constant dense<0.000000e+00> : vector<8x512xf32>
    %70 = tpu.matmul %69, %18, %cst_22 {dimension_numbers = #tpu.dot_dimension_numbers<[1], [0], [0], [1], [0, 0, 1, 1], [], []>} : vector<8x128xbf16>, vector<128x512xbf16>, vector<8x512xf32> -> vector<8x512xf32>
    %71 = vector.extract_strided_slice %15 {offsets = [8, 0], sizes = [8, 512], strides = [1, 1]} : vector<64x512xf32> to vector<8x512xf32>
    %72 = arith.truncf %46 : vector<8x128xf32> to vector<8x128xbf16>
    %cst_23 = arith.constant dense<0.000000e+00> : vector<8x512xf32>
    %73 = tpu.matmul %72, %16, %cst_23 {dimension_numbers = #tpu.dot_dimension_numbers<[1], [0], [0], [1], [0, 0, 1, 1], [], []>} : vector<8x128xbf16>, vector<128x512xbf16>, vector<8x512xf32> -> vector<8x512xf32>
    %74 = arith.addf %71, %73 : vector<8x512xf32>
    %75 = vector.extract_strided_slice %74 {offsets = [0, 0], sizes = [8, 384], strides = [1, 1]} : vector<8x512xf32> to vector<8x384xf32>
    %cst_24 = arith.constant 5.000000e-01 : f32
    %76 = vector.broadcast %cst_24 : f32 to vector<8x384xf32>
    %77 = arith.mulf %76, %75 : vector<8x384xf32>
    %78 = math.tanh %77 : vector<8x384xf32>
    %cst_25 = arith.constant 5.000000e-01 : f32
    %79 = vector.broadcast %cst_25 : f32 to vector<8x384xf32>
    %80 = arith.mulf %79, %78 : vector<8x384xf32>
    %cst_26 = arith.constant 5.000000e-01 : f32
    %81 = vector.broadcast %cst_26 : f32 to vector<8x384xf32>
    %82 = arith.addf %80, %81 : vector<8x384xf32>
    %83 = vector.extract_strided_slice %74 {offsets = [0, 384], sizes = [8, 128], strides = [1, 1]} : vector<8x512xf32> to vector<8x128xf32>
    %84 = math.tanh %83 : vector<8x128xf32>
    %85 = vector.extract_strided_slice %82 {offsets = [0, 0], sizes = [8, 128], strides = [1, 1]} : vector<8x384xf32> to vector<8x128xf32>
    %86 = vector.extract_strided_slice %82 {offsets = [0, 128], sizes = [8, 128], strides = [1, 1]} : vector<8x384xf32> to vector<8x128xf32>
    %87 = vector.extract_strided_slice %82 {offsets = [0, 256], sizes = [8, 128], strides = [1, 1]} : vector<8x384xf32> to vector<8x128xf32>
    %88 = arith.mulf %86, %44 : vector<8x128xf32>
    %89 = arith.mulf %85, %84 : vector<8x128xf32>
    %90 = arith.addf %88, %89 : vector<8x128xf32>
    %91 = math.tanh %90 : vector<8x128xf32>
    %92 = arith.mulf %87, %91 : vector<8x128xf32>
    %93 = arith.truncf %92 : vector<8x128xf32> to vector<8x128xbf16>
    %cst_27 = arith.constant dense<0.000000e+00> : vector<8x512xf32>
    %94 = tpu.matmul %93, %17, %cst_27 {dimension_numbers = #tpu.dot_dimension_numbers<[1], [0], [0], [1], [0, 0, 1, 1], [], []>} : vector<8x128xbf16>, vector<128x512xbf16>, vector<8x512xf32> -> vector<8x512xf32>
    %95 = arith.addf %70, %94 : vector<8x512xf32>
    %96 = arith.addf %95, %21 : vector<8x512xf32>
    %97 = vector.extract_strided_slice %96 {offsets = [0, 0], sizes = [8, 384], strides = [1, 1]} : vector<8x512xf32> to vector<8x384xf32>
    %cst_28 = arith.constant 5.000000e-01 : f32
    %98 = vector.broadcast %cst_28 : f32 to vector<8x384xf32>
    %99 = arith.mulf %98, %97 : vector<8x384xf32>
    %100 = math.tanh %99 : vector<8x384xf32>
    %cst_29 = arith.constant 5.000000e-01 : f32
    %101 = vector.broadcast %cst_29 : f32 to vector<8x384xf32>
    %102 = arith.mulf %101, %100 : vector<8x384xf32>
    %cst_30 = arith.constant 5.000000e-01 : f32
    %103 = vector.broadcast %cst_30 : f32 to vector<8x384xf32>
    %104 = arith.addf %102, %103 : vector<8x384xf32>
    %105 = vector.extract_strided_slice %96 {offsets = [0, 384], sizes = [8, 128], strides = [1, 1]} : vector<8x512xf32> to vector<8x128xf32>
    %106 = math.tanh %105 : vector<8x128xf32>
    %107 = vector.extract_strided_slice %104 {offsets = [0, 0], sizes = [8, 128], strides = [1, 1]} : vector<8x384xf32> to vector<8x128xf32>
    %108 = vector.extract_strided_slice %104 {offsets = [0, 128], sizes = [8, 128], strides = [1, 1]} : vector<8x384xf32> to vector<8x128xf32>
    %109 = vector.extract_strided_slice %104 {offsets = [0, 256], sizes = [8, 128], strides = [1, 1]} : vector<8x384xf32> to vector<8x128xf32>
    %110 = arith.mulf %108, %66 : vector<8x128xf32>
    %111 = arith.mulf %107, %106 : vector<8x128xf32>
    %112 = arith.addf %110, %111 : vector<8x128xf32>
    %113 = math.tanh %112 : vector<8x128xf32>
    %114 = arith.mulf %109, %113 : vector<8x128xf32>
    %115 = arith.truncf %114 : vector<8x128xf32> to vector<8x128xbf16>
    %cst_31 = arith.constant dense<0.000000e+00> : vector<8x512xf32>
    %116 = tpu.matmul %115, %18, %cst_31 {dimension_numbers = #tpu.dot_dimension_numbers<[1], [0], [0], [1], [0, 0, 1, 1], [], []>} : vector<8x128xbf16>, vector<128x512xbf16>, vector<8x512xf32> -> vector<8x512xf32>
    %117 = vector.extract_strided_slice %15 {offsets = [16, 0], sizes = [8, 512], strides = [1, 1]} : vector<64x512xf32> to vector<8x512xf32>
    %118 = arith.truncf %92 : vector<8x128xf32> to vector<8x128xbf16>
    %cst_32 = arith.constant dense<0.000000e+00> : vector<8x512xf32>
    %119 = tpu.matmul %118, %16, %cst_32 {dimension_numbers = #tpu.dot_dimension_numbers<[1], [0], [0], [1], [0, 0, 1, 1], [], []>} : vector<8x128xbf16>, vector<128x512xbf16>, vector<8x512xf32> -> vector<8x512xf32>
    %120 = arith.addf %117, %119 : vector<8x512xf32>
    %121 = vector.extract_strided_slice %120 {offsets = [0, 0], sizes = [8, 384], strides = [1, 1]} : vector<8x512xf32> to vector<8x384xf32>
    %cst_33 = arith.constant 5.000000e-01 : f32
    %122 = vector.broadcast %cst_33 : f32 to vector<8x384xf32>
    %123 = arith.mulf %122, %121 : vector<8x384xf32>
    %124 = math.tanh %123 : vector<8x384xf32>
    %cst_34 = arith.constant 5.000000e-01 : f32
    %125 = vector.broadcast %cst_34 : f32 to vector<8x384xf32>
    %126 = arith.mulf %125, %124 : vector<8x384xf32>
    %cst_35 = arith.constant 5.000000e-01 : f32
    %127 = vector.broadcast %cst_35 : f32 to vector<8x384xf32>
    %128 = arith.addf %126, %127 : vector<8x384xf32>
    %129 = vector.extract_strided_slice %120 {offsets = [0, 384], sizes = [8, 128], strides = [1, 1]} : vector<8x512xf32> to vector<8x128xf32>
    %130 = math.tanh %129 : vector<8x128xf32>
    %131 = vector.extract_strided_slice %128 {offsets = [0, 0], sizes = [8, 128], strides = [1, 1]} : vector<8x384xf32> to vector<8x128xf32>
    %132 = vector.extract_strided_slice %128 {offsets = [0, 128], sizes = [8, 128], strides = [1, 1]} : vector<8x384xf32> to vector<8x128xf32>
    %133 = vector.extract_strided_slice %128 {offsets = [0, 256], sizes = [8, 128], strides = [1, 1]} : vector<8x384xf32> to vector<8x128xf32>
    %134 = arith.mulf %132, %90 : vector<8x128xf32>
    %135 = arith.mulf %131, %130 : vector<8x128xf32>
    %136 = arith.addf %134, %135 : vector<8x128xf32>
    %137 = math.tanh %136 : vector<8x128xf32>
    %138 = arith.mulf %133, %137 : vector<8x128xf32>
    %139 = arith.truncf %138 : vector<8x128xf32> to vector<8x128xbf16>
    %cst_36 = arith.constant dense<0.000000e+00> : vector<8x512xf32>
    %140 = tpu.matmul %139, %17, %cst_36 {dimension_numbers = #tpu.dot_dimension_numbers<[1], [0], [0], [1], [0, 0, 1, 1], [], []>} : vector<8x128xbf16>, vector<128x512xbf16>, vector<8x512xf32> -> vector<8x512xf32>
    %141 = arith.addf %116, %140 : vector<8x512xf32>
    %142 = arith.addf %141, %21 : vector<8x512xf32>
    %143 = vector.extract_strided_slice %142 {offsets = [0, 0], sizes = [8, 384], strides = [1, 1]} : vector<8x512xf32> to vector<8x384xf32>
    %cst_37 = arith.constant 5.000000e-01 : f32
    %144 = vector.broadcast %cst_37 : f32 to vector<8x384xf32>
    %145 = arith.mulf %144, %143 : vector<8x384xf32>
    %146 = math.tanh %145 : vector<8x384xf32>
    %cst_38 = arith.constant 5.000000e-01 : f32
    %147 = vector.broadcast %cst_38 : f32 to vector<8x384xf32>
    %148 = arith.mulf %147, %146 : vector<8x384xf32>
    %cst_39 = arith.constant 5.000000e-01 : f32
    %149 = vector.broadcast %cst_39 : f32 to vector<8x384xf32>
    %150 = arith.addf %148, %149 : vector<8x384xf32>
    %151 = vector.extract_strided_slice %142 {offsets = [0, 384], sizes = [8, 128], strides = [1, 1]} : vector<8x512xf32> to vector<8x128xf32>
    %152 = math.tanh %151 : vector<8x128xf32>
    %153 = vector.extract_strided_slice %150 {offsets = [0, 0], sizes = [8, 128], strides = [1, 1]} : vector<8x384xf32> to vector<8x128xf32>
    %154 = vector.extract_strided_slice %150 {offsets = [0, 128], sizes = [8, 128], strides = [1, 1]} : vector<8x384xf32> to vector<8x128xf32>
    %155 = vector.extract_strided_slice %150 {offsets = [0, 256], sizes = [8, 128], strides = [1, 1]} : vector<8x384xf32> to vector<8x128xf32>
    %156 = arith.mulf %154, %112 : vector<8x128xf32>
    %157 = arith.mulf %153, %152 : vector<8x128xf32>
    %158 = arith.addf %156, %157 : vector<8x128xf32>
    %159 = math.tanh %158 : vector<8x128xf32>
    %160 = arith.mulf %155, %159 : vector<8x128xf32>
    %161 = arith.truncf %160 : vector<8x128xf32> to vector<8x128xbf16>
    %cst_40 = arith.constant dense<0.000000e+00> : vector<8x512xf32>
    %162 = tpu.matmul %161, %18, %cst_40 {dimension_numbers = #tpu.dot_dimension_numbers<[1], [0], [0], [1], [0, 0, 1, 1], [], []>} : vector<8x128xbf16>, vector<128x512xbf16>, vector<8x512xf32> -> vector<8x512xf32>
    %163 = vector.extract_strided_slice %15 {offsets = [24, 0], sizes = [8, 512], strides = [1, 1]} : vector<64x512xf32> to vector<8x512xf32>
    %164 = arith.truncf %138 : vector<8x128xf32> to vector<8x128xbf16>
    %cst_41 = arith.constant dense<0.000000e+00> : vector<8x512xf32>
    %165 = tpu.matmul %164, %16, %cst_41 {dimension_numbers = #tpu.dot_dimension_numbers<[1], [0], [0], [1], [0, 0, 1, 1], [], []>} : vector<8x128xbf16>, vector<128x512xbf16>, vector<8x512xf32> -> vector<8x512xf32>
    %166 = arith.addf %163, %165 : vector<8x512xf32>
    %167 = vector.extract_strided_slice %166 {offsets = [0, 0], sizes = [8, 384], strides = [1, 1]} : vector<8x512xf32> to vector<8x384xf32>
    %cst_42 = arith.constant 5.000000e-01 : f32
    %168 = vector.broadcast %cst_42 : f32 to vector<8x384xf32>
    %169 = arith.mulf %168, %167 : vector<8x384xf32>
    %170 = math.tanh %169 : vector<8x384xf32>
    %cst_43 = arith.constant 5.000000e-01 : f32
    %171 = vector.broadcast %cst_43 : f32 to vector<8x384xf32>
    %172 = arith.mulf %171, %170 : vector<8x384xf32>
    %cst_44 = arith.constant 5.000000e-01 : f32
    %173 = vector.broadcast %cst_44 : f32 to vector<8x384xf32>
    %174 = arith.addf %172, %173 : vector<8x384xf32>
    %175 = vector.extract_strided_slice %166 {offsets = [0, 384], sizes = [8, 128], strides = [1, 1]} : vector<8x512xf32> to vector<8x128xf32>
    %176 = math.tanh %175 : vector<8x128xf32>
    %177 = vector.extract_strided_slice %174 {offsets = [0, 0], sizes = [8, 128], strides = [1, 1]} : vector<8x384xf32> to vector<8x128xf32>
    %178 = vector.extract_strided_slice %174 {offsets = [0, 128], sizes = [8, 128], strides = [1, 1]} : vector<8x384xf32> to vector<8x128xf32>
    %179 = vector.extract_strided_slice %174 {offsets = [0, 256], sizes = [8, 128], strides = [1, 1]} : vector<8x384xf32> to vector<8x128xf32>
    %180 = arith.mulf %178, %136 : vector<8x128xf32>
    %181 = arith.mulf %177, %176 : vector<8x128xf32>
    %182 = arith.addf %180, %181 : vector<8x128xf32>
    %183 = math.tanh %182 : vector<8x128xf32>
    %184 = arith.mulf %179, %183 : vector<8x128xf32>
    %185 = arith.truncf %184 : vector<8x128xf32> to vector<8x128xbf16>
    %cst_45 = arith.constant dense<0.000000e+00> : vector<8x512xf32>
    %186 = tpu.matmul %185, %17, %cst_45 {dimension_numbers = #tpu.dot_dimension_numbers<[1], [0], [0], [1], [0, 0, 1, 1], [], []>} : vector<8x128xbf16>, vector<128x512xbf16>, vector<8x512xf32> -> vector<8x512xf32>
    %187 = arith.addf %162, %186 : vector<8x512xf32>
    %188 = arith.addf %187, %21 : vector<8x512xf32>
    %189 = vector.extract_strided_slice %188 {offsets = [0, 0], sizes = [8, 384], strides = [1, 1]} : vector<8x512xf32> to vector<8x384xf32>
    %cst_46 = arith.constant 5.000000e-01 : f32
    %190 = vector.broadcast %cst_46 : f32 to vector<8x384xf32>
    %191 = arith.mulf %190, %189 : vector<8x384xf32>
    %192 = math.tanh %191 : vector<8x384xf32>
    %cst_47 = arith.constant 5.000000e-01 : f32
    %193 = vector.broadcast %cst_47 : f32 to vector<8x384xf32>
    %194 = arith.mulf %193, %192 : vector<8x384xf32>
    %cst_48 = arith.constant 5.000000e-01 : f32
    %195 = vector.broadcast %cst_48 : f32 to vector<8x384xf32>
    %196 = arith.addf %194, %195 : vector<8x384xf32>
    %197 = vector.extract_strided_slice %188 {offsets = [0, 384], sizes = [8, 128], strides = [1, 1]} : vector<8x512xf32> to vector<8x128xf32>
    %198 = math.tanh %197 : vector<8x128xf32>
    %199 = vector.extract_strided_slice %196 {offsets = [0, 0], sizes = [8, 128], strides = [1, 1]} : vector<8x384xf32> to vector<8x128xf32>
    %200 = vector.extract_strided_slice %196 {offsets = [0, 128], sizes = [8, 128], strides = [1, 1]} : vector<8x384xf32> to vector<8x128xf32>
    %201 = vector.extract_strided_slice %196 {offsets = [0, 256], sizes = [8, 128], strides = [1, 1]} : vector<8x384xf32> to vector<8x128xf32>
    %202 = arith.mulf %200, %158 : vector<8x128xf32>
    %203 = arith.mulf %199, %198 : vector<8x128xf32>
    %204 = arith.addf %202, %203 : vector<8x128xf32>
    %205 = math.tanh %204 : vector<8x128xf32>
    %206 = arith.mulf %201, %205 : vector<8x128xf32>
    %207 = arith.truncf %206 : vector<8x128xf32> to vector<8x128xbf16>
    %cst_49 = arith.constant dense<0.000000e+00> : vector<8x512xf32>
    %208 = tpu.matmul %207, %18, %cst_49 {dimension_numbers = #tpu.dot_dimension_numbers<[1], [0], [0], [1], [0, 0, 1, 1], [], []>} : vector<8x128xbf16>, vector<128x512xbf16>, vector<8x512xf32> -> vector<8x512xf32>
    %209 = vector.extract_strided_slice %15 {offsets = [32, 0], sizes = [8, 512], strides = [1, 1]} : vector<64x512xf32> to vector<8x512xf32>
    %210 = arith.truncf %184 : vector<8x128xf32> to vector<8x128xbf16>
    %cst_50 = arith.constant dense<0.000000e+00> : vector<8x512xf32>
    %211 = tpu.matmul %210, %16, %cst_50 {dimension_numbers = #tpu.dot_dimension_numbers<[1], [0], [0], [1], [0, 0, 1, 1], [], []>} : vector<8x128xbf16>, vector<128x512xbf16>, vector<8x512xf32> -> vector<8x512xf32>
    %212 = arith.addf %209, %211 : vector<8x512xf32>
    %213 = vector.extract_strided_slice %212 {offsets = [0, 0], sizes = [8, 384], strides = [1, 1]} : vector<8x512xf32> to vector<8x384xf32>
    %cst_51 = arith.constant 5.000000e-01 : f32
    %214 = vector.broadcast %cst_51 : f32 to vector<8x384xf32>
    %215 = arith.mulf %214, %213 : vector<8x384xf32>
    %216 = math.tanh %215 : vector<8x384xf32>
    %cst_52 = arith.constant 5.000000e-01 : f32
    %217 = vector.broadcast %cst_52 : f32 to vector<8x384xf32>
    %218 = arith.mulf %217, %216 : vector<8x384xf32>
    %cst_53 = arith.constant 5.000000e-01 : f32
    %219 = vector.broadcast %cst_53 : f32 to vector<8x384xf32>
    %220 = arith.addf %218, %219 : vector<8x384xf32>
    %221 = vector.extract_strided_slice %212 {offsets = [0, 384], sizes = [8, 128], strides = [1, 1]} : vector<8x512xf32> to vector<8x128xf32>
    %222 = math.tanh %221 : vector<8x128xf32>
    %223 = vector.extract_strided_slice %220 {offsets = [0, 0], sizes = [8, 128], strides = [1, 1]} : vector<8x384xf32> to vector<8x128xf32>
    %224 = vector.extract_strided_slice %220 {offsets = [0, 128], sizes = [8, 128], strides = [1, 1]} : vector<8x384xf32> to vector<8x128xf32>
    %225 = vector.extract_strided_slice %220 {offsets = [0, 256], sizes = [8, 128], strides = [1, 1]} : vector<8x384xf32> to vector<8x128xf32>
    %226 = arith.mulf %224, %182 : vector<8x128xf32>
    %227 = arith.mulf %223, %222 : vector<8x128xf32>
    %228 = arith.addf %226, %227 : vector<8x128xf32>
    %229 = math.tanh %228 : vector<8x128xf32>
    %230 = arith.mulf %225, %229 : vector<8x128xf32>
    %231 = arith.truncf %230 : vector<8x128xf32> to vector<8x128xbf16>
    %cst_54 = arith.constant dense<0.000000e+00> : vector<8x512xf32>
    %232 = tpu.matmul %231, %17, %cst_54 {dimension_numbers = #tpu.dot_dimension_numbers<[1], [0], [0], [1], [0, 0, 1, 1], [], []>} : vector<8x128xbf16>, vector<128x512xbf16>, vector<8x512xf32> -> vector<8x512xf32>
    %233 = arith.addf %208, %232 : vector<8x512xf32>
    %234 = arith.addf %233, %21 : vector<8x512xf32>
    %235 = vector.extract_strided_slice %234 {offsets = [0, 0], sizes = [8, 384], strides = [1, 1]} : vector<8x512xf32> to vector<8x384xf32>
    %cst_55 = arith.constant 5.000000e-01 : f32
    %236 = vector.broadcast %cst_55 : f32 to vector<8x384xf32>
    %237 = arith.mulf %236, %235 : vector<8x384xf32>
    %238 = math.tanh %237 : vector<8x384xf32>
    %cst_56 = arith.constant 5.000000e-01 : f32
    %239 = vector.broadcast %cst_56 : f32 to vector<8x384xf32>
    %240 = arith.mulf %239, %238 : vector<8x384xf32>
    %cst_57 = arith.constant 5.000000e-01 : f32
    %241 = vector.broadcast %cst_57 : f32 to vector<8x384xf32>
    %242 = arith.addf %240, %241 : vector<8x384xf32>
    %243 = vector.extract_strided_slice %234 {offsets = [0, 384], sizes = [8, 128], strides = [1, 1]} : vector<8x512xf32> to vector<8x128xf32>
    %244 = math.tanh %243 : vector<8x128xf32>
    %245 = vector.extract_strided_slice %242 {offsets = [0, 0], sizes = [8, 128], strides = [1, 1]} : vector<8x384xf32> to vector<8x128xf32>
    %246 = vector.extract_strided_slice %242 {offsets = [0, 128], sizes = [8, 128], strides = [1, 1]} : vector<8x384xf32> to vector<8x128xf32>
    %247 = vector.extract_strided_slice %242 {offsets = [0, 256], sizes = [8, 128], strides = [1, 1]} : vector<8x384xf32> to vector<8x128xf32>
    %248 = arith.mulf %246, %204 : vector<8x128xf32>
    %249 = arith.mulf %245, %244 : vector<8x128xf32>
    %250 = arith.addf %248, %249 : vector<8x128xf32>
    %251 = math.tanh %250 : vector<8x128xf32>
    %252 = arith.mulf %247, %251 : vector<8x128xf32>
    %253 = arith.truncf %252 : vector<8x128xf32> to vector<8x128xbf16>
    %cst_58 = arith.constant dense<0.000000e+00> : vector<8x512xf32>
    %254 = tpu.matmul %253, %18, %cst_58 {dimension_numbers = #tpu.dot_dimension_numbers<[1], [0], [0], [1], [0, 0, 1, 1], [], []>} : vector<8x128xbf16>, vector<128x512xbf16>, vector<8x512xf32> -> vector<8x512xf32>
    %255 = vector.extract_strided_slice %15 {offsets = [40, 0], sizes = [8, 512], strides = [1, 1]} : vector<64x512xf32> to vector<8x512xf32>
    %256 = arith.truncf %230 : vector<8x128xf32> to vector<8x128xbf16>
    %cst_59 = arith.constant dense<0.000000e+00> : vector<8x512xf32>
    %257 = tpu.matmul %256, %16, %cst_59 {dimension_numbers = #tpu.dot_dimension_numbers<[1], [0], [0], [1], [0, 0, 1, 1], [], []>} : vector<8x128xbf16>, vector<128x512xbf16>, vector<8x512xf32> -> vector<8x512xf32>
    %258 = arith.addf %255, %257 : vector<8x512xf32>
    %259 = vector.extract_strided_slice %258 {offsets = [0, 0], sizes = [8, 384], strides = [1, 1]} : vector<8x512xf32> to vector<8x384xf32>
    %cst_60 = arith.constant 5.000000e-01 : f32
    %260 = vector.broadcast %cst_60 : f32 to vector<8x384xf32>
    %261 = arith.mulf %260, %259 : vector<8x384xf32>
    %262 = math.tanh %261 : vector<8x384xf32>
    %cst_61 = arith.constant 5.000000e-01 : f32
    %263 = vector.broadcast %cst_61 : f32 to vector<8x384xf32>
    %264 = arith.mulf %263, %262 : vector<8x384xf32>
    %cst_62 = arith.constant 5.000000e-01 : f32
    %265 = vector.broadcast %cst_62 : f32 to vector<8x384xf32>
    %266 = arith.addf %264, %265 : vector<8x384xf32>
    %267 = vector.extract_strided_slice %258 {offsets = [0, 384], sizes = [8, 128], strides = [1, 1]} : vector<8x512xf32> to vector<8x128xf32>
    %268 = math.tanh %267 : vector<8x128xf32>
    %269 = vector.extract_strided_slice %266 {offsets = [0, 0], sizes = [8, 128], strides = [1, 1]} : vector<8x384xf32> to vector<8x128xf32>
    %270 = vector.extract_strided_slice %266 {offsets = [0, 128], sizes = [8, 128], strides = [1, 1]} : vector<8x384xf32> to vector<8x128xf32>
    %271 = vector.extract_strided_slice %266 {offsets = [0, 256], sizes = [8, 128], strides = [1, 1]} : vector<8x384xf32> to vector<8x128xf32>
    %272 = arith.mulf %270, %228 : vector<8x128xf32>
    %273 = arith.mulf %269, %268 : vector<8x128xf32>
    %274 = arith.addf %272, %273 : vector<8x128xf32>
    %275 = math.tanh %274 : vector<8x128xf32>
    %276 = arith.mulf %271, %275 : vector<8x128xf32>
    %277 = arith.truncf %276 : vector<8x128xf32> to vector<8x128xbf16>
    %cst_63 = arith.constant dense<0.000000e+00> : vector<8x512xf32>
    %278 = tpu.matmul %277, %17, %cst_63 {dimension_numbers = #tpu.dot_dimension_numbers<[1], [0], [0], [1], [0, 0, 1, 1], [], []>} : vector<8x128xbf16>, vector<128x512xbf16>, vector<8x512xf32> -> vector<8x512xf32>
    %279 = arith.addf %254, %278 : vector<8x512xf32>
    %280 = arith.addf %279, %21 : vector<8x512xf32>
    %281 = vector.extract_strided_slice %280 {offsets = [0, 0], sizes = [8, 384], strides = [1, 1]} : vector<8x512xf32> to vector<8x384xf32>
    %cst_64 = arith.constant 5.000000e-01 : f32
    %282 = vector.broadcast %cst_64 : f32 to vector<8x384xf32>
    %283 = arith.mulf %282, %281 : vector<8x384xf32>
    %284 = math.tanh %283 : vector<8x384xf32>
    %cst_65 = arith.constant 5.000000e-01 : f32
    %285 = vector.broadcast %cst_65 : f32 to vector<8x384xf32>
    %286 = arith.mulf %285, %284 : vector<8x384xf32>
    %cst_66 = arith.constant 5.000000e-01 : f32
    %287 = vector.broadcast %cst_66 : f32 to vector<8x384xf32>
    %288 = arith.addf %286, %287 : vector<8x384xf32>
    %289 = vector.extract_strided_slice %280 {offsets = [0, 384], sizes = [8, 128], strides = [1, 1]} : vector<8x512xf32> to vector<8x128xf32>
    %290 = math.tanh %289 : vector<8x128xf32>
    %291 = vector.extract_strided_slice %288 {offsets = [0, 0], sizes = [8, 128], strides = [1, 1]} : vector<8x384xf32> to vector<8x128xf32>
    %292 = vector.extract_strided_slice %288 {offsets = [0, 128], sizes = [8, 128], strides = [1, 1]} : vector<8x384xf32> to vector<8x128xf32>
    %293 = vector.extract_strided_slice %288 {offsets = [0, 256], sizes = [8, 128], strides = [1, 1]} : vector<8x384xf32> to vector<8x128xf32>
    %294 = arith.mulf %292, %250 : vector<8x128xf32>
    %295 = arith.mulf %291, %290 : vector<8x128xf32>
    %296 = arith.addf %294, %295 : vector<8x128xf32>
    %297 = math.tanh %296 : vector<8x128xf32>
    %298 = arith.mulf %293, %297 : vector<8x128xf32>
    %299 = arith.truncf %298 : vector<8x128xf32> to vector<8x128xbf16>
    %cst_67 = arith.constant dense<0.000000e+00> : vector<8x512xf32>
    %300 = tpu.matmul %299, %18, %cst_67 {dimension_numbers = #tpu.dot_dimension_numbers<[1], [0], [0], [1], [0, 0, 1, 1], [], []>} : vector<8x128xbf16>, vector<128x512xbf16>, vector<8x512xf32> -> vector<8x512xf32>
    %301 = vector.extract_strided_slice %15 {offsets = [48, 0], sizes = [8, 512], strides = [1, 1]} : vector<64x512xf32> to vector<8x512xf32>
    %302 = arith.truncf %276 : vector<8x128xf32> to vector<8x128xbf16>
    %cst_68 = arith.constant dense<0.000000e+00> : vector<8x512xf32>
    %303 = tpu.matmul %302, %16, %cst_68 {dimension_numbers = #tpu.dot_dimension_numbers<[1], [0], [0], [1], [0, 0, 1, 1], [], []>} : vector<8x128xbf16>, vector<128x512xbf16>, vector<8x512xf32> -> vector<8x512xf32>
    %304 = arith.addf %301, %303 : vector<8x512xf32>
    %305 = vector.extract_strided_slice %304 {offsets = [0, 0], sizes = [8, 384], strides = [1, 1]} : vector<8x512xf32> to vector<8x384xf32>
    %cst_69 = arith.constant 5.000000e-01 : f32
    %306 = vector.broadcast %cst_69 : f32 to vector<8x384xf32>
    %307 = arith.mulf %306, %305 : vector<8x384xf32>
    %308 = math.tanh %307 : vector<8x384xf32>
    %cst_70 = arith.constant 5.000000e-01 : f32
    %309 = vector.broadcast %cst_70 : f32 to vector<8x384xf32>
    %310 = arith.mulf %309, %308 : vector<8x384xf32>
    %cst_71 = arith.constant 5.000000e-01 : f32
    %311 = vector.broadcast %cst_71 : f32 to vector<8x384xf32>
    %312 = arith.addf %310, %311 : vector<8x384xf32>
    %313 = vector.extract_strided_slice %304 {offsets = [0, 384], sizes = [8, 128], strides = [1, 1]} : vector<8x512xf32> to vector<8x128xf32>
    %314 = math.tanh %313 : vector<8x128xf32>
    %315 = vector.extract_strided_slice %312 {offsets = [0, 0], sizes = [8, 128], strides = [1, 1]} : vector<8x384xf32> to vector<8x128xf32>
    %316 = vector.extract_strided_slice %312 {offsets = [0, 128], sizes = [8, 128], strides = [1, 1]} : vector<8x384xf32> to vector<8x128xf32>
    %317 = vector.extract_strided_slice %312 {offsets = [0, 256], sizes = [8, 128], strides = [1, 1]} : vector<8x384xf32> to vector<8x128xf32>
    %318 = arith.mulf %316, %274 : vector<8x128xf32>
    %319 = arith.mulf %315, %314 : vector<8x128xf32>
    %320 = arith.addf %318, %319 : vector<8x128xf32>
    %321 = math.tanh %320 : vector<8x128xf32>
    %322 = arith.mulf %317, %321 : vector<8x128xf32>
    %323 = arith.truncf %322 : vector<8x128xf32> to vector<8x128xbf16>
    %cst_72 = arith.constant dense<0.000000e+00> : vector<8x512xf32>
    %324 = tpu.matmul %323, %17, %cst_72 {dimension_numbers = #tpu.dot_dimension_numbers<[1], [0], [0], [1], [0, 0, 1, 1], [], []>} : vector<8x128xbf16>, vector<128x512xbf16>, vector<8x512xf32> -> vector<8x512xf32>
    %325 = arith.addf %300, %324 : vector<8x512xf32>
    %326 = arith.addf %325, %21 : vector<8x512xf32>
    %327 = vector.extract_strided_slice %326 {offsets = [0, 0], sizes = [8, 384], strides = [1, 1]} : vector<8x512xf32> to vector<8x384xf32>
    %cst_73 = arith.constant 5.000000e-01 : f32
    %328 = vector.broadcast %cst_73 : f32 to vector<8x384xf32>
    %329 = arith.mulf %328, %327 : vector<8x384xf32>
    %330 = math.tanh %329 : vector<8x384xf32>
    %cst_74 = arith.constant 5.000000e-01 : f32
    %331 = vector.broadcast %cst_74 : f32 to vector<8x384xf32>
    %332 = arith.mulf %331, %330 : vector<8x384xf32>
    %cst_75 = arith.constant 5.000000e-01 : f32
    %333 = vector.broadcast %cst_75 : f32 to vector<8x384xf32>
    %334 = arith.addf %332, %333 : vector<8x384xf32>
    %335 = vector.extract_strided_slice %326 {offsets = [0, 384], sizes = [8, 128], strides = [1, 1]} : vector<8x512xf32> to vector<8x128xf32>
    %336 = math.tanh %335 : vector<8x128xf32>
    %337 = vector.extract_strided_slice %334 {offsets = [0, 0], sizes = [8, 128], strides = [1, 1]} : vector<8x384xf32> to vector<8x128xf32>
    %338 = vector.extract_strided_slice %334 {offsets = [0, 128], sizes = [8, 128], strides = [1, 1]} : vector<8x384xf32> to vector<8x128xf32>
    %339 = vector.extract_strided_slice %334 {offsets = [0, 256], sizes = [8, 128], strides = [1, 1]} : vector<8x384xf32> to vector<8x128xf32>
    %340 = arith.mulf %338, %296 : vector<8x128xf32>
    %341 = arith.mulf %337, %336 : vector<8x128xf32>
    %342 = arith.addf %340, %341 : vector<8x128xf32>
    %343 = math.tanh %342 : vector<8x128xf32>
    %344 = arith.mulf %339, %343 : vector<8x128xf32>
    %345 = arith.truncf %344 : vector<8x128xf32> to vector<8x128xbf16>
    %cst_76 = arith.constant dense<0.000000e+00> : vector<8x512xf32>
    %346 = tpu.matmul %345, %18, %cst_76 {dimension_numbers = #tpu.dot_dimension_numbers<[1], [0], [0], [1], [0, 0, 1, 1], [], []>} : vector<8x128xbf16>, vector<128x512xbf16>, vector<8x512xf32> -> vector<8x512xf32>
    %347 = vector.extract_strided_slice %15 {offsets = [56, 0], sizes = [8, 512], strides = [1, 1]} : vector<64x512xf32> to vector<8x512xf32>
    %348 = arith.truncf %322 : vector<8x128xf32> to vector<8x128xbf16>
    %cst_77 = arith.constant dense<0.000000e+00> : vector<8x512xf32>
    %349 = tpu.matmul %348, %16, %cst_77 {dimension_numbers = #tpu.dot_dimension_numbers<[1], [0], [0], [1], [0, 0, 1, 1], [], []>} : vector<8x128xbf16>, vector<128x512xbf16>, vector<8x512xf32> -> vector<8x512xf32>
    %350 = arith.addf %347, %349 : vector<8x512xf32>
    %351 = vector.extract_strided_slice %350 {offsets = [0, 0], sizes = [8, 384], strides = [1, 1]} : vector<8x512xf32> to vector<8x384xf32>
    %cst_78 = arith.constant 5.000000e-01 : f32
    %352 = vector.broadcast %cst_78 : f32 to vector<8x384xf32>
    %353 = arith.mulf %352, %351 : vector<8x384xf32>
    %354 = math.tanh %353 : vector<8x384xf32>
    %cst_79 = arith.constant 5.000000e-01 : f32
    %355 = vector.broadcast %cst_79 : f32 to vector<8x384xf32>
    %356 = arith.mulf %355, %354 : vector<8x384xf32>
    %cst_80 = arith.constant 5.000000e-01 : f32
    %357 = vector.broadcast %cst_80 : f32 to vector<8x384xf32>
    %358 = arith.addf %356, %357 : vector<8x384xf32>
    %359 = vector.extract_strided_slice %350 {offsets = [0, 384], sizes = [8, 128], strides = [1, 1]} : vector<8x512xf32> to vector<8x128xf32>
    %360 = math.tanh %359 : vector<8x128xf32>
    %361 = vector.extract_strided_slice %358 {offsets = [0, 0], sizes = [8, 128], strides = [1, 1]} : vector<8x384xf32> to vector<8x128xf32>
    %362 = vector.extract_strided_slice %358 {offsets = [0, 128], sizes = [8, 128], strides = [1, 1]} : vector<8x384xf32> to vector<8x128xf32>
    %363 = vector.extract_strided_slice %358 {offsets = [0, 256], sizes = [8, 128], strides = [1, 1]} : vector<8x384xf32> to vector<8x128xf32>
    %364 = arith.mulf %362, %320 : vector<8x128xf32>
    %365 = arith.mulf %361, %360 : vector<8x128xf32>
    %366 = arith.addf %364, %365 : vector<8x128xf32>
    %367 = math.tanh %366 : vector<8x128xf32>
    %368 = arith.mulf %363, %367 : vector<8x128xf32>
    %369 = arith.truncf %368 : vector<8x128xf32> to vector<8x128xbf16>
    %cst_81 = arith.constant dense<0.000000e+00> : vector<8x512xf32>
    %370 = tpu.matmul %369, %17, %cst_81 {dimension_numbers = #tpu.dot_dimension_numbers<[1], [0], [0], [1], [0, 0, 1, 1], [], []>} : vector<8x128xbf16>, vector<128x512xbf16>, vector<8x512xf32> -> vector<8x512xf32>
    %371 = arith.addf %346, %370 : vector<8x512xf32>
    %372 = arith.addf %371, %21 : vector<8x512xf32>
    %373 = vector.extract_strided_slice %372 {offsets = [0, 0], sizes = [8, 384], strides = [1, 1]} : vector<8x512xf32> to vector<8x384xf32>
    %cst_82 = arith.constant 5.000000e-01 : f32
    %374 = vector.broadcast %cst_82 : f32 to vector<8x384xf32>
    %375 = arith.mulf %374, %373 : vector<8x384xf32>
    %376 = math.tanh %375 : vector<8x384xf32>
    %cst_83 = arith.constant 5.000000e-01 : f32
    %377 = vector.broadcast %cst_83 : f32 to vector<8x384xf32>
    %378 = arith.mulf %377, %376 : vector<8x384xf32>
    %cst_84 = arith.constant 5.000000e-01 : f32
    %379 = vector.broadcast %cst_84 : f32 to vector<8x384xf32>
    %380 = arith.addf %378, %379 : vector<8x384xf32>
    %381 = vector.extract_strided_slice %372 {offsets = [0, 384], sizes = [8, 128], strides = [1, 1]} : vector<8x512xf32> to vector<8x128xf32>
    %382 = math.tanh %381 : vector<8x128xf32>
    %383 = vector.extract_strided_slice %380 {offsets = [0, 0], sizes = [8, 128], strides = [1, 1]} : vector<8x384xf32> to vector<8x128xf32>
    %384 = vector.extract_strided_slice %380 {offsets = [0, 128], sizes = [8, 128], strides = [1, 1]} : vector<8x384xf32> to vector<8x128xf32>
    %385 = vector.extract_strided_slice %380 {offsets = [0, 256], sizes = [8, 128], strides = [1, 1]} : vector<8x384xf32> to vector<8x128xf32>
    %386 = arith.mulf %384, %342 : vector<8x128xf32>
    %387 = arith.mulf %383, %382 : vector<8x128xf32>
    %388 = arith.addf %386, %387 : vector<8x128xf32>
    %389 = math.tanh %388 : vector<8x128xf32>
    %390 = arith.mulf %385, %389 : vector<8x128xf32>
    %c0_85 = arith.constant 0 : index
    %c0_86 = arith.constant 0 : index
    %391 = vector.load %arg10[%c0_85, %c0_86] : memref<8x128xf32, #tpu.memory_space<vmem>>, vector<8x128xf32>
    tpu.vector_store %arg10[%c0_85, %c0_86], %390 {strides = array<i32>} : memref<8x128xf32, #tpu.memory_space<vmem>>, vector<8x128xf32>,
    %392 = arith.truncf %390 : vector<8x128xf32> to vector<8x128xbf16>
    %c0_87 = arith.constant 0 : index
    %c0_88 = arith.constant 0 : index
    %393 = vector.load %arg7[%c0_87, %c0_88] : memref<128x128xbf16, #tpu.memory_space<vmem>>, vector<128x128xbf16>
    %cst_89 = arith.constant dense<0.000000e+00> : vector<8x128xf32>
    %394 = tpu.matmul %392, %393, %cst_89 {dimension_numbers = #tpu.dot_dimension_numbers<[1], [0], [0], [1], [0, 0, 1, 1], [], []>} : vector<8x128xbf16>, vector<128x128xbf16>, vector<8x128xf32> -> vector<8x128xf32>
    %c0_90 = arith.constant 0 : index
    %c0_91 = arith.constant 0 : index
    %395 = vector.load %arg8[%c0_90, %c0_91] : memref<1x128xf32, #tpu.memory_space<vmem>>, vector<1x128xf32>
    %396 = vector.broadcast %395 : vector<1x128xf32> to vector<8x128xf32>
    %397 = arith.addf %394, %396 : vector<8x128xf32>
    %c0_92 = arith.constant 0 : index
    %c0_93 = arith.constant 0 : index
    %398 = vector.load %arg9[%c0_92, %c0_93] : memref<8x128xf32, #tpu.memory_space<vmem>>, vector<8x128xf32>
    tpu.vector_store %arg9[%c0_92, %c0_93], %397 {strides = array<i32>} : memref<8x128xf32, #tpu.memory_space<vmem>>, vector<8x128xf32>,
    return
  }
}

</mosaic_0001>

<bundles_post_ra>
// kernel: tpu_custom_call.1
= control target key start
LH: loop header
LB: loop body
LE: loop exit
PB: predicated region body
PF: predicated region fallthrough
CT: control target
= control target key end

     0   :  { %16 = vsyncpa [#allocation3], 0  ;;  %s4942_s0 = inlined_call_operand.vmem [shape: f32[64,2], index: 0, kind: input, shape index: {}]   ;;  %s4943_s1 = inlined_call_operand.vmem [shape: f32[2,512], index: 1, kind: input, shape index: {}]   ;;  %s4944_s2 = inlined_call_operand.hbm [shape: f32[1,512], index: 2, kind: input, shape index: {}]   ;;  %s4945_s3 = inlined_call_operand.hbm [shape: bf16[128,512], index: 3, kind: input, shape index: {}]   ;;  %s4946_s4 = inlined_call_operand.hbm [shape: bf16[128,512], index: 4, kind: input, shape index: {}]   ;;  %s4947_s5 = inlined_call_operand.hbm [shape: bf16[128,512], index: 5, kind: input, shape index: {}]   ;;  %s4948_s6 = inlined_call_operand.hbm [shape: f32[1,512], index: 6, kind: input, shape index: {}]   ;;  %s4949_s7 = inlined_call_operand.vmem [shape: bf16[128,128], index: 7, kind: input, shape index: {}]   ;;  %s4950_s8 = inlined_call_operand.vmem [shape: f32[1,128], index: 8, kind: input, shape index: {}]   ;;  %s4951_s9 = inlined_call_operand.hbm [shape: f32[8,128], index: 9, kind: output, shape index: {0}]   ;;  %s4952_s10 = inlined_call_operand.hbm [shape: f32[8,128], index: 10, kind: output, shape index: {1}]  }
   0x1   :  { %17 = vsyncpa [#allocation6], 0 }
   0x2   :  { %18 = vsyncpa [#allocation9], 0 }
   0x3   :  { %19 = vsyncpa [#allocation4], 0  ;;  %s40_s15 = sshll.u32 %s4945_s3, 4  ;;  %s41_s15 = int_to_ptr.hbm [resolvable:$true] %s40_s15 }
   0x4   :  { %20 = vsyncpa [#allocation13], 0  ;;  %s3558_s16 = smov [#allocation5]   ;;  %s66_s20 = sshll.u32 %s4947_s5, 4  ;;  %s67_s20 = int_to_ptr.hbm [resolvable:$true] %s66_s20 }
   0x5   :  { %s42_s17 = sshll.u32 %s3558_s16, 4  ;;  %s3559_s21 = smov 256   ;;  %s43_s17 = int_to_ptr.vmem [resolvable:$true] %s42_s17 }
   0x6   :  { %s3560_s22 = smov 16   ;;  %s3561_s23 = smov [#allocation8]  }
   0x7   :  { %48 = dma.hbm_to_vmem [thread:$0]  %s41_s15, 4096, %s43_s17, [#allocation6], %s3559_s21, %s3559_s21, %s3560_s22  }
   0x8   :  { %s68_s24 = sshll.u32 %s3561_s23, 4  ;;  %s30_s27 = sshll.u32 %s4944_s2, 4  ;;  %s69_s24 = int_to_ptr.vmem [resolvable:$true] %s68_s24  ;;  %s31_s27 = int_to_ptr.hbm [resolvable:$true] %s30_s27 }
   0x9   :  { %74 = dma.hbm_to_vmem [thread:$0]  %s67_s20, 4096, %s69_s24, [#allocation9], %s3559_s21, %s3559_s21, %s3560_s22  }
   0xa   :  { %s53_s29 = sshll.u32 %s4946_s4, 4  ;;  %s3562_s30 = smov [#allocation2]   ;;  %s54_s29 = int_to_ptr.hbm [resolvable:$true] %s53_s29 }
   0xb   :  { %s32_s11 = sshll.u32 %s3562_s30, 4  ;;  %s3563_s5 = smov [#allocation7]   ;;  %s33_s11 = int_to_ptr.vmem [resolvable:$true] %s32_s11 }
   0xc   :  { %35 = dma.hbm_to_vmem [thread:$0]  %s31_s27, 64, %s33_s11, [#allocation3]  }
   0xd   :  { %s55_s12 = sshll.u32 %s3563_s5, 4  ;;  %s80_s15 = sshll.u32 %s4948_s6, 4  ;;  %s56_s12 = int_to_ptr.vmem [resolvable:$true] %s55_s12  ;;  %s81_s15 = int_to_ptr.hbm [resolvable:$true] %s80_s15 }
   0xe   :  { %61 = dma.hbm_to_vmem [thread:$0]  %s54_s29, 4096, %s56_s12, [#allocation6], %s3559_s21, %s3559_s21, %s3560_s22  }
   0xf   :  { %s3564_s2 = smov [#allocation10]  }
  0x10   :  { %s82_s16 = sshll.u32 %s3564_s2, 4  ;;  %s83_s16 = int_to_ptr.vmem [resolvable:$true] %s82_s16 }
  0x11   :  { %85 = dma.hbm_to_vmem [thread:$0]  %s81_s15, 64, %s83_s16, [#allocation9]  }
  0x12   :  { %3548 = dma.done.wait [#allocation3], 64  }
  0x13   :  { %3549 = vsyncadd [#allocation3], 4294967232 }
  0x14   :  { %3550 = dma.done.wait [#allocation6], 8192  }
  0x15   :  { %3551 = vsyncadd [#allocation6], 4294959104 }
  0x16   :  { %3552 = dma.done.wait [#allocation9], 4160  }
  0x17   :  { %3553 = vsyncadd [#allocation9], 4294963136  ;;  %v4953_v0 = vmov 0   ;;  %v2789_v1 = vld [vmem:[#allocation5 + $0xe0] sm:$0xf]  ;;  %s2658_s24 = sshll.u32 %s4952_s10, 4  ;;  %s2659_s24 = int_to_ptr.hbm [resolvable:$true] %s2658_s24 }
  0x18   :  { %3206 = vset.pattern.permute.xlu0 %v4953_v0  ;;  %3208 = vset.pattern.permute.xlu1 %v4953_v0  ;;  %v3121_v2 = vld [vmem:[#allocation5 + $0xec] sm:$0xf0]  ;;  %v3119_v3 = vld [vmem:[#allocation5 + $0xe4] sm:$0xf]  ;;  %v2791_v5 = vld [vmem:[#allocation5 + $0xf0] sm:$0xf0] }
  0x19   :  { %3210 = vset.pattern.permute.xlu2 %v4953_v0  ;;  %v3642_v4 = vor.u32 %v3121_v2, %v2789_v1  ;;  %v2797_v6 = vld [vmem:[#allocation5 + $0xe8] sm:$0xf]  ;;  %v3122_v7 = vld [vmem:[#allocation5 + $0xf4] sm:$0xf0]  ;;  %v3644_v8 = vor.u32 %v3119_v3, %v2791_v5  ;;  %v3120_v10 = vld [vmem:[#allocation5 + $0xec] sm:$0xf] }
  0x1a   :  { %v3646_v9 = vor.u32 %v3122_v7, %v2797_v6  ;;  %v2799_v11 = vld [vmem:[#allocation5 + $0xf8] sm:$0xf0]  ;;  %v2773_v12 = vld [vmem:[#allocation5 + $0xc0] sm:$0xf]  ;;  %v3117_v14 = vld [vmem:[#allocation5 + $0xcc] sm:$0xf0] }
  0x1b   :  { %621 = vmatpush.bf16.msra.mxu0 %v3642_v4  ;;  %v3649_v13 = vor.u32 %v3120_v10, %v2799_v11  ;;  %v3115_v15 = vld [vmem:[#allocation5 + $0xc4] sm:$0xf]  ;;  %v2775_v16 = vld [vmem:[#allocation5 + $0xd0] sm:$0xf0]  ;;  %634 = vmatpush.bf16.msra.mxu1 %v3644_v8  ;;  %v3653_v17 = vor.u32 %v3117_v14, %v2773_v12  ;;  %v2781_v19 = vld [vmem:[#allocation5 + $0xc8] sm:$0xf] }
  0x1c   :  { %647 = vmatpush.bf16.msra.mxu2 %v3646_v9  ;;  %v3655_v18 = vor.u32 %v3115_v15, %v2775_v16  ;;  %v3118_v20 = vld [vmem:[#allocation5 + $0xd4] sm:$0xf0]  ;;  %v3116_v21 = vld [vmem:[#allocation5 + $0xcc] sm:$0xf]  ;;  %v2783_v23 = vld [vmem:[#allocation5 + $0xd8] sm:$0xf0] }
  0x1d   :  { %660 = vmatpush.bf16.msra.mxu3 %v3649_v13  ;;  %v3658_v22 = vor.u32 %v3118_v20, %v2781_v19  ;;  %v2757_v24 = vld [vmem:[#allocation5 + $0xa0] sm:$0xf]  ;;  %v3113_v25 = vld [vmem:[#allocation5 + $0xac] sm:$0xf0]  ;;  %v3660_v26 = vor.u32 %v3116_v21, %v2783_v23  ;;  %v3111_v27 = vld [vmem:[#allocation5 + $0xa4] sm:$0xf] }
  0x1e   :  { %v2759_v28 = vld [vmem:[#allocation5 + $0xb0] sm:$0xf0]  ;;  %v2765_v29 = vld [vmem:[#allocation5 + $0xa8] sm:$0xf]  ;;  %v3663_v30 = vor.u32 %v3113_v25, %v2757_v24  ;;  %v3114_v31 = vld [vmem:[#allocation5 + $0xb4] sm:$0xf0] }
  0x1f   :  { %622 = vmatpush.bf16.msra.mxu0 %v3653_v17  ;;  %v3112_v32 = vld [vmem:[#allocation5 + $0xac] sm:$0xf]  ;;  %v2767_v33 = vld [vmem:[#allocation5 + $0xb8] sm:$0xf0]  ;;  %635 = vmatpush.bf16.msra.mxu1 %v3655_v18  ;;  %v3667_v34 = vor.u32 %v3111_v27, %v2759_v28  ;;  %v3669_v35 = vor.u32 %v3114_v31, %v2765_v29  ;;  %v2741_v36 = vld [vmem:[#allocation5 + $0x80] sm:$0xf] }
  0x20   :  { %648 = vmatpush.bf16.msra.mxu2 %v3658_v22  ;;  %v3109_v37 = vld [vmem:[#allocation5 + $0x8c] sm:$0xf0]  ;;  %v3107_v38 = vld [vmem:[#allocation5 + $0x84] sm:$0xf]  ;;  %v3672_v39 = vor.u32 %v3112_v32, %v2767_v33  ;;  %v2743_v40 = vld [vmem:[#allocation5 + $0x90] sm:$0xf0] }
  0x21   :  { %661 = vmatpush.bf16.msra.mxu3 %v3660_v26  ;;  %v2749_v41 = vld [vmem:[#allocation5 + $0x88] sm:$0xf]  ;;  %v3110_v42 = vld [vmem:[#allocation5 + $0x94] sm:$0xf0]  ;;  %v3108_v43 = vld [vmem:[#allocation5 + $0x8c] sm:$0xf]  ;;  %v3675_v45 = vor.u32 %v3109_v37, %v2741_v36  ;;  %v3679_v47 = vor.u32 %v3107_v38, %v2743_v40 }
  0x22   :  { %v2751_v44 = vld [vmem:[#allocation5 + $0x98] sm:$0xf0]  ;;  %v2725_v46 = vld [vmem:[#allocation5 + $0x60] sm:$0xf]  ;;  %v3681_v48 = vor.u32 %v3110_v42, %v2749_v41  ;;  %v3105_v49 = vld [vmem:[#allocation5 + $0x6c] sm:$0xf0] }
  0x23   :  { %623 = vmatpush.bf16.msra.mxu0 %v3663_v30  ;;  %636 = vmatpush.bf16.msra.mxu1 %v3667_v34  ;;  %v3103_v50 = vld [vmem:[#allocation5 + $0x64] sm:$0xf]  ;;  %v2727_v51 = vld [vmem:[#allocation5 + $0x70] sm:$0xf0]  ;;  %v3684_v52 = vor.u32 %v3108_v43, %v2751_v44  ;;  %v2733_v53 = vld [vmem:[#allocation5 + $0x68] sm:$0xf]  ;;  %v3690_v58 = vor.u32 %v3105_v49, %v2725_v46 }
  0x24   :  { %649 = vmatpush.bf16.msra.mxu2 %v3669_v35  ;;  %v3106_v54 = vld [vmem:[#allocation5 + $0x74] sm:$0xf0]  ;;  %v111_v55 = vld [vmem:[%s4942_s0] sm:$0xff]  ;;  %v3104_v56 = vld [vmem:[#allocation5 + $0x6c] sm:$0xf]  ;;  %v3694_v59 = vor.u32 %v3103_v50, %v2727_v51  ;;  %v4955_v27 = vmov 1  }
  0x25   :  { %662 = vmatpush.bf16.msra.mxu3 %v3672_v39  ;;  %v2735_v57 = vld [vmem:[#allocation5 + $0x78] sm:$0xf0]  ;;  %122 = vperm.xlu0 %3206, %v111_v55   ;;  %v3696_v60 = vor.u32 %v3106_v54, %v2733_v53  ;;  %v2709_v61 = vld [vmem:[#allocation5 + $0x40] sm:$0xf]  ;;  %v3101_v62 = vld [vmem:[#allocation5 + $0x4c] sm:$0xf0] }
  0x26   :  { %v3099_v63 = vld [vmem:[#allocation5 + $0x44] sm:$0xf]  ;;  %v3699_v1 = vor.u32 %v3104_v56, %v2735_v57  ;;  %v2711_v2 = vld [vmem:[#allocation5 + $0x50] sm:$0xf0]  ;;  %v2717_v3 = vld [vmem:[#allocation5 + $0x48] sm:$0xf]  ;;  %v3702_v10 = vor.u32 %v3101_v62, %v2709_v61 }
  0x27   :  { %624 = vmatpush.bf16.msra.mxu0 %v3675_v45  ;;  %637 = vmatpush.bf16.msra.mxu1 %v3679_v47  ;;  %v3102_v5 = vld [vmem:[#allocation5 + $0x54] sm:$0xf0]  ;;  %v3100_v6 = vld [vmem:[#allocation5 + $0x4c] sm:$0xf]  ;;  %v2719_v7 = vld [vmem:[#allocation5 + $0x58] sm:$0xf0]  ;;  %v3706_v11 = vor.u32 %v3099_v63, %v2711_v2 }
  0x28   :  { %650 = vmatpush.bf16.msra.mxu2 %v3681_v48  ;;  %v3708_v12 = vor.u32 %v3102_v5, %v2717_v3  ;;  %v2693_v14 = vld [vmem:[#allocation5 + $0x20] sm:$0xf]  ;;  %v3097_v15 = vld [vmem:[#allocation5 + $0x2c] sm:$0xf0]  ;;  %v3095_v16 = vld [vmem:[#allocation5 + $0x24] sm:$0xf]  ;;  %v3711_v19 = vor.u32 %v3100_v6, %v2719_v7 }
  0x29   :  { %663 = vmatpush.bf16.msra.mxu3 %v3684_v52  ;;  %v2695_v20 = vld [vmem:[#allocation5 + $0x30] sm:$0xf0]  ;;  %v2701_v21 = vld [vmem:[#allocation5 + $0x28] sm:$0xf]  ;;  %v3098_v23 = vld [vmem:[#allocation5 + $0x34] sm:$0xf0]  ;;  %v3715_v28 = vor.u32 %v3097_v15, %v2693_v14 }
  0x2a   :  { %5135 = vst [vmem:[#allocation19_spill] sm:$0xff] %v3708_v12  ;;  %v3096_v24 = vld [vmem:[#allocation5 + $0x2c] sm:$0xf]  ;;  %v2703_v25 = vld [vmem:[#allocation5 + $0x38] sm:$0xf0]  ;;  %v3719_v32 = vor.u32 %v3095_v16, %v2695_v20  ;;  %v3721_v33 = vor.u32 %v3098_v23, %v2701_v21  ;;  %s3568_s27 = smov [#allocation11]  }
  0x2b   :  { %625 = vmatpush.bf16.msra.mxu0 %v3690_v58  ;;  %638 = vmatpush.bf16.msra.mxu1 %v3694_v59  ;;  %5136 = vst [vmem:[#allocation20_spill] sm:$0xff] %v3711_v19  ;;  %v2677_v29 = vld [vmem:[#allocation5] sm:$0xf]  ;;  %v3093_v31 = vld [vmem:[#allocation5 + $0xc] sm:$0xf0]  ;;  %v3724_v38 = vor.u32 %v3096_v24, %v2703_v25  ;;  %s2645_s3 = sshll.u32 %s3568_s27, 4  ;;  %s2646_s3 = int_to_ptr.vmem [resolvable:$true] %s2645_s3 }
  0x2c   :  { %651 = vmatpush.bf16.msra.mxu2 %v3696_v60  ;;  %5137 = vst [vmem:[#allocation21_spill] sm:$0xff] %v3715_v28  ;;  %v3091_v36 = vld [vmem:[#allocation5 + $0x4] sm:$0xf]  ;;  %v2679_v37 = vld [vmem:[#allocation5 + $0x10] sm:$0xf0]  ;;  %v3727_v49 = vor.u32 %v3093_v31, %v2677_v29  ;;  %s2647_s30 = sshll.u32 %s4951_s9, 4  ;;  %s2648_s30 = int_to_ptr.hbm [resolvable:$true] %s2647_s30 }
  0x2d   :  { %664 = vmatpush.bf16.msra.mxu3 %v3699_v1  ;;  %3207 = vset.pattern.permute.xlu0 %v4955_v27  ;;  %5138 = vst [vmem:[#allocation22_spill] sm:$0xff] %v3719_v32  ;;  %v2685_v40 = vld [vmem:[#allocation5 + $0x8] sm:$0xf]  ;;  %v3094_v41 = vld [vmem:[#allocation5 + $0x14] sm:$0xf0]  ;;  %v3731_v53 = vor.u32 %v3091_v36, %v2679_v37 }
  0x2e   :  { %206 = vperm.xlu0 %3207, %v111_v55   ;;  %5139 = vst [vmem:[#allocation23_spill] sm:$0xff] %v3721_v33  ;;  %v3092_v42 = vld [vmem:[#allocation5 + $0xc] sm:$0xf]  ;;  %v2687_v43 = vld [vmem:[#allocation5 + $0x18] sm:$0xf0]  ;;  %v3733_v54 = vor.u32 %v3094_v41, %v2685_v40 }
  0x2f   :  { %626 = vmatpush.bf16.msra.mxu0 %v3702_v10  ;;  %639 = vmatpush.bf16.msra.mxu1 %v3706_v11  ;;  %5140 = vst [vmem:[#allocation24_spill] sm:$0xff] %v3724_v38  ;;  %v2917_v44 = vld [vmem:[#allocation7 + $0xe0] sm:$0xf]  ;;  %v3153_v46 = vld [vmem:[#allocation7 + $0xec] sm:$0xf0]  ;;  %v3736_v55 = vor.u32 %v3092_v42, %v2687_v43 }
  0x30   :  { %652 = vmatpush.bf16.msra.mxu2 %v3708_v12  ;;  %5141 = vst [vmem:[#allocation25_spill] sm:$0xff] %v3727_v49  ;;  %v3151_v50 = vld [vmem:[#allocation7 + $0xe4] sm:$0xf]  ;;  %v2919_v51 = vld [vmem:[#allocation7 + $0xf0] sm:$0xf0]  ;;  %v3738_v56 = vor.u32 %v3153_v46, %v2917_v44 }
  0x31   :  { %665 = vmatpush.bf16.msra.mxu3 %v3711_v19  ;;  %5142 = vst [vmem:[#allocation26_spill] sm:$0xff] %v3731_v53  ;;  %v2925_v57 = vld [vmem:[#allocation7 + $0xe8] sm:$0xf]  ;;  %v3154_v61 = vld [vmem:[#allocation7 + $0xf4] sm:$0xf0]  ;;  %v3740_v62 = vor.u32 %v3151_v50, %v2919_v51 }
  0x32   :  { %5143 = vst [vmem:[#allocation27_spill] sm:$0xff] %v3733_v54  ;;  %v3152_v63 = vld [vmem:[#allocation7 + $0xec] sm:$0xf]  ;;  %v2927_v2 = vld [vmem:[#allocation7 + $0xf8] sm:$0xf0]  ;;  %v3746_v3 = vor.u32 %v3154_v61, %v2925_v57 }
  0x33   :  { %627 = vmatpush.bf16.msra.mxu0 %v3715_v28  ;;  %640 = vmatpush.bf16.msra.mxu1 %v3719_v32  ;;  %5144 = vst [vmem:[#allocation28_spill] sm:$0xff] %v3736_v55  ;;  %v3750_v5 = vor.u32 %v3152_v63, %v2927_v2  ;;  %v2901_v6 = vld [vmem:[#allocation7 + $0xc0] sm:$0xf]  ;;  %v3149_v7 = vld [vmem:[#allocation7 + $0xcc] sm:$0xf0] }
  0x34   :  { %653 = vmatpush.bf16.msra.mxu2 %v3721_v33  ;;  %5145 = vst [vmem:[#allocation29_spill] sm:$0xff] %v3738_v56  ;;  %v3147_v14 = vld [vmem:[#allocation7 + $0xc4] sm:$0xf]  ;;  %v3759_v15 = vor.u32 %v3149_v7, %v2901_v6  ;;  %v2903_v16 = vld [vmem:[#allocation7 + $0xd0] sm:$0xf0] }
  0x35   :  { %666 = vmatpush.bf16.msra.mxu3 %v3724_v38  ;;  %5146 = vst [vmem:[#allocation30_spill] sm:$0xff] %v3740_v62  ;;  %v2909_v20 = vld [vmem:[#allocation7 + $0xc8] sm:$0xf]  ;;  %v3150_v21 = vld [vmem:[#allocation7 + $0xd4] sm:$0xf0]  ;;  %v3761_v23 = vor.u32 %v3147_v14, %v2903_v16 }
  0x36   :  { %3213 = vset.pattern.permute.xlu0 %v4953_v0  ;;  %5147 = vst [vmem:[#allocation31_spill] sm:$0xff] %v3746_v3  ;;  %v3763_v24 = vor.u32 %v3150_v21, %v2909_v20  ;;  %v3148_v25 = vld [vmem:[#allocation7 + $0xcc] sm:$0xf]  ;;  %v2911_v29 = vld [vmem:[#allocation7 + $0xd8] sm:$0xf0] }
  0x37   :  { %628 = vmatpush.bf16.msra.mxu0 %v3727_v49  ;;  %641 = vmatpush.bf16.msra.mxu1 %v3731_v53  ;;  %5148 = vst [vmem:[#allocation32_spill] sm:$0xff] %v3750_v5  ;;  %v2885_v31 = vld [vmem:[#allocation7 + $0xa0] sm:$0xf]  ;;  %v3766_v36 = vor.u32 %v3148_v25, %v2911_v29  ;;  %v3145_v37 = vld [vmem:[#allocation7 + $0xac] sm:$0xf0] }
  0x38   :  { %654 = vmatpush.bf16.msra.mxu2 %v3733_v54  ;;  %5149 = vst [vmem:[#allocation33_spill] sm:$0xff] %v3759_v15  ;;  %v3143_v40 = vld [vmem:[#allocation7 + $0xa4] sm:$0xf]  ;;  %v2887_v41 = vld [vmem:[#allocation7 + $0xb0] sm:$0xf0]  ;;  %v3770_v42 = vor.u32 %v3145_v37, %v2885_v31 }
  0x39   :  { %667 = vmatpush.bf16.msra.mxu3 %v3736_v55  ;;  %5150 = vst [vmem:[#allocation34_spill] sm:$0xff] %v3761_v23  ;;  %v3772_v43 = vor.u32 %v3143_v40, %v2887_v41  ;;  %v2893_v44 = vld [vmem:[#allocation7 + $0xa8] sm:$0xf]  ;;  %v3146_v46 = vld [vmem:[#allocation7 + $0xb4] sm:$0xf0] }
  0x3a   :  { %629 = vmatmul.bf16.vlgmr.msra.gmra.mxu0 %v4953_v0  ;;  %642 = vmatmul.bf16.vlgmr.msra.gmra.mxu1 %v4953_v0  ;;  %5151 = vst [vmem:[#allocation35_spill] sm:$0xff] %v3763_v24  ;;  %v3144_v50 = vld [vmem:[#allocation7 + $0xac] sm:$0xf]  ;;  %v3775_v51 = vor.u32 %v3146_v46, %v2893_v44  ;;  %v2895_v57 = vld [vmem:[#allocation7 + $0xb8] sm:$0xf0] }
  0x3b   :  { %856 = vmatpush.bf16.msrb.mxu0 %v3738_v56  ;;  %869 = vmatpush.bf16.msrb.mxu1 %v3740_v62  ;;  %5152 = vst [vmem:[#allocation36_spill] sm:$0xff] %v3766_v36  ;;  %v3777_v61 = vor.u32 %v3144_v50, %v2895_v57  ;;  %v2869_v63 = vld [vmem:[#allocation7 + $0x80] sm:$0xf]  ;;  %v3141_v2 = vld [vmem:[#allocation7 + $0x8c] sm:$0xf0] }
  0x3c   :  { %655 = vmatmul.bf16.vlgmr.msra.gmra.mxu2 %v4953_v0  ;;  %668 = vmatmul.bf16.vlgmr.msra.gmra.mxu3 %v4953_v0  ;;  %5153 = vst [vmem:[#allocation37_spill] sm:$0xff] %v3770_v42  ;;  %v3139_v6 = vld [vmem:[#allocation7 + $0x84] sm:$0xf]  ;;  %v3783_v7 = vor.u32 %v3141_v2, %v2869_v63  ;;  %v2871_v14 = vld [vmem:[#allocation7 + $0x90] sm:$0xf0] }
  0x3d   :  { %882 = vmatpush.bf16.msrb.mxu2 %v3746_v3  ;;  %895 = vmatpush.bf16.msrb.mxu3 %v3750_v5  ;;  %5154 = vst [vmem:[#allocation38_spill] sm:$0xff] %v3772_v43  ;;  %v2877_v16 = vld [vmem:[#allocation7 + $0x88] sm:$0xf]  ;;  %v3142_v20 = vld [vmem:[#allocation7 + $0x94] sm:$0xf0]  ;;  %v3785_v21 = vor.u32 %v3139_v6, %v2871_v14 }
  0x3e   :  { %5155 = vst [vmem:[#allocation39_spill] sm:$0xff] %v3775_v51  ;;  %v3787_v25 = vor.u32 %v3142_v20, %v2877_v16  ;;  %v3140_v29 = vld [vmem:[#allocation7 + $0x8c] sm:$0xf]  ;;  %v2879_v31 = vld [vmem:[#allocation7 + $0x98] sm:$0xf0] }
  0x3f   :  { %857 = vmatpush.bf16.msrb.mxu0 %v3759_v15  ;;  %870 = vmatpush.bf16.msrb.mxu1 %v3761_v23  ;;  %5156 = vst [vmem:[#allocation40_spill] sm:$0xff] %v3777_v61  ;;  %v2853_v37 = vld [vmem:[#allocation7 + $0x60] sm:$0xf]  ;;  %v3790_v40 = vor.u32 %v3140_v29, %v2879_v31  ;;  %v3137_v41 = vld [vmem:[#allocation7 + $0x6c] sm:$0xf0] }
  0x40   :  { %5157 = vst [vmem:[#allocation41_spill] sm:$0xff] %v3783_v7  ;;  %v3135_v44 = vld [vmem:[#allocation7 + $0x64] sm:$0xf]  ;;  %v2855_v46 = vld [vmem:[#allocation7 + $0x70] sm:$0xf0]  ;;  %v3794_v50 = vor.u32 %v3137_v41, %v2853_v37 }
  0x41   :  { %883 = vmatpush.bf16.msrb.mxu2 %v3763_v24  ;;  %896 = vmatpush.bf16.msrb.mxu3 %v3766_v36  ;;  %5158 = vst [vmem:[#allocation42_spill] sm:$0xff] %v3785_v21  ;;  %v3796_v57 = vor.u32 %v3135_v44, %v2855_v46  ;;  %v2861_v63 = vld [vmem:[#allocation7 + $0x68] sm:$0xf]  ;;  %v3138_v2 = vld [vmem:[#allocation7 + $0x74] sm:$0xf0] }
  0x42   :  { %5159 = vst [vmem:[#allocation43_spill] sm:$0xff] %v3787_v25  ;;  %v3136_v6 = vld [vmem:[#allocation7 + $0x6c] sm:$0xf]  ;;  %v3799_v14 = vor.u32 %v3138_v2, %v2861_v63  ;;  %v2863_v16 = vld [vmem:[#allocation7 + $0x78] sm:$0xf0] }
  0x43   :  { %858 = vmatpush.bf16.msrb.mxu0 %v3770_v42  ;;  %871 = vmatpush.bf16.msrb.mxu1 %v3772_v43  ;;  %5160 = vst [vmem:[#allocation44_spill] sm:$0xff] %v3790_v40  ;;  %v2837_v20 = vld [vmem:[#allocation7 + $0x40] sm:$0xf]  ;;  %v3133_v29 = vld [vmem:[#allocation7 + $0x4c] sm:$0xf0]  ;;  %v3801_v31 = vor.u32 %v3136_v6, %v2863_v16 }
  0x44   :  { %5161 = vst [vmem:[#allocation45_spill] sm:$0xff] %v3794_v50  ;;  %v3131_v0 = vld [vmem:[#allocation7 + $0x44] sm:$0xf]  ;;  %v2839_v27 = vld [vmem:[#allocation7 + $0x50] sm:$0xf0]  ;;  %v3804_v37 = vor.u32 %v3133_v29, %v2837_v20 }
  0x45   :  { %884 = vmatpush.bf16.msrb.mxu2 %v3775_v51  ;;  %897 = vmatpush.bf16.msrb.mxu3 %v3777_v61  ;;  %5162 = vst [vmem:[#allocation46_spill] sm:$0xff] %v3796_v57  ;;  %v3134_v41 = vld [vmem:[#allocation7 + $0x54] sm:$0xf0]  ;;  %v3132_v44 = vld [vmem:[#allocation7 + $0x4c] sm:$0xf]  ;;  %v3808_v63 = vor.u32 %v3131_v0, %v2839_v27 }
  0x46   :  { %5163 = vst [vmem:[#allocation47_spill] sm:$0xff] %v3799_v14  ;;  %v2847_v46 = vld [vmem:[#allocation7 + $0x58] sm:$0xf0]  ;;  %v2821_v6 = vld [vmem:[#allocation7 + $0x20] sm:$0xf] }
  0x47   :  { %859 = vmatpush.bf16.msrb.mxu0 %v3783_v7  ;;  %872 = vmatpush.bf16.msrb.mxu1 %v3785_v21  ;;  %5164 = vst [vmem:[#allocation48_spill] sm:$0xff] %v3801_v31  ;;  %v2845_v21 = vld [vmem:[#allocation7 + $0x48] sm:$0xf]  ;;  %v3129_v16 = vld [vmem:[#allocation7 + $0x2c] sm:$0xf0] }
  0x48   :  { %5165 = vst [vmem:[#allocation49_spill] sm:$0xff] %v3804_v37  ;;  %v3810_v2 = vor.u32 %v3134_v41, %v2845_v21  ;;  %v2823_v20 = vld [vmem:[#allocation7 + $0x30] sm:$0xf0]  ;;  %v2829_v29 = vld [vmem:[#allocation7 + $0x28] sm:$0xf] }
  0x49   :  { %885 = vmatpush.bf16.msrb.mxu2 %v3787_v25  ;;  %898 = vmatpush.bf16.msrb.mxu3 %v3790_v40  ;;  %5166 = vst [vmem:[#allocation50_spill] sm:$0xff] %v3808_v63  ;;  %v3127_v40 = vld [vmem:[#allocation7 + $0x24] sm:$0xf]  ;;  %v3813_v25 = vor.u32 %v3132_v44, %v2847_v46  ;;  %v3128_v7 = vld [vmem:[#allocation7 + $0x2c] sm:$0xf] }
  0x4a   :  { %5167 = vst [vmem:[#allocation51_spill] sm:$0xff] %v3810_v2  ;;  %v2831_v61 = vld [vmem:[#allocation7 + $0x38] sm:$0xf0]  ;;  %v3820_v0 = vor.u32 %v3127_v40, %v2823_v20  ;;  %v2805_v41 = vld [vmem:[#allocation7] sm:$0xf] }
  0x4b   :  { %860 = vmatpush.bf16.msrb.mxu0 %v3794_v50  ;;  %873 = vmatpush.bf16.msrb.mxu1 %v3796_v57  ;;  %5168 = vst [vmem:[#allocation52_spill] sm:$0xff] %v3813_v25  ;;  %v3130_v50 = vld [vmem:[#allocation7 + $0x34] sm:$0xf0]  ;;  %v3816_v57 = vor.u32 %v3129_v16, %v2821_v6  ;;  %v3825_v21 = vor.u32 %v3128_v7, %v2831_v61  ;;  %v3125_v44 = vld [vmem:[#allocation7 + $0xc] sm:$0xf0] }
  0x4c   :  { %5170 = vst [vmem:[#allocation54_spill] sm:$0xff] %v3820_v0  ;;  %v3822_v27 = vor.u32 %v3130_v50, %v2829_v29  ;;  %v3123_v46 = vld [vmem:[#allocation7 + $0x4] sm:$0xf]  ;;  %v2807_v6 = vld [vmem:[#allocation7 + $0x10] sm:$0xf0]  ;;  %v3831_v50 = vor.u32 %v3125_v44, %v2805_v41 }
  0x4d   :  { %886 = vmatpush.bf16.msrb.mxu2 %v3799_v14  ;;  %899 = vmatpush.bf16.msrb.mxu3 %v3801_v31  ;;  %5169 = vst [vmem:[#allocation53_spill] sm:$0xff] %v3816_v57  ;;  %v2813_v40 = vld [vmem:[#allocation7 + $0x8] sm:$0xf]  ;;  %v3126_v16 = vld [vmem:[#allocation7 + $0x14] sm:$0xf0]  ;;  %v3833_v20 = vor.u32 %v3123_v46, %v2807_v6 }
  0x4e   :  { %5171 = vst [vmem:[#allocation55_spill] sm:$0xff] %v3822_v27  ;;  %v3835_v61 = vor.u32 %v3126_v16, %v2813_v40  ;;  %v3124_v7 = vld [vmem:[#allocation7 + $0xc] sm:$0xf]  ;;  %v2815_v29 = vld [vmem:[#allocation7 + $0x18] sm:$0xf0] }
  0x4f   :  { %861 = vmatpush.bf16.msrb.mxu0 %v3804_v37  ;;  %874 = vmatpush.bf16.msrb.mxu1 %v3808_v63  ;;  %5172 = vst [vmem:[#allocation56_spill] sm:$0xff] %v3825_v21  ;;  %v3053_v44 = vld [vmem:[#allocation8 + $0xe8] sm:$0xf]  ;;  %v3186_v46 = vld [vmem:[#allocation8 + $0xf4] sm:$0xf0] }
  0x50   :  { %5173 = vst [vmem:[#allocation57_spill] sm:$0xff] %v3831_v50  ;;  %v3184_v6 = vld [vmem:[#allocation8 + $0xec] sm:$0xf]  ;;  %v3847_v40 = vor.u32 %v3186_v46, %v3053_v44  ;;  %v3055_v16 = vld [vmem:[#allocation8 + $0xf8] sm:$0xf0] }
  0x51   :  { %887 = vmatpush.bf16.msrb.mxu2 %v3810_v2  ;;  %900 = vmatpush.bf16.msrb.mxu3 %v3813_v25  ;;  %5174 = vst [vmem:[#allocation58_spill] sm:$0xff] %v3833_v20  ;;  %v3183_v25 = vld [vmem:[#allocation8 + $0xe4] sm:$0xf]  ;;  %v3182_v44 = vld [vmem:[#allocation8 + $0xd4] sm:$0xf0] }
  0x52   :  { %5175 = vst [vmem:[#allocation59_spill] sm:$0xff] %v3835_v61  ;;  %v3180_v46 = vld [vmem:[#allocation8 + $0xcc] sm:$0xf]  ;;  %v3921_v24 = vld [vmem:[#allocation2] sm:$0xf] }
  0x53   :  { %862 = vmatpush.bf16.msrb.mxu0 %v3816_v57  ;;  %875 = vmatpush.bf16.msrb.mxu1 %v3820_v0  ;;  %v3045_v57 = vld [vmem:[#allocation8 + $0xe0] sm:$0xf]  ;;  %v3837_v0 = vor.u32 %v3124_v7, %v2815_v29  ;;  %5179 = vst [vmem:[#allocation63_spill] sm:$0xff] %v3847_v40  ;;  %v3181_v29 = vld [vmem:[#allocation8 + $0xcc] sm:$0xf0]  ;;  %v3957_v5 = vperm.slane %v3921_v24, 1 }
  0x54   :  { %v3029_v7 = vld [vmem:[#allocation8 + $0xc0] sm:$0xf]  ;;  %v2973_v23 = vld [vmem:[#allocation8 + $0x48] sm:$0xf]  ;;  %v2975_v15 = vld [vmem:[#allocation8 + $0x58] sm:$0xf0] }
  0x55   :  { %888 = vmatpush.bf16.msrb.mxu2 %v3822_v27  ;;  %901 = vmatpush.bf16.msrb.mxu3 %v3825_v21  ;;  %5176 = vst [vmem:[#allocation60_spill] sm:$0xff] %v3837_v0  ;;  %v3185_v27 = vld [vmem:[#allocation8 + $0xec] sm:$0xf0]  ;;  %v3047_v21 = vld [vmem:[#allocation8 + $0xf0] sm:$0xf0] }
  0x56   :  { %v3841_v2 = vor.u32 %v3185_v27, %v3045_v57  ;;  %v3843_v41 = vor.u32 %v3183_v25, %v3047_v21  ;;  %v3851_v57 = vor.u32 %v3184_v6, %v3055_v16  ;;  %v3853_v25 = vor.u32 %v3181_v29, %v3029_v7  ;;  %v3179_v27 = vld [vmem:[#allocation8 + $0xc4] sm:$0xf]  ;;  %v3031_v21 = vld [vmem:[#allocation8 + $0xd0] sm:$0xf0]  ;;  %v3013_v29 = vld [vmem:[#allocation8 + $0xa0] sm:$0xf] }
  0x57   :  { %863 = vmatpush.bf16.msrb.mxu0 %v3831_v50  ;;  %876 = vmatpush.bf16.msrb.mxu1 %v3833_v20  ;;  %v3037_v20 = vld [vmem:[#allocation8 + $0xc8] sm:$0xf]  ;;  %v3178_v50 = vld [vmem:[#allocation8 + $0xb4] sm:$0xf0]  ;;  %5211 = vst [vmem:[#allocation95_spill] sm:$0xff] %v3957_v5 }
  0x58   :  { %5177 = vst [vmem:[#allocation61_spill] sm:$0xff] %v3841_v2  ;;  %v3864_v6 = vor.u32 %v3182_v44, %v3037_v20  ;;  %v3176_v44 = vld [vmem:[#allocation8 + $0xac] sm:$0xf] }
  0x59   :  { %5178 = vst [vmem:[#allocation62_spill] sm:$0xff] %v3843_v41  ;;  %889 = vmatpush.bf16.msrb.mxu2 %v3835_v61  ;;  %902 = vmatpush.bf16.msrb.mxu3 %v3837_v0  ;;  %v3856_v61 = vor.u32 %v3179_v27, %v3031_v21  ;;  %v3039_v0 = vld [vmem:[#allocation8 + $0xd8] sm:$0xf0]  ;;  %v3175_v27 = vld [vmem:[#allocation8 + $0xa4] sm:$0xf] }
  0x5a   :  { %5180 = vst [vmem:[#allocation64_spill] sm:$0xff] %v3851_v57  ;;  %v3866_v16 = vor.u32 %v3180_v46, %v3039_v0  ;;  %v3015_v21 = vld [vmem:[#allocation8 + $0xb0] sm:$0xf0]  ;;  %v3023_v46 = vld [vmem:[#allocation8 + $0xb8] sm:$0xf0] }
  0x5b   :  { %1068 = vmatpush.bf16.msra.mxu0 %v3841_v2  ;;  %1081 = vmatpush.bf16.msra.mxu1 %v3843_v41  ;;  %5181 = vst [vmem:[#allocation65_spill] sm:$0xff] %v3853_v25  ;;  %v3861_v2 = vld [vmem:[%s4943_s1] sm:$0xff]  ;;  %v3021_v41 = vld [vmem:[#allocation8 + $0xa8] sm:$0xf]  ;;  %v3875_v20 = vor.u32 %v3175_v27, %v3015_v21  ;;  %v3171_v27 = vld [vmem:[#allocation8 + $0x84] sm:$0xf] }
  0x5c   :  { %5182 = vst [vmem:[#allocation66_spill] sm:$0xff] %v3856_v61  ;;  %v3877_v0 = vor.u32 %v3178_v50, %v3021_v41  ;;  %v162_v37 = vperm.slane %v3861_v2, 2  ;;  %v237_v31 = vperm.slane %v3861_v2, 1  ;;  %v2999_v50 = vld [vmem:[#allocation8 + $0x90] sm:$0xf0] }
  0x5d   :  { %1094 = vmatpush.bf16.msra.mxu2 %v3847_v40  ;;  %1107 = vmatpush.bf16.msra.mxu3 %v3851_v57  ;;  %5183 = vst [vmem:[#allocation67_spill] sm:$0xff] %v3864_v6  ;;  %v3177_v40 = vld [vmem:[#allocation8 + $0xac] sm:$0xf0]  ;;  %v161_v57 = vperm.slane %v3861_v2, 0  ;;  %v3005_v41 = vld [vmem:[#allocation8 + $0x88] sm:$0xf]  ;;  %v3892_v51 = vor.u32 %v3171_v27, %v2999_v50 }
  0x5e   :  { %5184 = vst [vmem:[#allocation68_spill] sm:$0xff] %v3866_v16  ;;  %v3873_v63 = vor.u32 %v3177_v40, %v3013_v29  ;;  %v2997_v40 = vld [vmem:[#allocation8 + $0x80] sm:$0xf]  ;;  %v3173_v29 = vld [vmem:[#allocation8 + $0x8c] sm:$0xf0]  ;;  %v3900_v42 = vperm.slane %v237_v31, 1 }
  0x5f   :  { %1069 = vmatpush.bf16.msra.mxu0 %v3853_v25  ;;  %1082 = vmatpush.bf16.msra.mxu1 %v3856_v61  ;;  %5186 = vst [vmem:[#allocation70_spill] sm:$0xff] %v3875_v20  ;;  %v163_v25 = vperm.slane %v3861_v2, 4  ;;  %v3884_v61 = vor.u32 %v3176_v44, %v3023_v46  ;;  %v3174_v21 = vld [vmem:[#allocation8 + $0x94] sm:$0xf0]  ;;  %v3890_v14 = vor.u32 %v3173_v29, %v2997_v40  ;;  %v3172_v46 = vld [vmem:[#allocation8 + $0x8c] sm:$0xf] }
  0x60   :  { %5185 = vst [vmem:[#allocation69_spill] sm:$0xff] %v3873_v63  ;;  %v3894_v44 = vor.u32 %v3174_v21, %v3005_v41  ;;  %v3896_v43 = vperm.slane %v161_v57, 0  ;;  %v3167_v40 = vld [vmem:[#allocation8 + $0x64] sm:$0xf]  ;;  %v2983_v27 = vld [vmem:[#allocation8 + $0x70] sm:$0xf0] }
  0x61   :  { %1095 = vmatpush.bf16.msra.mxu2 %v3864_v6  ;;  %5187 = vst [vmem:[#allocation71_spill] sm:$0xff] %v3877_v0  ;;  %1108 = vmatpush.bf16.msra.mxu3 %v3866_v16  ;;  %v238_v6 = vperm.slane %v3861_v2, 3  ;;  %v3007_v16 = vld [vmem:[#allocation8 + $0x98] sm:$0xf0]  ;;  %v2989_v50 = vld [vmem:[#allocation8 + $0x68] sm:$0xf] }
  0x62   :  { %5188 = vst [vmem:[#allocation72_spill] sm:$0xff] %v3884_v61  ;;  %v3903_v36 = vor.u32 %v3172_v46, %v3007_v16  ;;  %v3170_v41 = vld [vmem:[#allocation8 + $0x74] sm:$0xf0]  ;;  %v164_v57 = vperm.slane %v3861_v2, 6  ;;  %v3913_v16 = vor.u32 %v3167_v40, %v2983_v27  ;;  %v3168_v46 = vld [vmem:[#allocation8 + $0x6c] sm:$0xf] }
  0x63   :  { %1070 = vmatpush.bf16.msra.mxu0 %v3873_v63  ;;  %1083 = vmatpush.bf16.msra.mxu1 %v3875_v20  ;;  %5189 = vst [vmem:[#allocation73_spill] sm:$0xff] %v3890_v14  ;;  %v3898_v63 = vperm.slane %v162_v37, 0  ;;  %v2981_v20 = vld [vmem:[#allocation8 + $0x60] sm:$0xf]  ;;  %v3909_v37 = vperm.slane %v238_v6, 1  ;;  %v3915_v21 = vor.u32 %v3170_v41, %v2989_v50 }
  0x64   :  { %5190 = vst [vmem:[#allocation74_spill] sm:$0xff] %v3892_v51  ;;  %v3163_v40 = vld [vmem:[#allocation8 + $0x44] sm:$0xf]  ;;  %v2967_v41 = vld [vmem:[#allocation8 + $0x50] sm:$0xf0] }
  0x65   :  { %1096 = vmatpush.bf16.msra.mxu2 %v3877_v0  ;;  %5191 = vst [vmem:[#allocation75_spill] sm:$0xff] %v3894_v44  ;;  %1109 = vmatpush.bf16.msra.mxu3 %v3884_v61  ;;  %v3169_v0 = vld [vmem:[#allocation8 + $0x6c] sm:$0xf0]  ;;  %v240_v61 = vperm.slane %v3861_v2, 7 }
  0x66   :  { %5192 = vst [vmem:[#allocation76_spill] sm:$0xff] %v3896_v43  ;;  %v3906_v29 = vor.u32 %v3169_v0, %v2981_v20  ;;  %v3917_v20 = vperm.slane %v163_v25, 0  ;;  %v239_v0 = vperm.slane %v3861_v2, 5 }
  0x67   :  { %5193 = vst [vmem:[#allocation77_spill] sm:$0xff] %v3898_v63  ;;  %1071 = vmatpush.bf16.msra.mxu0 %v3890_v14  ;;  %1084 = vmatpush.bf16.msra.mxu1 %v3892_v51  ;;  %v2991_v14 = vld [vmem:[#allocation8 + $0x78] sm:$0xf0]  ;;  %v2965_v51 = vld [vmem:[#allocation8 + $0x40] sm:$0xf] }
  0x68   :  { %5194 = vst [vmem:[#allocation78_spill] sm:$0xff] %v3900_v42  ;;  %v3924_v6 = vor.u32 %v3168_v46, %v2991_v14  ;;  %v3934_v14 = vperm.slane %v164_v57, 0 }
  0x69   :  { %5195 = vst [vmem:[#allocation79_spill] sm:$0xff] %v3903_v36  ;;  %1097 = vmatpush.bf16.msra.mxu2 %v3894_v44  ;;  %1110 = vmatpush.bf16.msra.mxu3 %v3903_v36  ;;  %v3165_v44 = vld [vmem:[#allocation8 + $0x4c] sm:$0xf0]  ;;  %v3166_v36 = vld [vmem:[#allocation8 + $0x54] sm:$0xf0] }
  0x6a   :  { %5196 = vst [vmem:[#allocation80_spill] sm:$0xff] %v3906_v29  ;;  %v3932_v2 = vor.u32 %v3165_v44, %v2965_v51  ;;  %v3945_v51 = vperm.slane %v240_v61, 1  ;;  %v3948_v44 = vperm.slane %v3921_v24, 0 }
  0x6b   :  { %5197 = vst [vmem:[#allocation81_spill] sm:$0xff] %v3909_v37  ;;  %1072 = vmatpush.bf16.msra.mxu0 %v3906_v29  ;;  %1085 = vmatpush.bf16.msra.mxu1 %v3913_v16  ;;  %v3943_v29 = vperm.slane %v239_v0, 1  ;;  %v2957_v0 = vld [vmem:[#allocation8 + $0x28] sm:$0xf] }
  0x6c   :  { %5198 = vst [vmem:[#allocation82_spill] sm:$0xff] %v3913_v16  ;;  %v3161_v16 = vld [vmem:[#allocation8 + $0x2c] sm:$0xf0] }
  0x6d   :  { %5199 = vst [vmem:[#allocation83_spill] sm:$0xff] %v3915_v21  ;;  %1098 = vmatpush.bf16.msra.mxu2 %v3915_v21  ;;  %1111 = vmatpush.bf16.msra.mxu3 %v3924_v6  ;;  %v3159_v21 = vld [vmem:[#allocation8 + $0x24] sm:$0xf] }
  0x6e   :  { %5200 = vst [vmem:[#allocation84_spill] sm:$0xff] %v3917_v20 }
  0x6f   :  { %5201 = vst [vmem:[#allocation85_spill] sm:$0xff] %v3924_v6  ;;  %1073 = vmatpush.bf16.msra.mxu0 %v3932_v2 }
  0x70   :  { %5202 = vst [vmem:[#allocation86_spill] sm:$0xff] %v3932_v2 }
  0x71   :  { %5203 = vst [vmem:[#allocation87_spill] sm:$0xff] %v3934_v14 }
  0x72   :  { %5206 = vst [vmem:[#allocation90_spill] sm:$0xff] %v3943_v29 }
  0x73   :  { %5207 = vst [vmem:[#allocation91_spill] sm:$0xff] %v3945_v51 }
  0x74   :  { %5208 = vst [vmem:[#allocation92_spill] sm:$0xff] %v3948_v44 }
  0x97   :  { %v3868_v7 = vpop.permute.xlu0 %122 }
  0x98   :  { %v173_v27 = vmul.f32 %v3896_v43, %v3868_v7  ;;  %v174_v25 = vmul.f32 %v3898_v63, %v3868_v7  ;;  %v3939_v43 = vor.u32 %v3163_v40, %v2967_v41  ;;  %v3941_v63 = vor.u32 %v3166_v36, %v2973_v23  ;;  %v2951_v36 = vld [vmem:[#allocation8 + $0x30] sm:$0xf0]  ;;  %v3162_v41 = vld [vmem:[#allocation8 + $0x34] sm:$0xf0] }
  0x9a   :  { %5204 = vst [vmem:[#allocation88_spill] sm:$0xff] %v3939_v43  ;;  %1086 = vmatpush.bf16.msra.mxu1 %v3939_v43  ;;  %1099 = vmatpush.bf16.msra.mxu2 %v3941_v63 }
  0x9b   :  { %5205 = vst [vmem:[#allocation89_spill] sm:$0xff] %v3941_v63 }
  0xa0   :  { %v207_v31 = vpop.permute.xlu0 %206 }
  0xa1   :  { %v249_v50 = vmul.f32 %v3900_v42, %v207_v31  ;;  %v250_v46 = vmul.f32 %v3909_v37, %v207_v31  ;;  %v3164_v42 = vld [vmem:[#allocation8 + $0x4c] sm:$0xf]  ;;  %v2949_v37 = vld [vmem:[#allocation8 + $0x20] sm:$0xf]  ;;  %v252_v63 = vmul.f32 %v3945_v51, %v207_v31 }
  0xa2   :  { %v3951_v57 = vor.u32 %v3164_v42, %v2975_v15  ;;  %v3954_v23 = vor.u32 %v3161_v16, %v2949_v37  ;;  %v3961_v15 = vor.u32 %v3159_v21, %v2951_v36  ;;  %v3963_v42 = vor.u32 %v3162_v41, %v2957_v0  ;;  %v2933_v36 = vld [vmem:[#allocation8] sm:$0xf]  ;;  %v3157_v0 = vld [vmem:[#allocation8 + $0xc] sm:$0xf0]  ;;  %v3155_v41 = vld [vmem:[#allocation8 + $0x4] sm:$0xf] }
  0xa3   :  { %v281_v40 = vadd.f32 %v249_v50, %v173_v27  ;;  %v282_v61 = vadd.f32 %v250_v46, %v174_v25  ;;  %v3160_v27 = vld [vmem:[#allocation8 + $0x2c] sm:$0xf]  ;;  %v2959_v50 = vld [vmem:[#allocation8 + $0x38] sm:$0xf0]  ;;  %v175_v16 = vmul.f32 %v3917_v20, %v3868_v7  ;;  %v251_v25 = vmul.f32 %v3943_v29, %v207_v31  ;;  %v2935_v29 = vld [vmem:[#allocation8 + $0x10] sm:$0xf0] }
  0xa4   :  { %5209 = vst [vmem:[#allocation93_spill] sm:$0xff] %v3951_v57  ;;  %1112 = vmatpush.bf16.msra.mxu3 %v3951_v57  ;;  %v3966_v37 = vor.u32 %v3160_v27, %v2959_v50  ;;  %v176_v46 = vmul.f32 %v3934_v14, %v3868_v7  ;;  %1074 = vmatpush.bf16.msra.mxu0 %v3954_v23  ;;  %v2941_v7 = vld [vmem:[#allocation8 + $0x8] sm:$0xf]  ;;  %v3158_v14 = vld [vmem:[#allocation8 + $0x14] sm:$0xf0] }
  0xa5   :  { %5210 = vst [vmem:[#allocation94_spill] sm:$0xff] %v3954_v23  ;;  %v323_v21 = vadd.f32 %v3948_v44, %v281_v40  ;;  %v324_v27 = vadd.f32 %v3957_v5, %v282_v61  ;;  %1087 = vmatpush.bf16.msra.mxu1 %v3961_v15  ;;  %1100 = vmatpush.bf16.msra.mxu2 %v3963_v42  ;;  %v3156_v20 = vld [vmem:[#allocation8 + $0xc] sm:$0xf]  ;;  %v2943_v23 = vld [vmem:[#allocation8 + $0x18] sm:$0xf0] }
  0xa6   :  { %5212 = vst [vmem:[#allocation96_spill] sm:$0xff] %v3961_v15  ;;  %v3979_v50 = vor.u32 %v3157_v0, %v2933_v36  ;;  %v3982_v40 = vor.u32 %v3155_v41, %v2935_v29  ;;  %v3984_v44 = vor.u32 %v3158_v14, %v2941_v7  ;;  %v283_v5 = vadd.f32 %v251_v25, %v175_v16 }
  0xa7   :  { %5213 = vst [vmem:[#allocation97_spill] sm:$0xff] %v3963_v42  ;;  %v3987_v15 = vperm.slane %v3921_v24, 2  ;;  %v3989_v36 = vor.u32 %v3156_v20, %v2943_v23  ;;  %v284_v42 = vadd.f32 %v252_v63, %v176_v46 }
  0xa8   :  { %5214 = vst [vmem:[#allocation98_spill] sm:$0xff] %v3966_v37  ;;  %1113 = vmatpush.bf16.msra.mxu3 %v3966_v37  ;;  %1075 = vmatpush.bf16.msra.mxu0 %v3979_v50 }
  0xa9   :  { %5215 = vst [vmem:[#allocation99_spill] sm:$0xff] %v3979_v50  ;;  %1088 = vmatpush.bf16.msra.mxu1 %v3982_v40  ;;  %1101 = vmatpush.bf16.msra.mxu2 %v3984_v44  ;;  %v325_v14 = vadd.f32 %v3987_v15, %v283_v5 }
  0xaa   :  { %5216 = vst [vmem:[#allocation100_spill] sm:$0xff] %v3982_v40 }
  0xab   :  { %5217 = vst [vmem:[#allocation101_spill] sm:$0xff] %v3984_v44 }
  0xac   :  { %5218 = vst [vmem:[#allocation102_spill] sm:$0xff] %v3987_v15  ;;  %1114 = vmatpush.bf16.msra.mxu3 %v3989_v36 }
  0xad   :  { %5219 = vst [vmem:[#allocation103_spill] sm:$0xff] %v3989_v36 }
  0xb7   :  { %v630_v57 = vpop.f32.mrf.mxu0  ;;  %v643_v51 = vpop.f32.mrf.mxu1 }
  0xb8   :  { %v673_v31 = vadd.f32 %v630_v57, %v323_v21  ;;  %v674_v61 = vadd.f32 %v643_v51, %v324_v27  ;;  %v3992_v57 = vperm.slane %v3921_v24, 3 }
  0xba   :  { %v677_v0 = vmul.f32 0.5, %v673_v31  ;;  %v678_v29 = vmul.f32 0.5, %v674_v61  ;;  %v326_v51 = vadd.f32 %v3992_v57, %v284_v42 }
  0xbc   :  { %3220 = vtanh.f32 %v677_v0 }
  0xbd   :  { %3222 = vtanh.f32 %v678_v29 }
  0xbf   :  { %v656_v20 = vpop.f32.mrf.mxu2  ;;  %v669_v23 = vpop.f32.mrf.mxu3 }
  0xc0   :  { %v675_v63 = vadd.f32 %v656_v20, %v325_v14  ;;  %v632_v24 = vpop.f32.mrf.mxu0  ;;  %v676_v16 = vadd.f32 %v669_v23, %v326_v51  ;;  %v645_v25 = vpop.f32.mrf.mxu1  ;;  %v112_v20 = vld [vmem:[%s4942_s0 + $0x8] sm:$0xff] }
  0xc1   :  { %127 = vperm.xlu1 %3208, %v112_v20  }
  0xc2   :  { %v679_v46 = vmul.f32 0.5, %v675_v63  ;;  %v3221_v21 = vpop.eup %3220  ;;  %3224 = vtanh.f32 %v676_v16  ;;  %v5220_v16 = vmov 1  }
  0xc3   :  { %v3223_v41 = vpop.eup %3222  ;;  %v683_v27 = vmul.f32 0.5, %v3221_v21  ;;  %v5224_v21 = vld [vmem:[#allocation34_spill] sm:$0xff] }
  0xc4   :  { %v684_v7 = vmul.f32 0.5, %v3223_v41  ;;  %3226 = vtanh.f32 %v679_v46  ;;  %v5223_v46 = vld [vmem:[#allocation33_spill] sm:$0xff]  ;;  %v5225_v41 = vld [vmem:[#allocation35_spill] sm:$0xff] }
  0xc5   :  { %v686_v31 = vadd.f32 0.5, %v683_v27  ;;  %v5226_v27 = vld [vmem:[#allocation36_spill] sm:$0xff] }
  0xc6   :  { %v687_v61 = vadd.f32 0.5, %v684_v7  ;;  %v5227_v7 = vld [vmem:[#allocation37_spill] sm:$0xff] }
  0xc7   :  { %v658_v0 = vpop.f32.mrf.mxu2  ;;  %v671_v29 = vpop.f32.mrf.mxu3 }
  0xc8   :  { %v3225_v5 = vpop.eup %3224  ;;  %v690_v15 = vmul.f32 0.0, %v687_v61  ;;  %v5229_v61 = vld [vmem:[#allocation39_spill] sm:$0xff]  ;;  %v5230_v0 = vld [vmem:[#allocation40_spill] sm:$0xff]  ;;  %v5231_v29 = vld [vmem:[#allocation41_spill] sm:$0xff] }
  0xc9   :  { %v691_v36 = vmul.f32 %v3225_v5, %v686_v31  ;;  %3209 = vset.pattern.permute.xlu1 %v5220_v16  ;;  %v5228_v31 = vld [vmem:[#allocation38_spill] sm:$0xff] }
  0xca   :  { %v3227_v42 = vpop.eup %3226  ;;  %210 = vperm.xlu1 %3209, %v112_v20   ;;  %v5232_v5 = vld [vmem:[#allocation42_spill] sm:$0xff]  ;;  %v5234_v20 = vld [vmem:[#allocation44_spill] sm:$0xff] }
  0xcb   :  { %v4000_v14 = vadd.f32 %v691_v36, %v690_v15  ;;  %v685_v51 = vmul.f32 0.5, %v3227_v42  ;;  %v5221_v15 = vmov 0   ;;  %v5222_v36 = vld [vmem:[#allocation32_spill] sm:$0xff]  ;;  %v5233_v42 = vld [vmem:[#allocation43_spill] sm:$0xff] }
  0xcd   :  { %3228 = vtanh.f32 %v4000_v14  ;;  %v688_v63 = vadd.f32 0.5, %v685_v51  ;;  %v5235_v51 = vld [vmem:[#allocation45_spill] sm:$0xff] }
  0xd2   :  { %3212 = vset.pattern.permute.xlu1 %v5221_v15 }
  0xd3   :  { %v3229_v23 = vpop.eup %3228 }
  0xd4   :  { %v694_v24 = vmul.f32 %v3229_v23, %v688_v63  ;;  %v5236_v63 = vld [vmem:[#allocation46_spill] sm:$0xff]  ;;  %v5237_v23 = vld [vmem:[#allocation47_spill] sm:$0xff] }
  0xd6   :  { %v695_v25 = vpack.c.bf16 %v694_v24, %v694_v24  ;;  %v5238_v24 = vld [vmem:[#allocation48_spill] sm:$0xff] }
  0xd8   :  { %864 = vmatmul.bf16.vlgmr.msrb.gmra.mxu0 %v695_v25  ;;  %877 = vmatmul.bf16.vlgmr.msrb.gmra.mxu1 %v695_v25 }
  0xd9   :  { %890 = vmatmul.bf16.vlgmr.msrb.gmra.mxu2 %v695_v25  ;;  %903 = vmatmul.bf16.vlgmr.msrb.gmra.mxu3 %v695_v25 }
  0xda   :  { %1143 = vmatpush.bf16.msrb.mxu0 %v3642_v4  ;;  %1156 = vmatpush.bf16.msrb.mxu1 %v3644_v8 }
  0xdb   :  { %1169 = vmatpush.bf16.msrb.mxu2 %v3646_v9  ;;  %1182 = vmatpush.bf16.msrb.mxu3 %v3649_v13 }
  0xde   :  { %1144 = vmatpush.bf16.msrb.mxu0 %v3653_v17  ;;  %1157 = vmatpush.bf16.msrb.mxu1 %v3655_v18 }
  0xdf   :  { %1170 = vmatpush.bf16.msrb.mxu2 %v3658_v22  ;;  %1183 = vmatpush.bf16.msrb.mxu3 %v3660_v26 }
  0xe2   :  { %1145 = vmatpush.bf16.msrb.mxu0 %v3663_v30  ;;  %1158 = vmatpush.bf16.msrb.mxu1 %v3667_v34 }
  0xe3   :  { %1171 = vmatpush.bf16.msrb.mxu2 %v3669_v35  ;;  %1184 = vmatpush.bf16.msrb.mxu3 %v3672_v39 }
  0xe6   :  { %1146 = vmatpush.bf16.msrb.mxu0 %v3675_v45  ;;  %1159 = vmatpush.bf16.msrb.mxu1 %v3679_v47 }
  0xe7   :  { %1172 = vmatpush.bf16.msrb.mxu2 %v3681_v48  ;;  %1185 = vmatpush.bf16.msrb.mxu3 %v3684_v52 }
  0xe8   :  { %1076 = vmatmul.bf16.vlgmr.msra.gmra.mxu0 %v5221_v15  ;;  %1089 = vmatmul.bf16.vlgmr.msra.gmra.mxu1 %v5221_v15 }
  0xe9   :  { %1102 = vmatmul.bf16.vlgmr.msra.gmra.mxu2 %v5221_v15  ;;  %1115 = vmatmul.bf16.vlgmr.msra.gmra.mxu3 %v5221_v15 }
  0xea   :  { %1147 = vmatpush.bf16.msrb.mxu0 %v3690_v58  ;;  %1160 = vmatpush.bf16.msrb.mxu1 %v3694_v59 }
  0xeb   :  { %1173 = vmatpush.bf16.msrb.mxu2 %v3696_v60  ;;  %1186 = vmatpush.bf16.msrb.mxu3 %v3699_v1 }
  0xee   :  { %1148 = vmatpush.bf16.msrb.mxu0 %v3702_v10  ;;  %1161 = vmatpush.bf16.msrb.mxu1 %v3706_v11 }
  0xef   :  { %1174 = vmatpush.bf16.msrb.mxu2 %v3708_v12  ;;  %1187 = vmatpush.bf16.msrb.mxu3 %v3711_v19 }
  0xf2   :  { %1149 = vmatpush.bf16.msrb.mxu0 %v3715_v28  ;;  %1162 = vmatpush.bf16.msrb.mxu1 %v3719_v32 }
  0xf3   :  { %1175 = vmatpush.bf16.msrb.mxu2 %v3721_v33  ;;  %1188 = vmatpush.bf16.msrb.mxu3 %v3724_v38 }
  0xf6   :  { %1150 = vmatpush.bf16.msrb.mxu0 %v3727_v49  ;;  %1163 = vmatpush.bf16.msrb.mxu1 %v3731_v53 }
  0xf7   :  { %1176 = vmatpush.bf16.msrb.mxu2 %v3733_v54  ;;  %1189 = vmatpush.bf16.msrb.mxu3 %v3736_v55 }
  0xf9   :  { %1151 = vmatmul.bf16.vlgmr.msrb.gmra.mxu0 %v695_v25  ;;  %1164 = vmatmul.bf16.vlgmr.msrb.gmra.mxu1 %v695_v25 }
  0xfa   :  { %1218 = vmatpush.bf16.msra.mxu0 %v3738_v56  ;;  %1231 = vmatpush.bf16.msra.mxu1 %v3740_v62  ;;  %v5281_v56 = vld [vmem:[#allocation84_spill] sm:$0xff] }
  0xfb   :  { %1177 = vmatmul.bf16.vlgmr.msrb.gmra.mxu2 %v695_v25  ;;  %1190 = vmatmul.bf16.vlgmr.msrb.gmra.mxu3 %v695_v25  ;;  %v5239_v25 = vld [vmem:[#allocation49_spill] sm:$0xff] }
  0xfc   :  { %1244 = vmatpush.bf16.msra.mxu2 %v3746_v3  ;;  %1257 = vmatpush.bf16.msra.mxu3 %v5222_v36 }
  0xfe   :  { %1219 = vmatpush.bf16.msra.mxu0 %v5223_v46  ;;  %1232 = vmatpush.bf16.msra.mxu1 %v5224_v21 }
 0x100   :  { %1245 = vmatpush.bf16.msra.mxu2 %v5225_v41  ;;  %1258 = vmatpush.bf16.msra.mxu3 %v5226_v27  ;;  %v5279_v27 = vld [vmem:[#allocation81_spill] sm:$0xff] }
 0x102   :  { %1220 = vmatpush.bf16.msra.mxu0 %v5227_v7  ;;  %1233 = vmatpush.bf16.msra.mxu1 %v5228_v31  ;;  %v5278_v31 = vld [vmem:[#allocation78_spill] sm:$0xff] }
 0x104   :  { %1246 = vmatpush.bf16.msra.mxu2 %v5229_v61  ;;  %1259 = vmatpush.bf16.msra.mxu3 %v5230_v0  ;;  %v5240_v61 = vld [vmem:[#allocation50_spill] sm:$0xff]  ;;  %v5241_v0 = vld [vmem:[#allocation51_spill] sm:$0xff] }
 0x106   :  { %1221 = vmatpush.bf16.msra.mxu0 %v5231_v29  ;;  %1234 = vmatpush.bf16.msra.mxu1 %v5232_v5  ;;  %v5242_v29 = vld [vmem:[#allocation52_spill] sm:$0xff]  ;;  %v5243_v5 = vld [vmem:[#allocation53_spill] sm:$0xff] }
 0x108   :  { %1247 = vmatpush.bf16.msra.mxu2 %v5233_v42  ;;  %1260 = vmatpush.bf16.msra.mxu3 %v5234_v20  ;;  %v5244_v42 = vld [vmem:[#allocation54_spill] sm:$0xff]  ;;  %v5245_v20 = vld [vmem:[#allocation55_spill] sm:$0xff] }
 0x10a   :  { %1222 = vmatpush.bf16.msra.mxu0 %v5235_v51  ;;  %1235 = vmatpush.bf16.msra.mxu1 %v5236_v63  ;;  %v5246_v51 = vld [vmem:[#allocation56_spill] sm:$0xff]  ;;  %v5247_v63 = vld [vmem:[#allocation57_spill] sm:$0xff] }
 0x10c   :  { %1248 = vmatpush.bf16.msra.mxu2 %v5237_v23  ;;  %1261 = vmatpush.bf16.msra.mxu3 %v5238_v24  ;;  %v5248_v23 = vld [vmem:[#allocation58_spill] sm:$0xff]  ;;  %v5249_v24 = vld [vmem:[#allocation61_spill] sm:$0xff] }
 0x10e   :  { %1223 = vmatpush.bf16.msra.mxu0 %v5239_v25  ;;  %1236 = vmatpush.bf16.msra.mxu1 %v5240_v61  ;;  %v5250_v25 = vld [vmem:[#allocation62_spill] sm:$0xff]  ;;  %v5251_v61 = vld [vmem:[#allocation59_spill] sm:$0xff] }
 0x110   :  { %1249 = vmatpush.bf16.msra.mxu2 %v5241_v0  ;;  %1262 = vmatpush.bf16.msra.mxu3 %v5242_v29  ;;  %v5252_v0 = vld [vmem:[#allocation60_spill] sm:$0xff]  ;;  %v5253_v29 = vld [vmem:[#allocation63_spill] sm:$0xff] }
 0x112   :  { %1224 = vmatpush.bf16.msra.mxu0 %v5243_v5  ;;  %1237 = vmatpush.bf16.msra.mxu1 %v5244_v42  ;;  %v5254_v5 = vld [vmem:[#allocation64_spill] sm:$0xff]  ;;  %v5255_v42 = vld [vmem:[#allocation65_spill] sm:$0xff] }
 0x114   :  { %1250 = vmatpush.bf16.msra.mxu2 %v5245_v20  ;;  %1263 = vmatpush.bf16.msra.mxu3 %v5246_v51  ;;  %v5256_v20 = vld [vmem:[#allocation66_spill] sm:$0xff]  ;;  %v5257_v51 = vld [vmem:[#allocation67_spill] sm:$0xff] }
 0x116   :  { %1225 = vmatpush.bf16.msra.mxu0 %v5247_v63  ;;  %1238 = vmatpush.bf16.msra.mxu1 %v5248_v23  ;;  %v5258_v63 = vld [vmem:[#allocation68_spill] sm:$0xff]  ;;  %v5259_v23 = vld [vmem:[#allocation69_spill] sm:$0xff] }
 0x118   :  { %1251 = vmatpush.bf16.msra.mxu2 %v5251_v61  ;;  %1264 = vmatpush.bf16.msra.mxu3 %v5252_v0  ;;  %v5262_v61 = vld [vmem:[#allocation72_spill] sm:$0xff]  ;;  %v5263_v0 = vld [vmem:[#allocation73_spill] sm:$0xff] }
 0x11a   :  { %1270 = vmatpush.bf16.msrb.mxu0 %v5249_v24  ;;  %1283 = vmatpush.bf16.msrb.mxu1 %v5250_v25  ;;  %v5260_v24 = vld [vmem:[#allocation70_spill] sm:$0xff]  ;;  %v5261_v25 = vld [vmem:[#allocation71_spill] sm:$0xff] }
 0x11c   :  { %1296 = vmatpush.bf16.msrb.mxu2 %v5253_v29  ;;  %1309 = vmatpush.bf16.msrb.mxu3 %v5254_v5  ;;  %v5264_v29 = vld [vmem:[#allocation74_spill] sm:$0xff]  ;;  %v5265_v5 = vld [vmem:[#allocation75_spill] sm:$0xff] }
 0x11e   :  { %1271 = vmatpush.bf16.msrb.mxu0 %v5255_v42  ;;  %1284 = vmatpush.bf16.msrb.mxu1 %v5256_v20  ;;  %v5266_v42 = vld [vmem:[#allocation79_spill] sm:$0xff]  ;;  %v5267_v20 = vld [vmem:[#allocation80_spill] sm:$0xff] }
 0x120   :  { %1297 = vmatpush.bf16.msrb.mxu2 %v5257_v51  ;;  %1310 = vmatpush.bf16.msrb.mxu3 %v5258_v63  ;;  %v5268_v51 = vld [vmem:[#allocation82_spill] sm:$0xff]  ;;  %v5269_v63 = vld [vmem:[#allocation83_spill] sm:$0xff] }
 0x122   :  { %1272 = vmatpush.bf16.msrb.mxu0 %v5259_v23  ;;  %1285 = vmatpush.bf16.msrb.mxu1 %v5260_v24  ;;  %v5276_v24 = vld [vmem:[#allocation76_spill] sm:$0xff]  ;;  %v5277_v23 = vld [vmem:[#allocation77_spill] sm:$0xff] }
 0x124   :  { %1298 = vmatpush.bf16.msrb.mxu2 %v5261_v25  ;;  %1311 = vmatpush.bf16.msrb.mxu3 %v5262_v61  ;;  %v5270_v61 = vld [vmem:[#allocation89_spill] sm:$0xff] }
 0x126   :  { %1273 = vmatpush.bf16.msrb.mxu0 %v5263_v0  ;;  %1286 = vmatpush.bf16.msrb.mxu1 %v5264_v29  ;;  %v5271_v0 = vld [vmem:[#allocation93_spill] sm:$0xff]  ;;  %v5272_v29 = vld [vmem:[#allocation94_spill] sm:$0xff] }
 0x128   :  { %1299 = vmatpush.bf16.msrb.mxu2 %v5265_v5  ;;  %1312 = vmatpush.bf16.msrb.mxu3 %v5266_v42  ;;  %v5273_v5 = vld [vmem:[#allocation96_spill] sm:$0xff]  ;;  %v5274_v42 = vld [vmem:[#allocation97_spill] sm:$0xff] }
 0x12a   :  { %1274 = vmatpush.bf16.msrb.mxu0 %v5267_v20  ;;  %1287 = vmatpush.bf16.msrb.mxu1 %v5268_v51 }
 0x12c   :  { %1300 = vmatpush.bf16.msrb.mxu2 %v5269_v63  ;;  %1313 = vmatpush.bf16.msrb.mxu3 %v3924_v6 }
 0x12e   :  { %1275 = vmatpush.bf16.msrb.mxu0 %v3932_v2  ;;  %1288 = vmatpush.bf16.msrb.mxu1 %v3939_v43  ;;  %v5275_v2 = vld [vmem:[#allocation103_spill] sm:$0xff] }
 0x130   :  { %1301 = vmatpush.bf16.msrb.mxu2 %v5270_v61  ;;  %1314 = vmatpush.bf16.msrb.mxu3 %v5271_v0 }
 0x132   :  { %1276 = vmatpush.bf16.msrb.mxu0 %v5272_v29  ;;  %1289 = vmatpush.bf16.msrb.mxu1 %v5273_v5 }
 0x133   :  { %v128_v5 = vpop.permute.xlu1 %127 }
 0x134   :  { %1302 = vmatpush.bf16.msrb.mxu2 %v5274_v42  ;;  %1315 = vmatpush.bf16.msrb.mxu3 %v3966_v37  ;;  %v179_v55 = vmul.f32 %v5281_v56, %v128_v5 }
 0x136   :  { %1277 = vmatpush.bf16.msrb.mxu0 %v3979_v50  ;;  %1290 = vmatpush.bf16.msrb.mxu1 %v3982_v40 }
 0x138   :  { %1303 = vmatpush.bf16.msrb.mxu2 %v3984_v44  ;;  %1316 = vmatpush.bf16.msrb.mxu3 %v5275_v2  ;;  %v177_v44 = vmul.f32 %v5276_v24, %v128_v5  ;;  %v178_v2 = vmul.f32 %v5277_v23, %v128_v5  ;;  %v5282_v24 = vld [vmem:[#allocation87_spill] sm:$0xff]  ;;  %v5283_v23 = vld [vmem:[#allocation90_spill] sm:$0xff] }
 0x139   :  { %v180_v54 = vmul.f32 %v5282_v24, %v128_v5 }
 0x13c   :  { %v211_v25 = vpop.permute.xlu1 %210 }
 0x13d   :  { %v253_v7 = vmul.f32 %v5278_v31, %v211_v25  ;;  %v254_v41 = vmul.f32 %v5279_v27, %v211_v25  ;;  %v255_v53 = vmul.f32 %v5283_v23, %v211_v25  ;;  %v5284_v31 = vld [vmem:[#allocation91_spill] sm:$0xff] }
 0x13e   :  { %v256_v49 = vmul.f32 %v5284_v31, %v211_v25 }
 0x13f   :  { %v285_v46 = vadd.f32 %v253_v7, %v177_v44  ;;  %v5286_v44 = vld [vmem:[#allocation95_spill] sm:$0xff]  ;;  %v287_v56 = vadd.f32 %v255_v53, %v179_v55 }
 0x140   :  { %v288_v5 = vadd.f32 %v256_v49, %v180_v54 }
 0x155   :  { %v865_v43 = vpop.f32.mrf.mxu0  ;;  %v878_v61 = vpop.f32.mrf.mxu1 }
 0x15c   :  { %v4108_v6 = vpop.f32.mrf.mxu2  ;;  %v904_v0 = vpop.f32.mrf.mxu3 }
 0x15d   :  { %v867_v29 = vpop.f32.mrf.mxu0  ;;  %v880_v63 = vpop.f32.mrf.mxu1 }
 0x15e   :  { %v451_v63 = vld [vmem:[#allocation10] sm:$0xf] }
 0x15f   :  { %v4118_v3 = vperm.slane %v451_v63, 1  ;;  %v4130_v53 = vperm.slane %v451_v63, 3 }
 0x164   :  { %v893_v51 = vpop.f32.mrf.mxu2  ;;  %v906_v42 = vpop.f32.mrf.mxu3 }
 0x165   :  { %v1077_v20 = vpop.f32.mrf.mxu0  ;;  %v1090_v37 = vpop.f32.mrf.mxu1  ;;  %v286_v51 = vadd.f32 %v254_v41, %v178_v2  ;;  %v4116_v42 = vperm.slane %v451_v63, 0 }
 0x166   :  { %v1078_v36 = vadd.f32 %v1077_v20, %v865_v43  ;;  %v1091_v62 = vadd.f32 %v1090_v37, %v878_v61 }
 0x167   :  { %5280 = vst [vmem:[#allocation104_spill] sm:$0xff] %v4116_v42  ;;  %v328_v2 = vadd.f32 %v5286_v44, %v286_v51 }
 0x168   :  { %v1120_v41 = vadd.f32 %v1078_v36, %v4116_v42  ;;  %v1121_v37 = vadd.f32 %v1091_v62, %v4118_v3 }
 0x16a   :  { %v1124_v38 = vmul.f32 0.5, %v1120_v41  ;;  %v1125_v25 = vmul.f32 0.5, %v1121_v37 }
 0x16c   :  { %v4110_v50 = vpop.f32.mrf.mxu2  ;;  %v1116_v40 = vpop.f32.mrf.mxu3 }
 0x16d   :  { %v1079_v21 = vpop.f32.mrf.mxu0  ;;  %v1092_v29 = vpop.f32.mrf.mxu1  ;;  %v1117_v49 = vadd.f32 %v1116_v40, %v904_v0  ;;  %v1104_v40 = vadd.f32 %v4110_v50, %v4108_v6 }
 0x16e   :  { %v5285_v29 = vld [vmem:[#allocation92_spill] sm:$0xff] }
 0x16f   :  { %v327_v15 = vadd.f32 %v5285_v29, %v285_v46  ;;  %v330_v46 = vadd.f32 %v3992_v57, %v288_v5 }
 0x174   :  { %v1105_v27 = vpop.f32.mrf.mxu2  ;;  %v1118_v21 = vpop.f32.mrf.mxu3 }
 0x175   :  { %v5287_v27 = vld [vmem:[#allocation102_spill] sm:$0xff] }
 0x176   :  { %v1152_v43 = vpop.f32.mrf.mxu0  ;;  %v1165_v7 = vpop.f32.mrf.mxu1  ;;  %v329_v21 = vadd.f32 %v5287_v27, %v287_v56  ;;  %v1123_v56 = vadd.f32 %v1117_v49, %v4130_v53 }
 0x177   :  { %v1195_v61 = vadd.f32 %v1152_v43, %v327_v15  ;;  %v1196_v20 = vadd.f32 %v1165_v7, %v328_v2 }
 0x179   :  { %v1199_v24 = vmul.f32 0.5, %v1195_v61  ;;  %v1200_v23 = vmul.f32 0.5, %v1196_v20  ;;  %v4133_v20 = vperm.slane %v451_v63, 2 }
 0x17b   :  { %3230 = vtanh.f32 %v1199_v24 }
 0x17c   :  { %3232 = vtanh.f32 %v1200_v23 }
 0x17d   :  { %3234 = vtanh.f32 %v1124_v38 }
 0x17e   :  { %v1178_v51 = vpop.f32.mrf.mxu2  ;;  %v1191_v36 = vpop.f32.mrf.mxu3  ;;  %3236 = vtanh.f32 %v1125_v25 }
 0x17f   :  { %v1197_v42 = vadd.f32 %v1178_v51, %v329_v21  ;;  %v1198_v44 = vadd.f32 %v1191_v36, %v330_v46  ;;  %v1154_v62 = vpop.f32.mrf.mxu0  ;;  %v1167_v15 = vpop.f32.mrf.mxu1  ;;  %v1122_v46 = vadd.f32 %v1104_v40, %v4133_v20  ;;  %v5288_v40 = vld [vmem:[#allocation24_spill] sm:$0xff] }
 0x181   :  { %v1201_v54 = vmul.f32 0.5, %v1197_v42  ;;  %3238 = vtanh.f32 %v1198_v44  ;;  %v3231_v55 = vpop.eup %3230  ;;  %v1126_v49 = vmul.f32 0.5, %v1122_v46  ;;  %v5295_v46 = vld [vmem:[#allocation30_spill] sm:$0xff] }
 0x182   :  { %v1205_v24 = vmul.f32 0.5, %v3231_v55  ;;  %v3233_v2 = vpop.eup %3232 }
 0x183   :  { %v3235_v41 = vpop.eup %3234  ;;  %v1206_v43 = vmul.f32 0.5, %v3233_v2  ;;  %3240 = vtanh.f32 %v1201_v54 }
 0x184   :  { %v1208_v23 = vadd.f32 0.5, %v1205_v24  ;;  %v3237_v38 = vpop.eup %3236  ;;  %3242 = vtanh.f32 %v1123_v56  ;;  %v1130_v44 = vmul.f32 0.5, %v3235_v41  ;;  %v114_v41 = vld [vmem:[%s4942_s0 + $0x18] sm:$0xff] }
 0x185   :  { %v1209_v0 = vadd.f32 0.5, %v1206_v43  ;;  %v1131_v5 = vmul.f32 0.5, %v3237_v38  ;;  %137 = vperm.xlu1 %3212, %v114_v41  }
 0x186   :  { %v1180_v7 = vpop.f32.mrf.mxu2  ;;  %v1193_v37 = vpop.f32.mrf.mxu3  ;;  %v1133_v36 = vadd.f32 0.5, %v1130_v44  ;;  %v5291_v44 = vld [vmem:[#allocation26_spill] sm:$0xff] }
 0x187   :  { %v3239_v61 = vpop.eup %3238  ;;  %v1212_v25 = vmul.f32 %v1209_v0, %v4000_v14  ;;  %v1134_v62 = vadd.f32 0.5, %v1131_v5  ;;  %v5289_v0 = vmov 0   ;;  %v5292_v5 = vld [vmem:[#allocation27_spill] sm:$0xff] }
 0x188   :  { %v1213_v42 = vmul.f32 %v3239_v61, %v1208_v23  ;;  %v113_v23 = vld [vmem:[%s4942_s0 + $0x10] sm:$0xff] }
 0x189   :  { %v3241_v21 = vpop.eup %3240  ;;  %v1137_v6 = vmul.f32 0.0, %v1134_v62  ;;  %132 = vperm.xlu2 %3210, %v113_v23   ;;  %v5297_v62 = vld [vmem:[#allocation32_spill] sm:$0xff] }
 0x18a   :  { %v4139_v51 = vadd.f32 %v1213_v42, %v1212_v25  ;;  %v3243_v63 = vpop.eup %3242  ;;  %v1207_v15 = vmul.f32 0.5, %v3241_v21  ;;  %v5290_v42 = vld [vmem:[#allocation25_spill] sm:$0xff]  ;;  %v5293_v25 = vld [vmem:[#allocation28_spill] sm:$0xff] }
 0x18b   :  { %v1138_v50 = vmul.f32 %v3243_v63, %v1133_v36  ;;  %v5294_v21 = vld [vmem:[#allocation29_spill] sm:$0xff]  ;;  %v5296_v36 = vld [vmem:[#allocation31_spill] sm:$0xff] }
 0x18c   :  { %3244 = vtanh.f32 %v4139_v51  ;;  %v1210_v54 = vadd.f32 0.5, %v1207_v15  ;;  %v5298_v63 = vld [vmem:[#allocation33_spill] sm:$0xff]  ;;  %v5299_v15 = vld [vmem:[#allocation34_spill] sm:$0xff] }
 0x18d   :  { %3246 = vtanh.f32 %v1126_v49  ;;  %v4142_v2 = vadd.f32 %v1138_v50, %v1137_v6  ;;  %3214 = vset.pattern.permute.xlu1 %v5220_v16  ;;  %v5300_v49 = vld [vmem:[#allocation35_spill] sm:$0xff]  ;;  %v5301_v6 = vld [vmem:[#allocation36_spill] sm:$0xff]  ;;  %v5302_v50 = vld [vmem:[#allocation37_spill] sm:$0xff] }
 0x18f   :  { %3248 = vtanh.f32 %v4142_v2 }
 0x191   :  { %3211 = vset.pattern.permute.xlu2 %v5220_v16  ;;  %v5316_v16 = vld [vmem:[#allocation51_spill] sm:$0xff] }
 0x192   :  { %v3245_v55 = vpop.eup %3244  ;;  %214 = vperm.xlu2 %3211, %v113_v23   ;;  %v5309_v23 = vld [vmem:[#allocation44_spill] sm:$0xff] }
 0x193   :  { %v1216_v24 = vmul.f32 %v3245_v55, %v1210_v54  ;;  %v3247_v56 = vpop.eup %3246  ;;  %v5303_v54 = vld [vmem:[#allocation38_spill] sm:$0xff]  ;;  %v5304_v55 = vld [vmem:[#allocation39_spill] sm:$0xff] }
 0x194   :  { %v1132_v43 = vmul.f32 0.5, %v3247_v56  ;;  %v5307_v56 = vld [vmem:[#allocation42_spill] sm:$0xff] }
 0x195   :  { %v1217_v14 = vpack.c.bf16 %v1216_v24, %v1216_v24  ;;  %v3249_v38 = vpop.eup %3248  ;;  %v5305_v24 = vld [vmem:[#allocation40_spill] sm:$0xff] }
 0x196   :  { %v1135_v7 = vadd.f32 0.5, %v1132_v43  ;;  %v5310_v43 = vld [vmem:[#allocation45_spill] sm:$0xff] }
 0x197   :  { %1226 = vmatmul.bf16.vlgmr.msra.gmra.mxu0 %v1217_v14  ;;  %1239 = vmatmul.bf16.vlgmr.msra.gmra.mxu1 %v1217_v14 }
 0x198   :  { %1252 = vmatmul.bf16.vlgmr.msra.gmra.mxu2 %v1217_v14  ;;  %1265 = vmatmul.bf16.vlgmr.msra.gmra.mxu3 %v1217_v14  ;;  %v1141_v37 = vmul.f32 %v3249_v38, %v1135_v7  ;;  %v5311_v38 = vld [vmem:[#allocation46_spill] sm:$0xff]  ;;  %v5312_v7 = vld [vmem:[#allocation47_spill] sm:$0xff] }
 0x199   :  { %1345 = vmatpush.bf16.msra.mxu0 %v3642_v4  ;;  %1358 = vmatpush.bf16.msra.mxu1 %v3644_v8 }
 0x19a   :  { %1371 = vmatpush.bf16.msra.mxu2 %v3646_v9  ;;  %1384 = vmatpush.bf16.msra.mxu3 %v3649_v13  ;;  %v1142_v61 = vpack.c.bf16 %v1141_v37, %v1141_v37  ;;  %v5313_v37 = vld [vmem:[#allocation48_spill] sm:$0xff] }
 0x19b   :  { %218 = vperm.xlu2 %3211, %v114_v41   ;;  %v5308_v41 = vld [vmem:[#allocation43_spill] sm:$0xff] }
 0x19d   :  { %1346 = vmatpush.bf16.msra.mxu0 %v3653_v17  ;;  %1359 = vmatpush.bf16.msra.mxu1 %v3655_v18 }
 0x19e   :  { %1372 = vmatpush.bf16.msra.mxu2 %v3658_v22  ;;  %1385 = vmatpush.bf16.msra.mxu3 %v3660_v26 }
 0x1a1   :  { %1347 = vmatpush.bf16.msra.mxu0 %v3663_v30  ;;  %1360 = vmatpush.bf16.msra.mxu1 %v3667_v34 }
 0x1a2   :  { %1373 = vmatpush.bf16.msra.mxu2 %v3669_v35  ;;  %1386 = vmatpush.bf16.msra.mxu3 %v3672_v39 }
 0x1a3   :  { %3215 = vset.pattern.permute.xlu2 %v5289_v0  ;;  %v5315_v0 = vld [vmem:[#allocation50_spill] sm:$0xff] }
 0x1a5   :  { %1348 = vmatpush.bf16.msra.mxu0 %v3675_v45  ;;  %1361 = vmatpush.bf16.msra.mxu1 %v3679_v47 }
 0x1a6   :  { %1374 = vmatpush.bf16.msra.mxu2 %v3681_v48  ;;  %1387 = vmatpush.bf16.msra.mxu3 %v3684_v52 }
 0x1a7   :  { %1278 = vmatmul.bf16.vlgmr.msrb.gmra.mxu0 %v1142_v61  ;;  %1291 = vmatmul.bf16.vlgmr.msrb.gmra.mxu1 %v1142_v61 }
 0x1a8   :  { %1304 = vmatmul.bf16.vlgmr.msrb.gmra.mxu2 %v1142_v61  ;;  %1317 = vmatmul.bf16.vlgmr.msrb.gmra.mxu3 %v1142_v61  ;;  %v5314_v61 = vld [vmem:[#allocation49_spill] sm:$0xff] }
 0x1a9   :  { %1349 = vmatpush.bf16.msra.mxu0 %v3690_v58  ;;  %1362 = vmatpush.bf16.msra.mxu1 %v3694_v59 }
 0x1aa   :  { %1375 = vmatpush.bf16.msra.mxu2 %v3696_v60  ;;  %1388 = vmatpush.bf16.msra.mxu3 %v3699_v1 }
 0x1ad   :  { %1350 = vmatpush.bf16.msra.mxu0 %v3702_v10  ;;  %1363 = vmatpush.bf16.msra.mxu1 %v3706_v11 }
 0x1ae   :  { %1376 = vmatpush.bf16.msra.mxu2 %v3708_v12  ;;  %1389 = vmatpush.bf16.msra.mxu3 %v3711_v19  ;;  %v5365_v19 = vld [vmem:[#allocation95_spill] sm:$0xff] }
 0x1b1   :  { %1351 = vmatpush.bf16.msra.mxu0 %v3715_v28  ;;  %1364 = vmatpush.bf16.msra.mxu1 %v3719_v32 }
 0x1b2   :  { %1377 = vmatpush.bf16.msra.mxu2 %v3721_v33  ;;  %1390 = vmatpush.bf16.msra.mxu3 %v5288_v40  ;;  %v5364_v33 = vld [vmem:[#allocation90_spill] sm:$0xff] }
 0x1b5   :  { %1352 = vmatpush.bf16.msra.mxu0 %v5290_v42  ;;  %1365 = vmatpush.bf16.msra.mxu1 %v5291_v44  ;;  %v5363_v42 = vld [vmem:[#allocation87_spill] sm:$0xff] }
 0x1b6   :  { %1378 = vmatpush.bf16.msra.mxu2 %v5292_v5  ;;  %1391 = vmatpush.bf16.msra.mxu3 %v5293_v25 }
 0x1b8   :  { %1353 = vmatmul.bf16.vlgmr.msra.gmra.mxu0 %v1217_v14  ;;  %1366 = vmatmul.bf16.vlgmr.msra.gmra.mxu1 %v1217_v14 }
 0x1b9   :  { %1420 = vmatpush.bf16.msrb.mxu0 %v5294_v21  ;;  %1433 = vmatpush.bf16.msrb.mxu1 %v5295_v46 }
 0x1ba   :  { %1379 = vmatmul.bf16.vlgmr.msra.gmra.mxu2 %v1217_v14  ;;  %1392 = vmatmul.bf16.vlgmr.msra.gmra.mxu3 %v1217_v14  ;;  %v5306_v14 = vld [vmem:[#allocation41_spill] sm:$0xff] }
 0x1bb   :  { %1446 = vmatpush.bf16.msrb.mxu2 %v5296_v36  ;;  %1459 = vmatpush.bf16.msrb.mxu3 %v5297_v62  ;;  %v5361_v36 = vld [vmem:[#allocation81_spill] sm:$0xff] }
 0x1bd   :  { %1421 = vmatpush.bf16.msrb.mxu0 %v5298_v63  ;;  %1434 = vmatpush.bf16.msrb.mxu1 %v5299_v15 }
 0x1bf   :  { %1447 = vmatpush.bf16.msrb.mxu2 %v5300_v49  ;;  %1460 = vmatpush.bf16.msrb.mxu3 %v5301_v6 }
 0x1c1   :  { %1422 = vmatpush.bf16.msrb.mxu0 %v5302_v50  ;;  %1435 = vmatpush.bf16.msrb.mxu1 %v5303_v54 }
 0x1c3   :  { %1448 = vmatpush.bf16.msrb.mxu2 %v5304_v55  ;;  %1461 = vmatpush.bf16.msrb.mxu3 %v5305_v24 }
 0x1c5   :  { %1423 = vmatpush.bf16.msrb.mxu0 %v5306_v14  ;;  %1436 = vmatpush.bf16.msrb.mxu1 %v5307_v56  ;;  %v5317_v14 = vld [vmem:[#allocation52_spill] sm:$0xff]  ;;  %v5318_v56 = vld [vmem:[#allocation53_spill] sm:$0xff] }
 0x1c7   :  { %1449 = vmatpush.bf16.msrb.mxu2 %v5308_v41  ;;  %1462 = vmatpush.bf16.msrb.mxu3 %v5309_v23  ;;  %v5319_v41 = vld [vmem:[#allocation54_spill] sm:$0xff]  ;;  %v5320_v23 = vld [vmem:[#allocation55_spill] sm:$0xff] }
 0x1c9   :  { %1424 = vmatpush.bf16.msrb.mxu0 %v5310_v43  ;;  %1437 = vmatpush.bf16.msrb.mxu1 %v5311_v38  ;;  %v5321_v43 = vld [vmem:[#allocation56_spill] sm:$0xff]  ;;  %v5322_v38 = vld [vmem:[#allocation57_spill] sm:$0xff] }
 0x1cb   :  { %1450 = vmatpush.bf16.msrb.mxu2 %v5312_v7  ;;  %1463 = vmatpush.bf16.msrb.mxu3 %v5313_v37  ;;  %v5323_v7 = vld [vmem:[#allocation58_spill] sm:$0xff]  ;;  %v5324_v37 = vld [vmem:[#allocation61_spill] sm:$0xff] }
 0x1cd   :  { %1425 = vmatpush.bf16.msrb.mxu0 %v5314_v61  ;;  %1438 = vmatpush.bf16.msrb.mxu1 %v5315_v0  ;;  %v5325_v61 = vld [vmem:[#allocation62_spill] sm:$0xff]  ;;  %v5326_v0 = vld [vmem:[#allocation59_spill] sm:$0xff] }
 0x1cf   :  { %1451 = vmatpush.bf16.msrb.mxu2 %v5316_v16  ;;  %1464 = vmatpush.bf16.msrb.mxu3 %v5317_v14  ;;  %v5327_v16 = vld [vmem:[#allocation60_spill] sm:$0xff]  ;;  %v5328_v14 = vld [vmem:[#allocation63_spill] sm:$0xff] }
 0x1d1   :  { %1426 = vmatpush.bf16.msrb.mxu0 %v5318_v56  ;;  %1439 = vmatpush.bf16.msrb.mxu1 %v5319_v41  ;;  %v5329_v56 = vld [vmem:[#allocation64_spill] sm:$0xff]  ;;  %v5330_v41 = vld [vmem:[#allocation65_spill] sm:$0xff] }
 0x1d3   :  { %1452 = vmatpush.bf16.msrb.mxu2 %v5320_v23  ;;  %1465 = vmatpush.bf16.msrb.mxu3 %v5321_v43  ;;  %v5331_v23 = vld [vmem:[#allocation66_spill] sm:$0xff]  ;;  %v5332_v43 = vld [vmem:[#allocation67_spill] sm:$0xff] }
 0x1d5   :  { %1427 = vmatpush.bf16.msrb.mxu0 %v5322_v38  ;;  %1440 = vmatpush.bf16.msrb.mxu1 %v5323_v7  ;;  %v5333_v38 = vld [vmem:[#allocation68_spill] sm:$0xff]  ;;  %v5334_v7 = vld [vmem:[#allocation69_spill] sm:$0xff] }
 0x1d7   :  { %1453 = vmatpush.bf16.msrb.mxu2 %v5326_v0  ;;  %1466 = vmatpush.bf16.msrb.mxu3 %v5327_v16  ;;  %v5337_v0 = vld [vmem:[#allocation72_spill] sm:$0xff]  ;;  %v5338_v16 = vld [vmem:[#allocation73_spill] sm:$0xff] }
 0x1d9   :  { %1472 = vmatpush.bf16.msra.mxu0 %v5324_v37  ;;  %1485 = vmatpush.bf16.msra.mxu1 %v5325_v61  ;;  %v5335_v37 = vld [vmem:[#allocation70_spill] sm:$0xff]  ;;  %v5336_v61 = vld [vmem:[#allocation71_spill] sm:$0xff] }
 0x1db   :  { %1498 = vmatpush.bf16.msra.mxu2 %v5328_v14  ;;  %1511 = vmatpush.bf16.msra.mxu3 %v5329_v56  ;;  %v5339_v14 = vld [vmem:[#allocation74_spill] sm:$0xff]  ;;  %v5340_v56 = vld [vmem:[#allocation75_spill] sm:$0xff] }
 0x1dd   :  { %1473 = vmatpush.bf16.msra.mxu0 %v5330_v41  ;;  %1486 = vmatpush.bf16.msra.mxu1 %v5331_v23  ;;  %v5341_v41 = vld [vmem:[#allocation79_spill] sm:$0xff]  ;;  %v5342_v23 = vld [vmem:[#allocation80_spill] sm:$0xff] }
 0x1df   :  { %1499 = vmatpush.bf16.msra.mxu2 %v5332_v43  ;;  %1512 = vmatpush.bf16.msra.mxu3 %v5333_v38  ;;  %v5343_v43 = vld [vmem:[#allocation82_spill] sm:$0xff]  ;;  %v5344_v38 = vld [vmem:[#allocation83_spill] sm:$0xff] }
 0x1e1   :  { %1474 = vmatpush.bf16.msra.mxu0 %v5334_v7  ;;  %1487 = vmatpush.bf16.msra.mxu1 %v5335_v37  ;;  %v5345_v7 = vld [vmem:[#allocation85_spill] sm:$0xff]  ;;  %v5346_v37 = vld [vmem:[#allocation86_spill] sm:$0xff] }
 0x1e3   :  { %1500 = vmatpush.bf16.msra.mxu2 %v5336_v61  ;;  %1513 = vmatpush.bf16.msra.mxu3 %v5337_v0  ;;  %v5347_v61 = vld [vmem:[#allocation88_spill] sm:$0xff]  ;;  %v5348_v0 = vld [vmem:[#allocation89_spill] sm:$0xff] }
 0x1e5   :  { %1475 = vmatpush.bf16.msra.mxu0 %v5338_v16  ;;  %1488 = vmatpush.bf16.msra.mxu1 %v5339_v14  ;;  %v5349_v16 = vld [vmem:[#allocation93_spill] sm:$0xff]  ;;  %v5350_v14 = vld [vmem:[#allocation94_spill] sm:$0xff] }
 0x1e7   :  { %1501 = vmatpush.bf16.msra.mxu2 %v5340_v56  ;;  %1514 = vmatpush.bf16.msra.mxu3 %v5341_v41  ;;  %v5351_v56 = vld [vmem:[#allocation96_spill] sm:$0xff]  ;;  %v5352_v41 = vld [vmem:[#allocation97_spill] sm:$0xff] }
 0x1e9   :  { %1476 = vmatpush.bf16.msra.mxu0 %v5342_v23  ;;  %1489 = vmatpush.bf16.msra.mxu1 %v5343_v43  ;;  %v5353_v23 = vld [vmem:[#allocation98_spill] sm:$0xff]  ;;  %v5354_v43 = vld [vmem:[#allocation99_spill] sm:$0xff] }
 0x1eb   :  { %1502 = vmatpush.bf16.msra.mxu2 %v5344_v38  ;;  %1515 = vmatpush.bf16.msra.mxu3 %v5345_v7  ;;  %v5355_v38 = vld [vmem:[#allocation100_spill] sm:$0xff]  ;;  %v5356_v7 = vld [vmem:[#allocation101_spill] sm:$0xff] }
 0x1ed   :  { %1477 = vmatpush.bf16.msra.mxu0 %v5346_v37  ;;  %1490 = vmatpush.bf16.msra.mxu1 %v5347_v61  ;;  %v5357_v37 = vld [vmem:[#allocation103_spill] sm:$0xff] }
 0x1ef   :  { %1503 = vmatpush.bf16.msra.mxu2 %v5348_v0  ;;  %1516 = vmatpush.bf16.msra.mxu3 %v5349_v16 }
 0x1f1   :  { %1478 = vmatpush.bf16.msra.mxu0 %v5350_v14  ;;  %1491 = vmatpush.bf16.msra.mxu1 %v5351_v56  ;;  %v133_v56 = vpop.permute.xlu2 %132 }
 0x1f2   :  { %v184_v40 = vmul.f32 %v5363_v42, %v133_v56 }
 0x1f3   :  { %1504 = vmatpush.bf16.msra.mxu2 %v5352_v41  ;;  %1517 = vmatpush.bf16.msra.mxu3 %v5353_v23 }
 0x1f5   :  { %1479 = vmatpush.bf16.msra.mxu0 %v5354_v43  ;;  %1492 = vmatpush.bf16.msra.mxu1 %v5355_v38  ;;  %v5358_v38 = vld [vmem:[#allocation76_spill] sm:$0xff] }
 0x1f6   :  { %v181_v15 = vmul.f32 %v5358_v38, %v133_v56 }
 0x1f7   :  { %1505 = vmatpush.bf16.msra.mxu2 %v5356_v7  ;;  %1518 = vmatpush.bf16.msra.mxu3 %v5357_v37  ;;  %v5359_v7 = vld [vmem:[#allocation77_spill] sm:$0xff]  ;;  %v5360_v37 = vld [vmem:[#allocation78_spill] sm:$0xff] }
 0x1f8   :  { %v182_v63 = vmul.f32 %v5359_v7, %v133_v56 }
 0x1f9   :  { %v215_v6 = vpop.permute.xlu2 %214 }
 0x1fa   :  { %v257_v62 = vmul.f32 %v5360_v37, %v215_v6  ;;  %v258_v46 = vmul.f32 %v5361_v36, %v215_v6  ;;  %v259_v32 = vmul.f32 %v5364_v33, %v215_v6  ;;  %v260_v38 = vmul.f32 %v5284_v31, %v215_v6 }
 0x214   :  { %v1227_v61 = vpop.f32.mrf.mxu0  ;;  %v1240_v0 = vpop.f32.mrf.mxu1 }
 0x21b   :  { %v4250_v24 = vpop.f32.mrf.mxu2  ;;  %v1266_v16 = vpop.f32.mrf.mxu3 }
 0x21c   :  { %v1229_v14 = vpop.f32.mrf.mxu0  ;;  %v1242_v55 = vpop.f32.mrf.mxu1 }
 0x21d   :  { %v289_v14 = vadd.f32 %v257_v62, %v181_v15  ;;  %v290_v55 = vadd.f32 %v258_v46, %v182_v63 }
 0x21f   :  { %v331_v37 = vadd.f32 %v5285_v29, %v289_v14  ;;  %v332_v36 = vadd.f32 %v5365_v19, %v290_v55 }
 0x223   :  { %v1255_v54 = vpop.f32.mrf.mxu2  ;;  %v1268_v41 = vpop.f32.mrf.mxu3 }
 0x224   :  { %v1279_v50 = vpop.f32.mrf.mxu0  ;;  %v1292_v23 = vpop.f32.mrf.mxu1  ;;  %v5362_v41 = vld [vmem:[#allocation84_spill] sm:$0xff] }
 0x225   :  { %v1280_v5 = vadd.f32 %v1279_v50, %v1227_v61  ;;  %v1293_v54 = vadd.f32 %v1292_v23, %v1240_v0  ;;  %v183_v44 = vmul.f32 %v5362_v41, %v133_v56  ;;  %v292_v56 = vadd.f32 %v260_v38, %v184_v40 }
 0x227   :  { %v1323_v0 = vadd.f32 %v1293_v54, %v4118_v3  ;;  %v291_v50 = vadd.f32 %v259_v32, %v183_v44 }
 0x229   :  { %v1327_v6 = vmul.f32 0.5, %v1323_v0 }
 0x22b   :  { %v1305_v43 = vpop.f32.mrf.mxu2  ;;  %v1318_v49 = vpop.f32.mrf.mxu3 }
 0x22c   :  { %v1281_v21 = vpop.f32.mrf.mxu0  ;;  %v1294_v25 = vpop.f32.mrf.mxu1  ;;  %v1319_v32 = vadd.f32 %v1318_v49, %v1266_v16 }
 0x22d   :  { %v5366_v21 = vld [vmem:[#allocation104_spill] sm:$0xff] }
 0x22e   :  { %v1322_v25 = vadd.f32 %v1280_v5, %v5366_v21 }
 0x230   :  { %v1326_v42 = vmul.f32 0.5, %v1322_v25  ;;  %v1325_v25 = vadd.f32 %v1319_v32, %v4130_v53 }
 0x233   :  { %v1307_v28 = vpop.f32.mrf.mxu2  ;;  %v1320_v7 = vpop.f32.mrf.mxu3 }
 0x234   :  { %v333_v28 = vadd.f32 %v5287_v27, %v291_v50  ;;  %v334_v7 = vadd.f32 %v3992_v57, %v292_v56  ;;  %v1306_v56 = vadd.f32 %v1305_v43, %v4250_v24 }
 0x235   :  { %v1354_v62 = vpop.f32.mrf.mxu0  ;;  %v1367_v46 = vpop.f32.mrf.mxu1 }
 0x236   :  { %v1397_v63 = vadd.f32 %v1354_v62, %v331_v37  ;;  %v1398_v15 = vadd.f32 %v1367_v46, %v332_v36 }
 0x238   :  { %v1401_v23 = vmul.f32 0.5, %v1397_v63  ;;  %v1402_v61 = vmul.f32 0.5, %v1398_v15 }
 0x23a   :  { %3250 = vtanh.f32 %v1401_v23 }
 0x23b   :  { %3252 = vtanh.f32 %v1402_v61 }
 0x23c   :  { %3254 = vtanh.f32 %v1326_v42 }
 0x23d   :  { %v1380_v14 = vpop.f32.mrf.mxu2  ;;  %v1393_v5 = vpop.f32.mrf.mxu3  ;;  %3256 = vtanh.f32 %v1327_v6 }
 0x23e   :  { %v1399_v55 = vadd.f32 %v1380_v14, %v333_v28  ;;  %v1400_v21 = vadd.f32 %v1393_v5, %v334_v7  ;;  %v1356_v54 = vpop.f32.mrf.mxu0  ;;  %v1369_v37 = vpop.f32.mrf.mxu1  ;;  %v1324_v28 = vadd.f32 %v1306_v56, %v4133_v20  ;;  %v5371_v56 = vld [vmem:[#allocation24_spill] sm:$0xff] }
 0x240   :  { %v1403_v40 = vmul.f32 0.5, %v1399_v55  ;;  %3258 = vtanh.f32 %v1400_v21  ;;  %v3251_v44 = vpop.eup %3250  ;;  %v1328_v37 = vmul.f32 0.5, %v1324_v28  ;;  %v5378_v28 = vld [vmem:[#allocation31_spill] sm:$0xff] }
 0x241   :  { %v1407_v36 = vmul.f32 0.5, %v3251_v44  ;;  %v3253_v38 = vpop.eup %3252 }
 0x242   :  { %v3255_v62 = vpop.eup %3254  ;;  %v1408_v0 = vmul.f32 0.5, %v3253_v38  ;;  %3260 = vtanh.f32 %v1403_v40 }
 0x243   :  { %v1410_v46 = vadd.f32 0.5, %v1407_v36  ;;  %v3257_v63 = vpop.eup %3256  ;;  %3262 = vtanh.f32 %v1325_v25  ;;  %v1332_v49 = vmul.f32 0.5, %v3255_v62 }
 0x244   :  { %v1411_v23 = vadd.f32 0.5, %v1408_v0  ;;  %v1333_v21 = vmul.f32 0.5, %v3257_v63  ;;  %v5367_v63 = vld [vmem:[#allocation20_spill] sm:$0xff] }
 0x245   :  { %v1382_v15 = vpop.f32.mrf.mxu2  ;;  %v1395_v42 = vpop.f32.mrf.mxu3  ;;  %v1335_v14 = vadd.f32 0.5, %v1332_v49  ;;  %v5374_v49 = vld [vmem:[#allocation27_spill] sm:$0xff] }
 0x246   :  { %v3259_v50 = vpop.eup %3258  ;;  %v1414_v61 = vmul.f32 %v1411_v23, %v4139_v51  ;;  %v1336_v5 = vadd.f32 0.5, %v1333_v21  ;;  %v5368_v15 = vld [vmem:[#allocation21_spill] sm:$0xff]  ;;  %v5369_v42 = vld [vmem:[#allocation22_spill] sm:$0xff]  ;;  %v5375_v21 = vld [vmem:[#allocation28_spill] sm:$0xff] }
 0x247   :  { %v1415_v16 = vmul.f32 %v3259_v50, %v1410_v46  ;;  %v5370_v50 = vld [vmem:[#allocation23_spill] sm:$0xff]  ;;  %v5372_v23 = vld [vmem:[#allocation25_spill] sm:$0xff] }
 0x248   :  { %v3261_v6 = vpop.eup %3260  ;;  %v1339_v24 = vmul.f32 %v1336_v5, %v4142_v2  ;;  %v5380_v5 = vld [vmem:[#allocation33_spill] sm:$0xff] }
 0x249   :  { %v4270_v7 = vadd.f32 %v1415_v16, %v1414_v61  ;;  %v3263_v55 = vpop.eup %3262  ;;  %v1409_v54 = vmul.f32 0.5, %v3261_v6  ;;  %v5373_v16 = vld [vmem:[#allocation26_spill] sm:$0xff]  ;;  %v5376_v61 = vld [vmem:[#allocation29_spill] sm:$0xff] }
 0x24a   :  { %v1340_v43 = vmul.f32 %v3263_v55, %v1335_v14  ;;  %v5377_v6 = vld [vmem:[#allocation30_spill] sm:$0xff]  ;;  %v5379_v14 = vld [vmem:[#allocation32_spill] sm:$0xff] }
 0x24b   :  { %3264 = vtanh.f32 %v4270_v7  ;;  %v1412_v32 = vadd.f32 0.5, %v1409_v54  ;;  %v5381_v55 = vld [vmem:[#allocation34_spill] sm:$0xff]  ;;  %v5382_v54 = vld [vmem:[#allocation35_spill] sm:$0xff] }
 0x24c   :  { %3266 = vtanh.f32 %v1328_v37  ;;  %v4274_v51 = vadd.f32 %v1340_v43, %v1339_v24  ;;  %v5383_v37 = vld [vmem:[#allocation36_spill] sm:$0xff]  ;;  %v5384_v24 = vld [vmem:[#allocation37_spill] sm:$0xff]  ;;  %v5385_v43 = vld [vmem:[#allocation38_spill] sm:$0xff] }
 0x24e   :  { %3268 = vtanh.f32 %v4274_v51 }
 0x251   :  { %v3265_v40 = vpop.eup %3264 }
 0x252   :  { %v1418_v44 = vmul.f32 %v3265_v40, %v1412_v32  ;;  %v3267_v38 = vpop.eup %3266  ;;  %v5386_v32 = vld [vmem:[#allocation39_spill] sm:$0xff]  ;;  %v5387_v40 = vld [vmem:[#allocation40_spill] sm:$0xff] }
 0x253   :  { %v1334_v2 = vmul.f32 0.5, %v3267_v38  ;;  %v5390_v38 = vld [vmem:[#allocation43_spill] sm:$0xff] }
 0x254   :  { %v1419_v36 = vpack.c.bf16 %v1418_v44, %v1418_v44  ;;  %v3269_v25 = vpop.eup %3268  ;;  %v5388_v44 = vld [vmem:[#allocation41_spill] sm:$0xff] }
 0x255   :  { %v1337_v62 = vadd.f32 0.5, %v1334_v2  ;;  %v5391_v2 = vld [vmem:[#allocation44_spill] sm:$0xff] }
 0x256   :  { %1428 = vmatmul.bf16.vlgmr.msrb.gmra.mxu0 %v1419_v36  ;;  %1441 = vmatmul.bf16.vlgmr.msrb.gmra.mxu1 %v1419_v36 }
 0x257   :  { %1454 = vmatmul.bf16.vlgmr.msrb.gmra.mxu2 %v1419_v36  ;;  %1467 = vmatmul.bf16.vlgmr.msrb.gmra.mxu3 %v1419_v36  ;;  %v1343_v46 = vmul.f32 %v3269_v25, %v1337_v62  ;;  %v5392_v25 = vld [vmem:[#allocation45_spill] sm:$0xff]  ;;  %v5393_v62 = vld [vmem:[#allocation46_spill] sm:$0xff] }
 0x258   :  { %1547 = vmatpush.bf16.msrb.mxu0 %v3642_v4  ;;  %1560 = vmatpush.bf16.msrb.mxu1 %v3644_v8 }
 0x259   :  { %1573 = vmatpush.bf16.msrb.mxu2 %v3646_v9  ;;  %1586 = vmatpush.bf16.msrb.mxu3 %v3649_v13  ;;  %v1344_v0 = vpack.c.bf16 %v1343_v46, %v1343_v46  ;;  %v5394_v46 = vld [vmem:[#allocation47_spill] sm:$0xff] }
 0x25c   :  { %1548 = vmatpush.bf16.msrb.mxu0 %v3653_v17  ;;  %1561 = vmatpush.bf16.msrb.mxu1 %v3655_v18 }
 0x25d   :  { %1574 = vmatpush.bf16.msrb.mxu2 %v3658_v22  ;;  %1587 = vmatpush.bf16.msrb.mxu3 %v3660_v26 }
 0x260   :  { %1549 = vmatpush.bf16.msrb.mxu0 %v3663_v30  ;;  %1562 = vmatpush.bf16.msrb.mxu1 %v3667_v34 }
 0x261   :  { %1575 = vmatpush.bf16.msrb.mxu2 %v3669_v35  ;;  %1588 = vmatpush.bf16.msrb.mxu3 %v3672_v39 }
 0x264   :  { %1550 = vmatpush.bf16.msrb.mxu0 %v3675_v45  ;;  %1563 = vmatpush.bf16.msrb.mxu1 %v3679_v47 }
 0x265   :  { %1576 = vmatpush.bf16.msrb.mxu2 %v3681_v48  ;;  %1589 = vmatpush.bf16.msrb.mxu3 %v3684_v52 }
 0x266   :  { %1480 = vmatmul.bf16.vlgmr.msra.gmra.mxu0 %v1344_v0  ;;  %1493 = vmatmul.bf16.vlgmr.msra.gmra.mxu1 %v1344_v0 }
 0x267   :  { %1506 = vmatmul.bf16.vlgmr.msra.gmra.mxu2 %v1344_v0  ;;  %1519 = vmatmul.bf16.vlgmr.msra.gmra.mxu3 %v1344_v0  ;;  %v5395_v0 = vld [vmem:[#allocation48_spill] sm:$0xff] }
 0x268   :  { %1551 = vmatpush.bf16.msrb.mxu0 %v3690_v58  ;;  %1564 = vmatpush.bf16.msrb.mxu1 %v3694_v59 }
 0x269   :  { %1577 = vmatpush.bf16.msrb.mxu2 %v3696_v60  ;;  %1590 = vmatpush.bf16.msrb.mxu3 %v3699_v1 }
 0x26c   :  { %1552 = vmatpush.bf16.msrb.mxu0 %v3702_v10  ;;  %1565 = vmatpush.bf16.msrb.mxu1 %v3706_v11 }
 0x26d   :  { %1578 = vmatpush.bf16.msrb.mxu2 %v3708_v12  ;;  %1591 = vmatpush.bf16.msrb.mxu3 %v5367_v63 }
 0x270   :  { %1553 = vmatpush.bf16.msrb.mxu0 %v5368_v15  ;;  %1566 = vmatpush.bf16.msrb.mxu1 %v5369_v42  ;;  %v5444_v15 = vld [vmem:[#allocation87_spill] sm:$0xff] }
 0x271   :  { %1579 = vmatpush.bf16.msrb.mxu2 %v5370_v50  ;;  %1592 = vmatpush.bf16.msrb.mxu3 %v5371_v56 }
 0x274   :  { %1554 = vmatpush.bf16.msrb.mxu0 %v5372_v23  ;;  %1567 = vmatpush.bf16.msrb.mxu1 %v5373_v16 }
 0x275   :  { %1580 = vmatpush.bf16.msrb.mxu2 %v5374_v49  ;;  %1593 = vmatpush.bf16.msrb.mxu3 %v5375_v21  ;;  %v5443_v21 = vld [vmem:[#allocation77_spill] sm:$0xff] }
 0x277   :  { %1555 = vmatmul.bf16.vlgmr.msrb.gmra.mxu0 %v1419_v36  ;;  %1568 = vmatmul.bf16.vlgmr.msrb.gmra.mxu1 %v1419_v36 }
 0x278   :  { %1622 = vmatpush.bf16.msra.mxu0 %v5376_v61  ;;  %1635 = vmatpush.bf16.msra.mxu1 %v5377_v6 }
 0x279   :  { %1581 = vmatmul.bf16.vlgmr.msrb.gmra.mxu2 %v1419_v36  ;;  %1594 = vmatmul.bf16.vlgmr.msrb.gmra.mxu3 %v1419_v36  ;;  %v5389_v36 = vld [vmem:[#allocation42_spill] sm:$0xff] }
 0x27a   :  { %1648 = vmatpush.bf16.msra.mxu2 %v5378_v28  ;;  %1661 = vmatpush.bf16.msra.mxu3 %v5379_v14 }
 0x27c   :  { %1623 = vmatpush.bf16.msra.mxu0 %v5380_v5  ;;  %1636 = vmatpush.bf16.msra.mxu1 %v5381_v55  ;;  %v138_v5 = vpop.permute.xlu1 %137 }
 0x27d   :  { %v186_v49 = vmul.f32 %v5443_v21, %v138_v5  ;;  %v187_v42 = vmul.f32 %v5362_v41, %v138_v5 }
 0x27e   :  { %1649 = vmatpush.bf16.msra.mxu2 %v5382_v54  ;;  %1662 = vmatpush.bf16.msra.mxu3 %v5383_v37 }
 0x280   :  { %1624 = vmatpush.bf16.msra.mxu0 %v5384_v24  ;;  %1637 = vmatpush.bf16.msra.mxu1 %v5385_v43  ;;  %v5396_v43 = vld [vmem:[#allocation49_spill] sm:$0xff] }
 0x282   :  { %1650 = vmatpush.bf16.msra.mxu2 %v5386_v32  ;;  %1663 = vmatpush.bf16.msra.mxu3 %v5387_v40  ;;  %v5397_v32 = vld [vmem:[#allocation50_spill] sm:$0xff]  ;;  %v5398_v40 = vld [vmem:[#allocation51_spill] sm:$0xff] }
 0x284   :  { %1625 = vmatpush.bf16.msra.mxu0 %v5388_v44  ;;  %1638 = vmatpush.bf16.msra.mxu1 %v5389_v36  ;;  %v5399_v44 = vld [vmem:[#allocation52_spill] sm:$0xff]  ;;  %v5400_v36 = vld [vmem:[#allocation53_spill] sm:$0xff] }
 0x286   :  { %1651 = vmatpush.bf16.msra.mxu2 %v5390_v38  ;;  %1664 = vmatpush.bf16.msra.mxu3 %v5391_v2  ;;  %v5401_v38 = vld [vmem:[#allocation54_spill] sm:$0xff]  ;;  %v5402_v2 = vld [vmem:[#allocation55_spill] sm:$0xff] }
 0x288   :  { %1626 = vmatpush.bf16.msra.mxu0 %v5392_v25  ;;  %1639 = vmatpush.bf16.msra.mxu1 %v5393_v62  ;;  %v5403_v25 = vld [vmem:[#allocation56_spill] sm:$0xff]  ;;  %v5404_v62 = vld [vmem:[#allocation57_spill] sm:$0xff] }
 0x28a   :  { %1652 = vmatpush.bf16.msra.mxu2 %v5394_v46  ;;  %1665 = vmatpush.bf16.msra.mxu3 %v5395_v0  ;;  %v5405_v46 = vld [vmem:[#allocation58_spill] sm:$0xff]  ;;  %v5406_v0 = vld [vmem:[#allocation61_spill] sm:$0xff] }
 0x28c   :  { %1627 = vmatpush.bf16.msra.mxu0 %v5396_v43  ;;  %1640 = vmatpush.bf16.msra.mxu1 %v5397_v32  ;;  %v5407_v43 = vld [vmem:[#allocation62_spill] sm:$0xff]  ;;  %v5408_v32 = vld [vmem:[#allocation59_spill] sm:$0xff] }
 0x28e   :  { %1653 = vmatpush.bf16.msra.mxu2 %v5398_v40  ;;  %1666 = vmatpush.bf16.msra.mxu3 %v5399_v44  ;;  %v5409_v40 = vld [vmem:[#allocation60_spill] sm:$0xff]  ;;  %v5410_v44 = vld [vmem:[#allocation63_spill] sm:$0xff] }
 0x290   :  { %1628 = vmatpush.bf16.msra.mxu0 %v5400_v36  ;;  %1641 = vmatpush.bf16.msra.mxu1 %v5401_v38  ;;  %v5411_v36 = vld [vmem:[#allocation64_spill] sm:$0xff]  ;;  %v5412_v38 = vld [vmem:[#allocation65_spill] sm:$0xff] }
 0x292   :  { %1654 = vmatpush.bf16.msra.mxu2 %v5402_v2  ;;  %1667 = vmatpush.bf16.msra.mxu3 %v5403_v25  ;;  %v5413_v2 = vld [vmem:[#allocation66_spill] sm:$0xff]  ;;  %v5414_v25 = vld [vmem:[#allocation67_spill] sm:$0xff] }
 0x294   :  { %1629 = vmatpush.bf16.msra.mxu0 %v5404_v62  ;;  %1642 = vmatpush.bf16.msra.mxu1 %v5405_v46  ;;  %v5415_v62 = vld [vmem:[#allocation68_spill] sm:$0xff]  ;;  %v5416_v46 = vld [vmem:[#allocation69_spill] sm:$0xff] }
 0x296   :  { %1655 = vmatpush.bf16.msra.mxu2 %v5408_v32  ;;  %1668 = vmatpush.bf16.msra.mxu3 %v5409_v40  ;;  %v5419_v32 = vld [vmem:[#allocation72_spill] sm:$0xff]  ;;  %v5420_v40 = vld [vmem:[#allocation73_spill] sm:$0xff] }
 0x298   :  { %1674 = vmatpush.bf16.msrb.mxu0 %v5406_v0  ;;  %1687 = vmatpush.bf16.msrb.mxu1 %v5407_v43  ;;  %v5417_v0 = vld [vmem:[#allocation70_spill] sm:$0xff]  ;;  %v5418_v43 = vld [vmem:[#allocation71_spill] sm:$0xff] }
 0x29a   :  { %1700 = vmatpush.bf16.msrb.mxu2 %v5410_v44  ;;  %1713 = vmatpush.bf16.msrb.mxu3 %v5411_v36  ;;  %v5421_v44 = vld [vmem:[#allocation74_spill] sm:$0xff]  ;;  %v5422_v36 = vld [vmem:[#allocation75_spill] sm:$0xff] }
 0x29c   :  { %1675 = vmatpush.bf16.msrb.mxu0 %v5412_v38  ;;  %1688 = vmatpush.bf16.msrb.mxu1 %v5413_v2  ;;  %v5423_v38 = vld [vmem:[#allocation79_spill] sm:$0xff]  ;;  %v5424_v2 = vld [vmem:[#allocation80_spill] sm:$0xff] }
 0x29e   :  { %1701 = vmatpush.bf16.msrb.mxu2 %v5414_v25  ;;  %1714 = vmatpush.bf16.msrb.mxu3 %v5415_v62  ;;  %v5425_v25 = vld [vmem:[#allocation82_spill] sm:$0xff]  ;;  %v5426_v62 = vld [vmem:[#allocation83_spill] sm:$0xff] }
 0x2a0   :  { %1676 = vmatpush.bf16.msrb.mxu0 %v5416_v46  ;;  %1689 = vmatpush.bf16.msrb.mxu1 %v5417_v0  ;;  %v5427_v46 = vld [vmem:[#allocation85_spill] sm:$0xff]  ;;  %v5428_v0 = vld [vmem:[#allocation86_spill] sm:$0xff] }
 0x2a2   :  { %1702 = vmatpush.bf16.msrb.mxu2 %v5418_v43  ;;  %1715 = vmatpush.bf16.msrb.mxu3 %v5419_v32  ;;  %v5429_v43 = vld [vmem:[#allocation88_spill] sm:$0xff]  ;;  %v5430_v32 = vld [vmem:[#allocation89_spill] sm:$0xff] }
 0x2a4   :  { %1677 = vmatpush.bf16.msrb.mxu0 %v5420_v40  ;;  %1690 = vmatpush.bf16.msrb.mxu1 %v5421_v44  ;;  %v5431_v40 = vld [vmem:[#allocation93_spill] sm:$0xff]  ;;  %v5432_v44 = vld [vmem:[#allocation94_spill] sm:$0xff] }
 0x2a6   :  { %1703 = vmatpush.bf16.msrb.mxu2 %v5422_v36  ;;  %1716 = vmatpush.bf16.msrb.mxu3 %v5423_v38  ;;  %v5433_v36 = vld [vmem:[#allocation96_spill] sm:$0xff]  ;;  %v5434_v38 = vld [vmem:[#allocation97_spill] sm:$0xff] }
 0x2a8   :  { %1678 = vmatpush.bf16.msrb.mxu0 %v5424_v2  ;;  %1691 = vmatpush.bf16.msrb.mxu1 %v5425_v25  ;;  %v5435_v2 = vld [vmem:[#allocation98_spill] sm:$0xff]  ;;  %v5436_v25 = vld [vmem:[#allocation99_spill] sm:$0xff] }
 0x2aa   :  { %1704 = vmatpush.bf16.msrb.mxu2 %v5426_v62  ;;  %1717 = vmatpush.bf16.msrb.mxu3 %v5427_v46  ;;  %v5437_v62 = vld [vmem:[#allocation100_spill] sm:$0xff]  ;;  %v5438_v46 = vld [vmem:[#allocation101_spill] sm:$0xff] }
 0x2ac   :  { %1679 = vmatpush.bf16.msrb.mxu0 %v5428_v0  ;;  %1692 = vmatpush.bf16.msrb.mxu1 %v5429_v43  ;;  %v5439_v0 = vld [vmem:[#allocation103_spill] sm:$0xff] }
 0x2ae   :  { %1705 = vmatpush.bf16.msrb.mxu2 %v5430_v32  ;;  %1718 = vmatpush.bf16.msrb.mxu3 %v5431_v40 }
 0x2b0   :  { %1680 = vmatpush.bf16.msrb.mxu0 %v5432_v44  ;;  %1693 = vmatpush.bf16.msrb.mxu1 %v5433_v36 }
 0x2b2   :  { %1706 = vmatpush.bf16.msrb.mxu2 %v5434_v38  ;;  %1719 = vmatpush.bf16.msrb.mxu3 %v5435_v2  ;;  %v219_v2 = vpop.permute.xlu2 %218 }
 0x2b3   :  { %v263_v56 = vmul.f32 %v5364_v33, %v219_v2  ;;  %v264_v50 = vmul.f32 %v5284_v31, %v219_v2 }
 0x2b4   :  { %1681 = vmatpush.bf16.msrb.mxu0 %v5436_v25  ;;  %1694 = vmatpush.bf16.msrb.mxu1 %v5437_v62  ;;  %v5440_v62 = vld [vmem:[#allocation78_spill] sm:$0xff] }
 0x2b5   :  { %v261_v28 = vmul.f32 %v5440_v62, %v219_v2  ;;  %v188_v62 = vmul.f32 %v5444_v15, %v138_v5 }
 0x2b6   :  { %1707 = vmatpush.bf16.msrb.mxu2 %v5438_v46  ;;  %1720 = vmatpush.bf16.msrb.mxu3 %v5439_v0  ;;  %v5441_v46 = vld [vmem:[#allocation81_spill] sm:$0xff]  ;;  %v5442_v0 = vld [vmem:[#allocation76_spill] sm:$0xff] }
 0x2b7   :  { %v262_v6 = vmul.f32 %v5441_v46, %v219_v2  ;;  %v185_v61 = vmul.f32 %v5442_v0, %v138_v5 }
 0x2d3   :  { %v1429_v43 = vpop.f32.mrf.mxu0  ;;  %v1442_v32 = vpop.f32.mrf.mxu1 }
 0x2da   :  { %v4373_v24 = vpop.f32.mrf.mxu2  ;;  %v1468_v40 = vpop.f32.mrf.mxu3 }
 0x2db   :  { %v1431_v44 = vpop.f32.mrf.mxu0  ;;  %v1444_v37 = vpop.f32.mrf.mxu1 }
 0x2dc   :  { %v293_v44 = vadd.f32 %v261_v28, %v185_v61  ;;  %v294_v37 = vadd.f32 %v262_v6, %v186_v49 }
 0x2de   :  { %v335_v0 = vadd.f32 %v5285_v29, %v293_v44  ;;  %v336_v21 = vadd.f32 %v5365_v19, %v294_v37 }
 0x2e2   :  { %v1457_v36 = vpop.f32.mrf.mxu2  ;;  %v1470_v54 = vpop.f32.mrf.mxu3 }
 0x2e3   :  { %v1481_v38 = vpop.f32.mrf.mxu0  ;;  %v1494_v55 = vpop.f32.mrf.mxu1 }
 0x2e4   :  { %v1482_v36 = vadd.f32 %v1481_v38, %v1429_v43  ;;  %v1495_v54 = vadd.f32 %v1494_v55, %v1442_v32  ;;  %v295_v43 = vadd.f32 %v263_v56, %v187_v42  ;;  %v296_v32 = vadd.f32 %v264_v50, %v188_v62 }
 0x2e6   :  { %v1525_v6 = vadd.f32 %v1495_v54, %v4118_v3 }
 0x2e8   :  { %v1529_v5 = vmul.f32 0.5, %v1525_v6 }
 0x2ea   :  { %v1507_v25 = vpop.f32.mrf.mxu2  ;;  %v1520_v14 = vpop.f32.mrf.mxu3 }
 0x2eb   :  { %v1483_v16 = vpop.f32.mrf.mxu0  ;;  %v1496_v23 = vpop.f32.mrf.mxu1  ;;  %v1521_v42 = vadd.f32 %v1520_v14, %v1468_v40 }
 0x2ec   :  { %v5445_v16 = vld [vmem:[#allocation104_spill] sm:$0xff] }
 0x2ed   :  { %v1524_v23 = vadd.f32 %v1482_v36, %v5445_v16 }
 0x2ef   :  { %v1528_v41 = vmul.f32 0.5, %v1524_v23  ;;  %v1527_v23 = vadd.f32 %v1521_v42, %v4130_v53 }
 0x2f2   :  { %v1509_v63 = vpop.f32.mrf.mxu2  ;;  %v1522_v46 = vpop.f32.mrf.mxu3 }
 0x2f3   :  { %v337_v63 = vadd.f32 %v5287_v27, %v295_v43  ;;  %v338_v46 = vadd.f32 %v3992_v57, %v296_v32  ;;  %v1508_v32 = vadd.f32 %v1507_v25, %v4373_v24 }
 0x2f4   :  { %v1556_v61 = vpop.f32.mrf.mxu0  ;;  %v1569_v49 = vpop.f32.mrf.mxu1 }
 0x2f5   :  { %v1599_v28 = vadd.f32 %v1556_v61, %v335_v0  ;;  %v1600_v55 = vadd.f32 %v1569_v49, %v336_v21 }
 0x2f7   :  { %v1603_v38 = vmul.f32 0.5, %v1599_v28  ;;  %v1604_v2 = vmul.f32 0.5, %v1600_v55 }
 0x2f9   :  { %3270 = vtanh.f32 %v1603_v38 }
 0x2fa   :  { %3272 = vtanh.f32 %v1604_v2 }
 0x2fb   :  { %3274 = vtanh.f32 %v1528_v41 }
 0x2fc   :  { %v1582_v44 = vpop.f32.mrf.mxu2  ;;  %v1595_v37 = vpop.f32.mrf.mxu3  ;;  %3276 = vtanh.f32 %v1529_v5 }
 0x2fd   :  { %v1601_v36 = vadd.f32 %v1582_v44, %v337_v63  ;;  %v1602_v16 = vadd.f32 %v1595_v37, %v338_v46  ;;  %v1558_v54 = vpop.f32.mrf.mxu0  ;;  %v1571_v0 = vpop.f32.mrf.mxu1  ;;  %v1526_v63 = vadd.f32 %v1508_v32, %v4133_v20  ;;  %v5448_v32 = vld [vmem:[#allocation20_spill] sm:$0xff] }
 0x2ff   :  { %v1605_v50 = vmul.f32 0.5, %v1601_v36  ;;  %3278 = vtanh.f32 %v1602_v16  ;;  %v3271_v56 = vpop.eup %3270  ;;  %v1530_v0 = vmul.f32 0.5, %v1526_v63  ;;  %v5455_v63 = vld [vmem:[#allocation27_spill] sm:$0xff] }
 0x300   :  { %v1609_v21 = vmul.f32 0.5, %v3271_v56  ;;  %v3273_v62 = vpop.eup %3272 }
 0x301   :  { %v3275_v61 = vpop.eup %3274  ;;  %v1610_v6 = vmul.f32 0.5, %v3273_v62  ;;  %3280 = vtanh.f32 %v1605_v50 }
 0x302   :  { %v1612_v49 = vadd.f32 0.5, %v1609_v21  ;;  %v3277_v28 = vpop.eup %3276  ;;  %3282 = vtanh.f32 %v1527_v23  ;;  %v1534_v40 = vmul.f32 0.5, %v3275_v61 }
 0x303   :  { %v1613_v38 = vadd.f32 0.5, %v1610_v6  ;;  %v1535_v16 = vmul.f32 0.5, %v3277_v28 }
 0x304   :  { %v1584_v55 = vpop.f32.mrf.mxu2  ;;  %v1597_v41 = vpop.f32.mrf.mxu3  ;;  %v1537_v44 = vadd.f32 0.5, %v1534_v40  ;;  %v5451_v40 = vld [vmem:[#allocation23_spill] sm:$0xff] }
 0x305   :  { %v3279_v43 = vpop.eup %3278  ;;  %v1616_v2 = vmul.f32 %v1613_v38, %v4270_v7  ;;  %v1538_v37 = vadd.f32 0.5, %v1535_v16  ;;  %v115_v7 = vld [vmem:[%s4942_s0 + $0x20] sm:$0xff]  ;;  %v5447_v41 = vmov 0   ;;  %v5449_v38 = vld [vmem:[#allocation21_spill] sm:$0xff] }
 0x306   :  { %v1617_v14 = vmul.f32 %v3279_v43, %v1612_v49  ;;  %222 = vperm.xlu1 %3214, %v115_v7   ;;  %142 = vperm.xlu0 %3213, %v115_v7   ;;  %v5446_v49 = vmov 1   ;;  %v5452_v16 = vld [vmem:[#allocation24_spill] sm:$0xff]  ;;  %v5465_v7 = vld [vmem:[#allocation37_spill] sm:$0xff] }
 0x307   :  { %v3281_v5 = vpop.eup %3280  ;;  %v1541_v24 = vmul.f32 %v1538_v37, %v4274_v51  ;;  %v116_v51 = vld [vmem:[%s4942_s0 + $0x28] sm:$0xff] }
 0x308   :  { %v4393_v46 = vadd.f32 %v1617_v14, %v1616_v2  ;;  %v3283_v36 = vpop.eup %3282  ;;  %v1611_v54 = vmul.f32 0.5, %v3281_v5  ;;  %147 = vperm.xlu2 %3215, %v116_v51   ;;  %v5450_v14 = vld [vmem:[#allocation22_spill] sm:$0xff]  ;;  %v5453_v2 = vld [vmem:[#allocation25_spill] sm:$0xff] }
 0x309   :  { %v1542_v25 = vmul.f32 %v3283_v36, %v1537_v44  ;;  %v5454_v5 = vld [vmem:[#allocation26_spill] sm:$0xff]  ;;  %v5456_v44 = vld [vmem:[#allocation28_spill] sm:$0xff]  ;;  %v5457_v37 = vld [vmem:[#allocation29_spill] sm:$0xff] }
 0x30a   :  { %3284 = vtanh.f32 %v4393_v46  ;;  %v1614_v42 = vadd.f32 0.5, %v1611_v54  ;;  %v5458_v36 = vld [vmem:[#allocation30_spill] sm:$0xff]  ;;  %v5459_v54 = vld [vmem:[#allocation31_spill] sm:$0xff] }
 0x30b   :  { %3286 = vtanh.f32 %v1530_v0  ;;  %v4400_v21 = vadd.f32 %v1542_v25, %v1541_v24  ;;  %v5460_v0 = vld [vmem:[#allocation32_spill] sm:$0xff]  ;;  %v5461_v24 = vld [vmem:[#allocation33_spill] sm:$0xff]  ;;  %v5462_v25 = vld [vmem:[#allocation34_spill] sm:$0xff] }
 0x30d   :  { %3288 = vtanh.f32 %v4400_v21 }
 0x30e   :  { %226 = vperm.xlu1 %3214, %v116_v51   ;;  %3216 = vset.pattern.permute.xlu0 %v5446_v49  ;;  %v5468_v51 = vld [vmem:[#allocation40_spill] sm:$0xff] }
 0x310   :  { %v3285_v50 = vpop.eup %3284 }
 0x311   :  { %v1620_v56 = vmul.f32 %v3285_v50, %v1614_v42  ;;  %v3287_v23 = vpop.eup %3286  ;;  %v5463_v42 = vld [vmem:[#allocation35_spill] sm:$0xff]  ;;  %v5464_v50 = vld [vmem:[#allocation36_spill] sm:$0xff] }
 0x312   :  { %v1536_v61 = vmul.f32 0.5, %v3287_v23  ;;  %v5467_v23 = vld [vmem:[#allocation39_spill] sm:$0xff] }
 0x313   :  { %v1621_v62 = vpack.c.bf16 %v1620_v56, %v1620_v56  ;;  %v3289_v6 = vpop.eup %3288  ;;  %v5466_v56 = vld [vmem:[#allocation38_spill] sm:$0xff] }
 0x314   :  { %v1539_v28 = vadd.f32 0.5, %v1536_v61  ;;  %v5470_v61 = vld [vmem:[#allocation42_spill] sm:$0xff] }
 0x315   :  { %1630 = vmatmul.bf16.vlgmr.msra.gmra.mxu0 %v1621_v62  ;;  %1643 = vmatmul.bf16.vlgmr.msra.gmra.mxu1 %v1621_v62 }
 0x316   :  { %1656 = vmatmul.bf16.vlgmr.msra.gmra.mxu2 %v1621_v62  ;;  %1669 = vmatmul.bf16.vlgmr.msra.gmra.mxu3 %v1621_v62  ;;  %v1545_v55 = vmul.f32 %v3289_v6, %v1539_v28  ;;  %v5471_v6 = vld [vmem:[#allocation43_spill] sm:$0xff]  ;;  %v5472_v28 = vld [vmem:[#allocation44_spill] sm:$0xff] }
 0x317   :  { %1749 = vmatpush.bf16.msra.mxu0 %v3642_v4  ;;  %1762 = vmatpush.bf16.msra.mxu1 %v3644_v8 }
 0x318   :  { %1775 = vmatpush.bf16.msra.mxu2 %v3646_v9  ;;  %1788 = vmatpush.bf16.msra.mxu3 %v3649_v13  ;;  %v1546_v43 = vpack.c.bf16 %v1545_v55, %v1545_v55  ;;  %v5473_v55 = vld [vmem:[#allocation45_spill] sm:$0xff] }
 0x319   :  { %3217 = vset.pattern.permute.xlu1 %v5447_v41  ;;  %v5474_v41 = vld [vmem:[#allocation46_spill] sm:$0xff] }
 0x31b   :  { %1750 = vmatpush.bf16.msra.mxu0 %v3653_v17  ;;  %1763 = vmatpush.bf16.msra.mxu1 %v3655_v18 }
 0x31c   :  { %1776 = vmatpush.bf16.msra.mxu2 %v3658_v22  ;;  %1789 = vmatpush.bf16.msra.mxu3 %v3660_v26 }
 0x31f   :  { %1751 = vmatpush.bf16.msra.mxu0 %v3663_v30  ;;  %1764 = vmatpush.bf16.msra.mxu1 %v3667_v34 }
 0x320   :  { %1777 = vmatpush.bf16.msra.mxu2 %v3669_v35  ;;  %1790 = vmatpush.bf16.msra.mxu3 %v3672_v39 }
 0x323   :  { %1752 = vmatpush.bf16.msra.mxu0 %v3675_v45  ;;  %1765 = vmatpush.bf16.msra.mxu1 %v3679_v47 }
 0x324   :  { %1778 = vmatpush.bf16.msra.mxu2 %v3681_v48  ;;  %1791 = vmatpush.bf16.msra.mxu3 %v3684_v52 }
 0x325   :  { %1682 = vmatmul.bf16.vlgmr.msrb.gmra.mxu0 %v1546_v43  ;;  %1695 = vmatmul.bf16.vlgmr.msrb.gmra.mxu1 %v1546_v43 }
 0x326   :  { %1708 = vmatmul.bf16.vlgmr.msrb.gmra.mxu2 %v1546_v43  ;;  %1721 = vmatmul.bf16.vlgmr.msrb.gmra.mxu3 %v1546_v43  ;;  %v5475_v43 = vld [vmem:[#allocation47_spill] sm:$0xff] }
 0x327   :  { %1753 = vmatpush.bf16.msra.mxu0 %v3690_v58  ;;  %1766 = vmatpush.bf16.msra.mxu1 %v3694_v59 }
 0x328   :  { %1779 = vmatpush.bf16.msra.mxu2 %v3696_v60  ;;  %1792 = vmatpush.bf16.msra.mxu3 %v3699_v1 }
 0x32b   :  { %1754 = vmatpush.bf16.msra.mxu0 %v3702_v10  ;;  %1767 = vmatpush.bf16.msra.mxu1 %v3706_v11 }
 0x32c   :  { %1780 = vmatpush.bf16.msra.mxu2 %v3708_v12  ;;  %1793 = vmatpush.bf16.msra.mxu3 %v5448_v32 }
 0x32f   :  { %1755 = vmatpush.bf16.msra.mxu0 %v5449_v38  ;;  %1768 = vmatpush.bf16.msra.mxu1 %v5450_v14  ;;  %v5525_v38 = vld [vmem:[#allocation84_spill] sm:$0xff] }
 0x330   :  { %1781 = vmatpush.bf16.msra.mxu2 %v5451_v40  ;;  %1794 = vmatpush.bf16.msra.mxu3 %v5452_v16 }
 0x333   :  { %1756 = vmatpush.bf16.msra.mxu0 %v5453_v2  ;;  %1769 = vmatpush.bf16.msra.mxu1 %v5454_v5 }
 0x334   :  { %1782 = vmatpush.bf16.msra.mxu2 %v5455_v63  ;;  %1795 = vmatpush.bf16.msra.mxu3 %v5456_v44 }
 0x336   :  { %1757 = vmatmul.bf16.vlgmr.msra.gmra.mxu0 %v1621_v62  ;;  %1770 = vmatmul.bf16.vlgmr.msra.gmra.mxu1 %v1621_v62 }
 0x337   :  { %1824 = vmatpush.bf16.msrb.mxu0 %v5457_v37  ;;  %1837 = vmatpush.bf16.msrb.mxu1 %v5458_v36 }
 0x338   :  { %1783 = vmatmul.bf16.vlgmr.msra.gmra.mxu2 %v1621_v62  ;;  %1796 = vmatmul.bf16.vlgmr.msra.gmra.mxu3 %v1621_v62  ;;  %v5469_v62 = vld [vmem:[#allocation41_spill] sm:$0xff] }
 0x339   :  { %1850 = vmatpush.bf16.msrb.mxu2 %v5459_v54  ;;  %1863 = vmatpush.bf16.msrb.mxu3 %v5460_v0 }
 0x33b   :  { %1825 = vmatpush.bf16.msrb.mxu0 %v5461_v24  ;;  %1838 = vmatpush.bf16.msrb.mxu1 %v5462_v25 }
 0x33d   :  { %1851 = vmatpush.bf16.msrb.mxu2 %v5463_v42  ;;  %1864 = vmatpush.bf16.msrb.mxu3 %v5464_v50 }
 0x33f   :  { %1826 = vmatpush.bf16.msrb.mxu0 %v5465_v7  ;;  %1839 = vmatpush.bf16.msrb.mxu1 %v5466_v56  ;;  %v5476_v7 = vld [vmem:[#allocation48_spill] sm:$0xff]  ;;  %v5477_v56 = vld [vmem:[#allocation49_spill] sm:$0xff] }
 0x341   :  { %1852 = vmatpush.bf16.msrb.mxu2 %v5467_v23  ;;  %1865 = vmatpush.bf16.msrb.mxu3 %v5468_v51  ;;  %v5478_v23 = vld [vmem:[#allocation50_spill] sm:$0xff]  ;;  %v5479_v51 = vld [vmem:[#allocation51_spill] sm:$0xff] }
 0x343   :  { %1827 = vmatpush.bf16.msrb.mxu0 %v5469_v62  ;;  %1840 = vmatpush.bf16.msrb.mxu1 %v5470_v61  ;;  %v5480_v62 = vld [vmem:[#allocation52_spill] sm:$0xff]  ;;  %v5481_v61 = vld [vmem:[#allocation53_spill] sm:$0xff] }
 0x345   :  { %1853 = vmatpush.bf16.msrb.mxu2 %v5471_v6  ;;  %1866 = vmatpush.bf16.msrb.mxu3 %v5472_v28  ;;  %v5482_v6 = vld [vmem:[#allocation54_spill] sm:$0xff]  ;;  %v5483_v28 = vld [vmem:[#allocation55_spill] sm:$0xff] }
 0x347   :  { %1828 = vmatpush.bf16.msrb.mxu0 %v5473_v55  ;;  %1841 = vmatpush.bf16.msrb.mxu1 %v5474_v41  ;;  %v5484_v55 = vld [vmem:[#allocation56_spill] sm:$0xff]  ;;  %v5485_v41 = vld [vmem:[#allocation57_spill] sm:$0xff] }
 0x349   :  { %1854 = vmatpush.bf16.msrb.mxu2 %v5475_v43  ;;  %1867 = vmatpush.bf16.msrb.mxu3 %v5476_v7  ;;  %v5486_v43 = vld [vmem:[#allocation58_spill] sm:$0xff]  ;;  %v5487_v7 = vld [vmem:[#allocation61_spill] sm:$0xff] }
 0x34b   :  { %1829 = vmatpush.bf16.msrb.mxu0 %v5477_v56  ;;  %1842 = vmatpush.bf16.msrb.mxu1 %v5478_v23  ;;  %v5488_v56 = vld [vmem:[#allocation62_spill] sm:$0xff]  ;;  %v5489_v23 = vld [vmem:[#allocation59_spill] sm:$0xff] }
 0x34d   :  { %1855 = vmatpush.bf16.msrb.mxu2 %v5479_v51  ;;  %1868 = vmatpush.bf16.msrb.mxu3 %v5480_v62  ;;  %v5490_v51 = vld [vmem:[#allocation60_spill] sm:$0xff]  ;;  %v5491_v62 = vld [vmem:[#allocation63_spill] sm:$0xff] }
 0x34f   :  { %1830 = vmatpush.bf16.msrb.mxu0 %v5481_v61  ;;  %1843 = vmatpush.bf16.msrb.mxu1 %v5482_v6  ;;  %v5492_v61 = vld [vmem:[#allocation64_spill] sm:$0xff]  ;;  %v5493_v6 = vld [vmem:[#allocation65_spill] sm:$0xff] }
 0x351   :  { %1856 = vmatpush.bf16.msrb.mxu2 %v5483_v28  ;;  %1869 = vmatpush.bf16.msrb.mxu3 %v5484_v55  ;;  %v5494_v28 = vld [vmem:[#allocation66_spill] sm:$0xff]  ;;  %v5495_v55 = vld [vmem:[#allocation67_spill] sm:$0xff] }
 0x353   :  { %1831 = vmatpush.bf16.msrb.mxu0 %v5485_v41  ;;  %1844 = vmatpush.bf16.msrb.mxu1 %v5486_v43  ;;  %v5496_v41 = vld [vmem:[#allocation68_spill] sm:$0xff]  ;;  %v5497_v43 = vld [vmem:[#allocation69_spill] sm:$0xff] }
 0x355   :  { %1857 = vmatpush.bf16.msrb.mxu2 %v5489_v23  ;;  %1870 = vmatpush.bf16.msrb.mxu3 %v5490_v51  ;;  %v5500_v23 = vld [vmem:[#allocation72_spill] sm:$0xff]  ;;  %v5501_v51 = vld [vmem:[#allocation73_spill] sm:$0xff] }
 0x357   :  { %1876 = vmatpush.bf16.msra.mxu0 %v5487_v7  ;;  %1889 = vmatpush.bf16.msra.mxu1 %v5488_v56  ;;  %v5498_v7 = vld [vmem:[#allocation70_spill] sm:$0xff]  ;;  %v5499_v56 = vld [vmem:[#allocation71_spill] sm:$0xff] }
 0x359   :  { %1902 = vmatpush.bf16.msra.mxu2 %v5491_v62  ;;  %1915 = vmatpush.bf16.msra.mxu3 %v5492_v61  ;;  %v5502_v62 = vld [vmem:[#allocation74_spill] sm:$0xff]  ;;  %v5503_v61 = vld [vmem:[#allocation75_spill] sm:$0xff] }
 0x35b   :  { %1877 = vmatpush.bf16.msra.mxu0 %v5493_v6  ;;  %1890 = vmatpush.bf16.msra.mxu1 %v5494_v28  ;;  %v5504_v6 = vld [vmem:[#allocation79_spill] sm:$0xff]  ;;  %v5505_v28 = vld [vmem:[#allocation80_spill] sm:$0xff] }
 0x35d   :  { %1903 = vmatpush.bf16.msra.mxu2 %v5495_v55  ;;  %1916 = vmatpush.bf16.msra.mxu3 %v5496_v41  ;;  %v5506_v55 = vld [vmem:[#allocation82_spill] sm:$0xff]  ;;  %v5507_v41 = vld [vmem:[#allocation83_spill] sm:$0xff] }
 0x35f   :  { %1878 = vmatpush.bf16.msra.mxu0 %v5497_v43  ;;  %1891 = vmatpush.bf16.msra.mxu1 %v5498_v7  ;;  %v5508_v43 = vld [vmem:[#allocation85_spill] sm:$0xff]  ;;  %v5509_v7 = vld [vmem:[#allocation86_spill] sm:$0xff] }
 0x361   :  { %1904 = vmatpush.bf16.msra.mxu2 %v5499_v56  ;;  %1917 = vmatpush.bf16.msra.mxu3 %v5500_v23  ;;  %v5510_v56 = vld [vmem:[#allocation88_spill] sm:$0xff]  ;;  %v5511_v23 = vld [vmem:[#allocation89_spill] sm:$0xff] }
 0x363   :  { %1879 = vmatpush.bf16.msra.mxu0 %v5501_v51  ;;  %1892 = vmatpush.bf16.msra.mxu1 %v5502_v62  ;;  %v5512_v51 = vld [vmem:[#allocation93_spill] sm:$0xff]  ;;  %v5513_v62 = vld [vmem:[#allocation94_spill] sm:$0xff] }
 0x365   :  { %1905 = vmatpush.bf16.msra.mxu2 %v5503_v61  ;;  %1918 = vmatpush.bf16.msra.mxu3 %v5504_v6  ;;  %v5514_v61 = vld [vmem:[#allocation96_spill] sm:$0xff]  ;;  %v5515_v6 = vld [vmem:[#allocation97_spill] sm:$0xff] }
 0x367   :  { %1880 = vmatpush.bf16.msra.mxu0 %v5505_v28  ;;  %1893 = vmatpush.bf16.msra.mxu1 %v5506_v55  ;;  %v5516_v28 = vld [vmem:[#allocation98_spill] sm:$0xff]  ;;  %v5517_v55 = vld [vmem:[#allocation99_spill] sm:$0xff] }
 0x369   :  { %1906 = vmatpush.bf16.msra.mxu2 %v5507_v41  ;;  %1919 = vmatpush.bf16.msra.mxu3 %v5508_v43  ;;  %v5518_v41 = vld [vmem:[#allocation100_spill] sm:$0xff]  ;;  %v5519_v43 = vld [vmem:[#allocation101_spill] sm:$0xff] }
 0x36b   :  { %1881 = vmatpush.bf16.msra.mxu0 %v5509_v7  ;;  %1894 = vmatpush.bf16.msra.mxu1 %v5510_v56  ;;  %v5520_v7 = vld [vmem:[#allocation103_spill] sm:$0xff] }
 0x36d   :  { %1907 = vmatpush.bf16.msra.mxu2 %v5511_v23  ;;  %1920 = vmatpush.bf16.msra.mxu3 %v5512_v51 }
 0x36f   :  { %1882 = vmatpush.bf16.msra.mxu0 %v5513_v62  ;;  %1895 = vmatpush.bf16.msra.mxu1 %v5514_v61 }
 0x371   :  { %1908 = vmatpush.bf16.msra.mxu2 %v5515_v6  ;;  %1921 = vmatpush.bf16.msra.mxu3 %v5516_v28 }
 0x373   :  { %1883 = vmatpush.bf16.msra.mxu0 %v5517_v55  ;;  %1896 = vmatpush.bf16.msra.mxu1 %v5518_v41  ;;  %v5521_v55 = vld [vmem:[#allocation78_spill] sm:$0xff]  ;;  %v5522_v41 = vld [vmem:[#allocation81_spill] sm:$0xff] }
 0x375   :  { %1909 = vmatpush.bf16.msra.mxu2 %v5519_v43  ;;  %1922 = vmatpush.bf16.msra.mxu3 %v5520_v7  ;;  %v5523_v43 = vld [vmem:[#allocation76_spill] sm:$0xff]  ;;  %v5524_v7 = vld [vmem:[#allocation77_spill] sm:$0xff] }
 0x378   :  { %v143_v28 = vpop.permute.xlu0 %142  ;;  %v223_v0 = vpop.permute.xlu1 %222 }
 0x379   :  { %v265_v54 = vmul.f32 %v5521_v55, %v223_v0  ;;  %v266_v36 = vmul.f32 %v5522_v41, %v223_v0  ;;  %v189_v37 = vmul.f32 %v5523_v43, %v143_v28  ;;  %v190_v44 = vmul.f32 %v5524_v7, %v143_v28 }
 0x37a   :  { %v267_v55 = vmul.f32 %v5364_v33, %v223_v0  ;;  %v268_v41 = vmul.f32 %v5284_v31, %v223_v0  ;;  %v191_v43 = vmul.f32 %v5525_v38, %v143_v28  ;;  %v192_v7 = vmul.f32 %v5444_v15, %v143_v28 }
 0x392   :  { %v1631_v56 = vpop.f32.mrf.mxu0  ;;  %v1644_v23 = vpop.f32.mrf.mxu1 }
 0x399   :  { %v4504_v50 = vpop.f32.mrf.mxu2  ;;  %v1670_v51 = vpop.f32.mrf.mxu3 }
 0x39a   :  { %v1633_v62 = vpop.f32.mrf.mxu0  ;;  %v1646_v42 = vpop.f32.mrf.mxu1 }
 0x39b   :  { %v297_v62 = vadd.f32 %v265_v54, %v189_v37  ;;  %v298_v42 = vadd.f32 %v266_v36, %v190_v44 }
 0x39d   :  { %v339_v40 = vadd.f32 %v5285_v29, %v297_v62  ;;  %v340_v14 = vadd.f32 %v5365_v19, %v298_v42 }
 0x3a1   :  { %v1659_v61 = vpop.f32.mrf.mxu2  ;;  %v1672_v25 = vpop.f32.mrf.mxu3 }
 0x3a2   :  { %v1683_v6 = vpop.f32.mrf.mxu0  ;;  %v1696_v24 = vpop.f32.mrf.mxu1 }
 0x3a3   :  { %v1684_v61 = vadd.f32 %v1683_v6, %v1631_v56  ;;  %v1697_v25 = vadd.f32 %v1696_v24, %v1644_v23  ;;  %v299_v56 = vadd.f32 %v267_v55, %v191_v43  ;;  %v300_v23 = vadd.f32 %v268_v41, %v192_v7 }
 0x3a5   :  { %v1727_v36 = vadd.f32 %v1697_v25, %v4118_v3  ;;  %v341_v19 = vadd.f32 %v5287_v27, %v299_v56 }
 0x3a7   :  { %v1731_v0 = vmul.f32 0.5, %v1727_v36 }
 0x3a9   :  { %v1709_v63 = vpop.f32.mrf.mxu2  ;;  %v1722_v5 = vpop.f32.mrf.mxu3 }
 0x3aa   :  { %v1685_v2 = vpop.f32.mrf.mxu0  ;;  %v1698_v16 = vpop.f32.mrf.mxu1 }
 0x3ab   :  { %v5526_v2 = vld [vmem:[#allocation104_spill] sm:$0xff] }
 0x3ac   :  { %v1726_v16 = vadd.f32 %v1684_v61, %v5526_v2 }
 0x3ae   :  { %v1730_v42 = vmul.f32 0.5, %v1726_v16 }
 0x3b1   :  { %v1711_v32 = vpop.f32.mrf.mxu2  ;;  %v1724_v12 = vpop.f32.mrf.mxu3 }
 0x3b2   :  { %v342_v32 = vadd.f32 %v3992_v57, %v300_v23  ;;  %v1710_v23 = vadd.f32 %v1709_v63, %v4504_v50 }
 0x3b3   :  { %v1758_v37 = vpop.f32.mrf.mxu0  ;;  %v1771_v44 = vpop.f32.mrf.mxu1 }
 0x3b4   :  { %v1801_v54 = vadd.f32 %v1758_v37, %v339_v40  ;;  %v1802_v24 = vadd.f32 %v1771_v44, %v340_v14  ;;  %v1723_v14 = vadd.f32 %v1722_v5, %v1670_v51 }
 0x3b6   :  { %v1805_v6 = vmul.f32 0.5, %v1801_v54  ;;  %v1806_v62 = vmul.f32 0.5, %v1802_v24  ;;  %v1729_v16 = vadd.f32 %v1723_v14, %v4130_v53 }
 0x3b8   :  { %3290 = vtanh.f32 %v1805_v6 }
 0x3b9   :  { %3292 = vtanh.f32 %v1806_v62 }
 0x3ba   :  { %3294 = vtanh.f32 %v1730_v42 }
 0x3bb   :  { %v1784_v12 = vpop.f32.mrf.mxu2  ;;  %v1797_v28 = vpop.f32.mrf.mxu3  ;;  %3296 = vtanh.f32 %v1731_v0  ;;  %v1728_v0 = vadd.f32 %v1710_v23, %v4133_v20  ;;  %v5531_v23 = vld [vmem:[#allocation23_spill] sm:$0xff] }
 0x3bc   :  { %v1803_v61 = vadd.f32 %v1784_v12, %v341_v19  ;;  %v1804_v2 = vadd.f32 %v1797_v28, %v342_v32  ;;  %v1760_v25 = vpop.f32.mrf.mxu0  ;;  %v1773_v40 = vpop.f32.mrf.mxu1 }
 0x3bd   :  { %v1732_v40 = vmul.f32 0.5, %v1728_v0  ;;  %v5538_v0 = vld [vmem:[#allocation30_spill] sm:$0xff] }
 0x3be   :  { %v1807_v7 = vmul.f32 0.5, %v1803_v61  ;;  %3298 = vtanh.f32 %v1804_v2  ;;  %v3291_v55 = vpop.eup %3290 }
 0x3bf   :  { %v1811_v41 = vmul.f32 0.5, %v3291_v55  ;;  %v3293_v43 = vpop.eup %3292 }
 0x3c0   :  { %v3295_v37 = vpop.eup %3294  ;;  %v1812_v36 = vmul.f32 0.5, %v3293_v43  ;;  %3300 = vtanh.f32 %v1807_v7 }
 0x3c1   :  { %v1814_v44 = vadd.f32 0.5, %v1811_v41  ;;  %v3297_v54 = vpop.eup %3296  ;;  %3302 = vtanh.f32 %v1729_v16  ;;  %v1736_v51 = vmul.f32 0.5, %v3295_v37 }
 0x3c2   :  { %v1815_v6 = vadd.f32 0.5, %v1812_v36  ;;  %v1737_v2 = vmul.f32 0.5, %v3297_v54 }
 0x3c3   :  { %v1786_v24 = vpop.f32.mrf.mxu2  ;;  %v1799_v56 = vpop.f32.mrf.mxu3  ;;  %v1739_v12 = vadd.f32 0.5, %v1736_v51  ;;  %v5534_v51 = vld [vmem:[#allocation26_spill] sm:$0xff] }
 0x3c4   :  { %v3299_v19 = vpop.eup %3298  ;;  %v1818_v62 = vmul.f32 %v1815_v6, %v4393_v46  ;;  %v1740_v28 = vadd.f32 0.5, %v1737_v2  ;;  %v5528_v24 = vld [vmem:[#allocation20_spill] sm:$0xff]  ;;  %v5529_v56 = vld [vmem:[#allocation21_spill] sm:$0xff]  ;;  %v5535_v2 = vld [vmem:[#allocation27_spill] sm:$0xff] }
 0x3c5   :  { %v1819_v5 = vmul.f32 %v3299_v19, %v1814_v44  ;;  %v5530_v19 = vld [vmem:[#allocation22_spill] sm:$0xff]  ;;  %v5532_v6 = vld [vmem:[#allocation24_spill] sm:$0xff] }
 0x3c6   :  { %v3301_v42 = vpop.eup %3300  ;;  %v1743_v63 = vmul.f32 %v1740_v28, %v4400_v21  ;;  %v117_v21 = vld [vmem:[%s4942_s0 + $0x30] sm:$0xff]  ;;  %v5540_v28 = vld [vmem:[#allocation32_spill] sm:$0xff] }
 0x3c7   :  { %v4524_v32 = vadd.f32 %v1819_v5, %v1818_v62  ;;  %v3303_v61 = vpop.eup %3302  ;;  %v1813_v25 = vmul.f32 0.5, %v3301_v42  ;;  %230 = vperm.xlu0 %3216, %v117_v21   ;;  %152 = vperm.xlu2 %3215, %v117_v21   ;;  %v5533_v5 = vld [vmem:[#allocation25_spill] sm:$0xff]  ;;  %v5536_v62 = vld [vmem:[#allocation28_spill] sm:$0xff]  ;;  %v5551_v21 = vld [vmem:[#allocation43_spill] sm:$0xff] }
 0x3c8   :  { %v1744_v50 = vmul.f32 %v3303_v61, %v1739_v12  ;;  %v5537_v42 = vld [vmem:[#allocation29_spill] sm:$0xff]  ;;  %v5539_v12 = vld [vmem:[#allocation31_spill] sm:$0xff] }
 0x3c9   :  { %3304 = vtanh.f32 %v4524_v32  ;;  %v1816_v14 = vadd.f32 0.5, %v1813_v25  ;;  %v5541_v61 = vld [vmem:[#allocation33_spill] sm:$0xff]  ;;  %v5542_v25 = vld [vmem:[#allocation34_spill] sm:$0xff] }
 0x3ca   :  { %3306 = vtanh.f32 %v1732_v40  ;;  %v4528_v46 = vadd.f32 %v1744_v50, %v1743_v63  ;;  %v5543_v40 = vld [vmem:[#allocation35_spill] sm:$0xff]  ;;  %v5544_v63 = vld [vmem:[#allocation36_spill] sm:$0xff]  ;;  %v5545_v50 = vld [vmem:[#allocation37_spill] sm:$0xff] }
 0x3cc   :  { %3308 = vtanh.f32 %v4528_v46 }
 0x3cf   :  { %v3305_v7 = vpop.eup %3304  ;;  %3218 = vset.pattern.permute.xlu2 %v5446_v49  ;;  %v5527_v49 = vld [vmem:[#allocation19_spill] sm:$0xff] }
 0x3d0   :  { %v1822_v55 = vmul.f32 %v3305_v7, %v1816_v14  ;;  %v3307_v43 = vpop.eup %3306  ;;  %v5546_v14 = vld [vmem:[#allocation38_spill] sm:$0xff]  ;;  %v5547_v7 = vld [vmem:[#allocation39_spill] sm:$0xff] }
 0x3d1   :  { %v1738_v16 = vmul.f32 0.5, %v3307_v43  ;;  %v5550_v43 = vld [vmem:[#allocation42_spill] sm:$0xff] }
 0x3d2   :  { %v1823_v41 = vpack.c.bf16 %v1822_v55, %v1822_v55  ;;  %v3309_v37 = vpop.eup %3308  ;;  %v5548_v55 = vld [vmem:[#allocation40_spill] sm:$0xff] }
 0x3d3   :  { %v1741_v44 = vadd.f32 0.5, %v1738_v16  ;;  %v5552_v16 = vld [vmem:[#allocation44_spill] sm:$0xff] }
 0x3d4   :  { %1832 = vmatmul.bf16.vlgmr.msrb.gmra.mxu0 %v1823_v41  ;;  %1845 = vmatmul.bf16.vlgmr.msrb.gmra.mxu1 %v1823_v41 }
 0x3d5   :  { %1858 = vmatmul.bf16.vlgmr.msrb.gmra.mxu2 %v1823_v41  ;;  %1871 = vmatmul.bf16.vlgmr.msrb.gmra.mxu3 %v1823_v41  ;;  %v1747_v36 = vmul.f32 %v3309_v37, %v1741_v44  ;;  %v5553_v37 = vld [vmem:[#allocation45_spill] sm:$0xff]  ;;  %v5554_v44 = vld [vmem:[#allocation46_spill] sm:$0xff] }
 0x3d6   :  { %1951 = vmatpush.bf16.msrb.mxu0 %v3642_v4  ;;  %1964 = vmatpush.bf16.msrb.mxu1 %v3644_v8 }
 0x3d7   :  { %1977 = vmatpush.bf16.msrb.mxu2 %v3646_v9  ;;  %1990 = vmatpush.bf16.msrb.mxu3 %v3649_v13  ;;  %v1748_v54 = vpack.c.bf16 %v1747_v36, %v1747_v36  ;;  %v5555_v36 = vld [vmem:[#allocation47_spill] sm:$0xff] }
 0x3da   :  { %1952 = vmatpush.bf16.msrb.mxu0 %v3653_v17  ;;  %1965 = vmatpush.bf16.msrb.mxu1 %v3655_v18 }
 0x3db   :  { %1978 = vmatpush.bf16.msrb.mxu2 %v3658_v22  ;;  %1991 = vmatpush.bf16.msrb.mxu3 %v3660_v26 }
 0x3de   :  { %1953 = vmatpush.bf16.msrb.mxu0 %v3663_v30  ;;  %1966 = vmatpush.bf16.msrb.mxu1 %v3667_v34 }
 0x3df   :  { %1979 = vmatpush.bf16.msrb.mxu2 %v3669_v35  ;;  %1992 = vmatpush.bf16.msrb.mxu3 %v3672_v39 }
 0x3e2   :  { %1954 = vmatpush.bf16.msrb.mxu0 %v3675_v45  ;;  %1967 = vmatpush.bf16.msrb.mxu1 %v3679_v47 }
 0x3e3   :  { %1980 = vmatpush.bf16.msrb.mxu2 %v3681_v48  ;;  %1993 = vmatpush.bf16.msrb.mxu3 %v3684_v52 }
 0x3e4   :  { %1884 = vmatmul.bf16.vlgmr.msra.gmra.mxu0 %v1748_v54  ;;  %1897 = vmatmul.bf16.vlgmr.msra.gmra.mxu1 %v1748_v54 }
 0x3e5   :  { %1910 = vmatmul.bf16.vlgmr.msra.gmra.mxu2 %v1748_v54  ;;  %1923 = vmatmul.bf16.vlgmr.msra.gmra.mxu3 %v1748_v54  ;;  %v5556_v54 = vld [vmem:[#allocation48_spill] sm:$0xff] }
 0x3e6   :  { %1955 = vmatpush.bf16.msrb.mxu0 %v3690_v58  ;;  %1968 = vmatpush.bf16.msrb.mxu1 %v3694_v59 }
 0x3e7   :  { %1981 = vmatpush.bf16.msrb.mxu2 %v3696_v60  ;;  %1994 = vmatpush.bf16.msrb.mxu3 %v3699_v1 }
 0x3ea   :  { %1956 = vmatpush.bf16.msrb.mxu0 %v3702_v10  ;;  %1969 = vmatpush.bf16.msrb.mxu1 %v3706_v11 }
 0x3eb   :  { %1982 = vmatpush.bf16.msrb.mxu2 %v5527_v49  ;;  %1995 = vmatpush.bf16.msrb.mxu3 %v5528_v24  ;;  %v5605_v24 = vld [vmem:[#allocation95_spill] sm:$0xff] }
 0x3ee   :  { %1957 = vmatpush.bf16.msrb.mxu0 %v5529_v56  ;;  %1970 = vmatpush.bf16.msrb.mxu1 %v5530_v19 }
 0x3ef   :  { %1983 = vmatpush.bf16.msrb.mxu2 %v5531_v23  ;;  %1996 = vmatpush.bf16.msrb.mxu3 %v5532_v6 }
 0x3f2   :  { %1958 = vmatpush.bf16.msrb.mxu0 %v5533_v5  ;;  %1971 = vmatpush.bf16.msrb.mxu1 %v5534_v51 }
 0x3f3   :  { %1984 = vmatpush.bf16.msrb.mxu2 %v5535_v2  ;;  %1997 = vmatpush.bf16.msrb.mxu3 %v5536_v62  ;;  %v5604_v62 = vld [vmem:[#allocation81_spill] sm:$0xff] }
 0x3f5   :  { %1959 = vmatmul.bf16.vlgmr.msrb.gmra.mxu0 %v1823_v41  ;;  %1972 = vmatmul.bf16.vlgmr.msrb.gmra.mxu1 %v1823_v41 }
 0x3f6   :  { %2026 = vmatpush.bf16.msra.mxu0 %v5537_v42  ;;  %2039 = vmatpush.bf16.msra.mxu1 %v5538_v0 }
 0x3f7   :  { %1985 = vmatmul.bf16.vlgmr.msrb.gmra.mxu2 %v1823_v41  ;;  %1998 = vmatmul.bf16.vlgmr.msrb.gmra.mxu3 %v1823_v41  ;;  %v5549_v41 = vld [vmem:[#allocation41_spill] sm:$0xff] }
 0x3f8   :  { %2052 = vmatpush.bf16.msra.mxu2 %v5539_v12  ;;  %2065 = vmatpush.bf16.msra.mxu3 %v5540_v28 }
 0x3fa   :  { %2027 = vmatpush.bf16.msra.mxu0 %v5541_v61  ;;  %2040 = vmatpush.bf16.msra.mxu1 %v5542_v25  ;;  %v227_v61 = vpop.permute.xlu1 %226 }
 0x3fb   :  { %v270_v2 = vmul.f32 %v5604_v62, %v227_v61  ;;  %v271_v19 = vmul.f32 %v5364_v33, %v227_v61 }
 0x3fc   :  { %2053 = vmatpush.bf16.msra.mxu2 %v5543_v40  ;;  %2066 = vmatpush.bf16.msra.mxu3 %v5544_v63 }
 0x3fe   :  { %2028 = vmatpush.bf16.msra.mxu0 %v5545_v50  ;;  %2041 = vmatpush.bf16.msra.mxu1 %v5546_v14  ;;  %v5557_v14 = vld [vmem:[#allocation49_spill] sm:$0xff] }
 0x400   :  { %2054 = vmatpush.bf16.msra.mxu2 %v5547_v7  ;;  %2067 = vmatpush.bf16.msra.mxu3 %v5548_v55  ;;  %v5558_v7 = vld [vmem:[#allocation50_spill] sm:$0xff]  ;;  %v5559_v55 = vld [vmem:[#allocation51_spill] sm:$0xff] }
 0x402   :  { %2029 = vmatpush.bf16.msra.mxu0 %v5549_v41  ;;  %2042 = vmatpush.bf16.msra.mxu1 %v5550_v43  ;;  %v5560_v41 = vld [vmem:[#allocation52_spill] sm:$0xff]  ;;  %v5561_v43 = vld [vmem:[#allocation53_spill] sm:$0xff] }
 0x404   :  { %2055 = vmatpush.bf16.msra.mxu2 %v5551_v21  ;;  %2068 = vmatpush.bf16.msra.mxu3 %v5552_v16  ;;  %v5562_v21 = vld [vmem:[#allocation54_spill] sm:$0xff]  ;;  %v5563_v16 = vld [vmem:[#allocation55_spill] sm:$0xff] }
 0x406   :  { %2030 = vmatpush.bf16.msra.mxu0 %v5553_v37  ;;  %2043 = vmatpush.bf16.msra.mxu1 %v5554_v44  ;;  %v5564_v37 = vld [vmem:[#allocation56_spill] sm:$0xff]  ;;  %v5565_v44 = vld [vmem:[#allocation57_spill] sm:$0xff] }
 0x408   :  { %2056 = vmatpush.bf16.msra.mxu2 %v5555_v36  ;;  %2069 = vmatpush.bf16.msra.mxu3 %v5556_v54  ;;  %v5566_v36 = vld [vmem:[#allocation58_spill] sm:$0xff]  ;;  %v5567_v54 = vld [vmem:[#allocation61_spill] sm:$0xff] }
 0x40a   :  { %2031 = vmatpush.bf16.msra.mxu0 %v5557_v14  ;;  %2044 = vmatpush.bf16.msra.mxu1 %v5558_v7  ;;  %v5568_v14 = vld [vmem:[#allocation62_spill] sm:$0xff]  ;;  %v5569_v7 = vld [vmem:[#allocation59_spill] sm:$0xff] }
 0x40c   :  { %2057 = vmatpush.bf16.msra.mxu2 %v5559_v55  ;;  %2070 = vmatpush.bf16.msra.mxu3 %v5560_v41  ;;  %v5570_v55 = vld [vmem:[#allocation60_spill] sm:$0xff]  ;;  %v5571_v41 = vld [vmem:[#allocation63_spill] sm:$0xff] }
 0x40e   :  { %2032 = vmatpush.bf16.msra.mxu0 %v5561_v43  ;;  %2045 = vmatpush.bf16.msra.mxu1 %v5562_v21  ;;  %v5572_v43 = vld [vmem:[#allocation64_spill] sm:$0xff]  ;;  %v5573_v21 = vld [vmem:[#allocation65_spill] sm:$0xff] }
 0x410   :  { %2058 = vmatpush.bf16.msra.mxu2 %v5563_v16  ;;  %2071 = vmatpush.bf16.msra.mxu3 %v5564_v37  ;;  %v5574_v16 = vld [vmem:[#allocation66_spill] sm:$0xff]  ;;  %v5575_v37 = vld [vmem:[#allocation67_spill] sm:$0xff] }
 0x412   :  { %2033 = vmatpush.bf16.msra.mxu0 %v5565_v44  ;;  %2046 = vmatpush.bf16.msra.mxu1 %v5566_v36  ;;  %v5576_v44 = vld [vmem:[#allocation68_spill] sm:$0xff]  ;;  %v5577_v36 = vld [vmem:[#allocation69_spill] sm:$0xff] }
 0x414   :  { %2059 = vmatpush.bf16.msra.mxu2 %v5569_v7  ;;  %2072 = vmatpush.bf16.msra.mxu3 %v5570_v55  ;;  %v5580_v7 = vld [vmem:[#allocation72_spill] sm:$0xff]  ;;  %v5581_v55 = vld [vmem:[#allocation73_spill] sm:$0xff] }
 0x416   :  { %2078 = vmatpush.bf16.msrb.mxu0 %v5567_v54  ;;  %2091 = vmatpush.bf16.msrb.mxu1 %v5568_v14  ;;  %v5578_v54 = vld [vmem:[#allocation70_spill] sm:$0xff]  ;;  %v5579_v14 = vld [vmem:[#allocation71_spill] sm:$0xff] }
 0x418   :  { %2104 = vmatpush.bf16.msrb.mxu2 %v5571_v41  ;;  %2117 = vmatpush.bf16.msrb.mxu3 %v5572_v43  ;;  %v5582_v41 = vld [vmem:[#allocation74_spill] sm:$0xff]  ;;  %v5583_v43 = vld [vmem:[#allocation75_spill] sm:$0xff] }
 0x41a   :  { %2079 = vmatpush.bf16.msrb.mxu0 %v5573_v21  ;;  %2092 = vmatpush.bf16.msrb.mxu1 %v5574_v16  ;;  %v5584_v21 = vld [vmem:[#allocation79_spill] sm:$0xff]  ;;  %v5585_v16 = vld [vmem:[#allocation80_spill] sm:$0xff] }
 0x41c   :  { %2105 = vmatpush.bf16.msrb.mxu2 %v5575_v37  ;;  %2118 = vmatpush.bf16.msrb.mxu3 %v5576_v44  ;;  %v5586_v37 = vld [vmem:[#allocation82_spill] sm:$0xff]  ;;  %v5587_v44 = vld [vmem:[#allocation83_spill] sm:$0xff] }
 0x41e   :  { %2080 = vmatpush.bf16.msrb.mxu0 %v5577_v36  ;;  %2093 = vmatpush.bf16.msrb.mxu1 %v5578_v54  ;;  %v5588_v36 = vld [vmem:[#allocation85_spill] sm:$0xff]  ;;  %v5589_v54 = vld [vmem:[#allocation86_spill] sm:$0xff] }
 0x420   :  { %2106 = vmatpush.bf16.msrb.mxu2 %v5579_v14  ;;  %2119 = vmatpush.bf16.msrb.mxu3 %v5580_v7  ;;  %v5590_v14 = vld [vmem:[#allocation88_spill] sm:$0xff]  ;;  %v5591_v7 = vld [vmem:[#allocation89_spill] sm:$0xff] }
 0x422   :  { %2081 = vmatpush.bf16.msrb.mxu0 %v5581_v55  ;;  %2094 = vmatpush.bf16.msrb.mxu1 %v5582_v41  ;;  %v5592_v55 = vld [vmem:[#allocation93_spill] sm:$0xff]  ;;  %v5593_v41 = vld [vmem:[#allocation94_spill] sm:$0xff] }
 0x424   :  { %2107 = vmatpush.bf16.msrb.mxu2 %v5583_v43  ;;  %2120 = vmatpush.bf16.msrb.mxu3 %v5584_v21  ;;  %v5594_v43 = vld [vmem:[#allocation96_spill] sm:$0xff]  ;;  %v5595_v21 = vld [vmem:[#allocation97_spill] sm:$0xff] }
 0x426   :  { %2082 = vmatpush.bf16.msrb.mxu0 %v5585_v16  ;;  %2095 = vmatpush.bf16.msrb.mxu1 %v5586_v37  ;;  %v5596_v16 = vld [vmem:[#allocation98_spill] sm:$0xff]  ;;  %v5597_v37 = vld [vmem:[#allocation99_spill] sm:$0xff] }
 0x428   :  { %2108 = vmatpush.bf16.msrb.mxu2 %v5587_v44  ;;  %2121 = vmatpush.bf16.msrb.mxu3 %v5588_v36  ;;  %v5598_v44 = vld [vmem:[#allocation100_spill] sm:$0xff]  ;;  %v5599_v36 = vld [vmem:[#allocation101_spill] sm:$0xff] }
 0x42a   :  { %2083 = vmatpush.bf16.msrb.mxu0 %v5589_v54  ;;  %2096 = vmatpush.bf16.msrb.mxu1 %v5590_v14  ;;  %v5600_v54 = vld [vmem:[#allocation103_spill] sm:$0xff] }
 0x42c   :  { %2109 = vmatpush.bf16.msrb.mxu2 %v5591_v7  ;;  %2122 = vmatpush.bf16.msrb.mxu3 %v5592_v55 }
 0x42e   :  { %2084 = vmatpush.bf16.msrb.mxu0 %v5593_v41  ;;  %2097 = vmatpush.bf16.msrb.mxu1 %v5594_v43 }
 0x430   :  { %2110 = vmatpush.bf16.msrb.mxu2 %v5595_v21  ;;  %2123 = vmatpush.bf16.msrb.mxu3 %v5596_v16  ;;  %v148_v16 = vpop.permute.xlu2 %147 }
 0x431   :  { %v195_v6 = vmul.f32 %v5525_v38, %v148_v16  ;;  %v196_v23 = vmul.f32 %v5444_v15, %v148_v16 }
 0x432   :  { %2085 = vmatpush.bf16.msrb.mxu0 %v5597_v37  ;;  %2098 = vmatpush.bf16.msrb.mxu1 %v5598_v44  ;;  %v5601_v44 = vld [vmem:[#allocation76_spill] sm:$0xff] }
 0x433   :  { %v193_v12 = vmul.f32 %v5601_v44, %v148_v16  ;;  %v272_v44 = vmul.f32 %v5284_v31, %v227_v61 }
 0x434   :  { %2111 = vmatpush.bf16.msrb.mxu2 %v5599_v36  ;;  %2124 = vmatpush.bf16.msrb.mxu3 %v5600_v54  ;;  %v5602_v36 = vld [vmem:[#allocation77_spill] sm:$0xff]  ;;  %v5603_v54 = vld [vmem:[#allocation78_spill] sm:$0xff] }
 0x435   :  { %v194_v0 = vmul.f32 %v5602_v36, %v148_v16  ;;  %v269_v42 = vmul.f32 %v5603_v54, %v227_v61 }
 0x451   :  { %v1833_v14 = vpop.f32.mrf.mxu0  ;;  %v1846_v7 = vpop.f32.mrf.mxu1 }
 0x458   :  { %v4631_v50 = vpop.f32.mrf.mxu2  ;;  %v1872_v55 = vpop.f32.mrf.mxu3 }
 0x459   :  { %v1835_v41 = vpop.f32.mrf.mxu0  ;;  %v1848_v63 = vpop.f32.mrf.mxu1 }
 0x45a   :  { %v301_v41 = vadd.f32 %v269_v42, %v193_v12  ;;  %v302_v63 = vadd.f32 %v270_v2, %v194_v0 }
 0x45c   :  { %v343_v54 = vadd.f32 %v5285_v29, %v301_v41  ;;  %v344_v62 = vadd.f32 %v5605_v24, %v302_v63 }
 0x460   :  { %v1861_v43 = vpop.f32.mrf.mxu2  ;;  %v1874_v40 = vpop.f32.mrf.mxu3 }
 0x461   :  { %v1885_v21 = vpop.f32.mrf.mxu0  ;;  %v1898_v25 = vpop.f32.mrf.mxu1 }
 0x462   :  { %v1886_v43 = vadd.f32 %v1885_v21, %v1833_v14  ;;  %v1899_v40 = vadd.f32 %v1898_v25, %v1846_v7  ;;  %v303_v14 = vadd.f32 %v271_v19, %v195_v6  ;;  %v304_v7 = vadd.f32 %v272_v44, %v196_v23 }
 0x464   :  { %v1929_v0 = vadd.f32 %v1899_v40, %v4118_v3 }
 0x466   :  { %v1933_v61 = vmul.f32 0.5, %v1929_v0 }
 0x468   :  { %v1911_v37 = vpop.f32.mrf.mxu2  ;;  %v1924_v28 = vpop.f32.mrf.mxu3 }
 0x469   :  { %v1887_v51 = vpop.f32.mrf.mxu0  ;;  %v1900_v5 = vpop.f32.mrf.mxu1  ;;  %v1925_v19 = vadd.f32 %v1924_v28, %v1872_v55 }
 0x46a   :  { %v5606_v51 = vld [vmem:[#allocation104_spill] sm:$0xff] }
 0x46b   :  { %v1928_v5 = vadd.f32 %v1886_v43, %v5606_v51 }
 0x46d   :  { %v1932_v33 = vmul.f32 0.5, %v1928_v5  ;;  %v1931_v5 = vadd.f32 %v1925_v19, %v4130_v53 }
 0x470   :  { %v1913_v56 = vpop.f32.mrf.mxu2  ;;  %v1926_v36 = vpop.f32.mrf.mxu3 }
 0x471   :  { %v345_v56 = vadd.f32 %v5287_v27, %v303_v14  ;;  %v346_v36 = vadd.f32 %v3992_v57, %v304_v7  ;;  %v1912_v7 = vadd.f32 %v1911_v37, %v4631_v50 }
 0x472   :  { %v1960_v42 = vpop.f32.mrf.mxu0  ;;  %v1973_v2 = vpop.f32.mrf.mxu1 }
 0x473   :  { %v2003_v12 = vadd.f32 %v1960_v42, %v343_v54  ;;  %v2004_v25 = vadd.f32 %v1973_v2, %v344_v62 }
 0x475   :  { %v2007_v21 = vmul.f32 0.5, %v2003_v12  ;;  %v2008_v16 = vmul.f32 0.5, %v2004_v25 }
 0x477   :  { %3310 = vtanh.f32 %v2007_v21 }
 0x478   :  { %3312 = vtanh.f32 %v2008_v16 }
 0x479   :  { %3314 = vtanh.f32 %v1932_v33 }
 0x47a   :  { %v1986_v41 = vpop.f32.mrf.mxu2  ;;  %v1999_v63 = vpop.f32.mrf.mxu3  ;;  %3316 = vtanh.f32 %v1933_v61 }
 0x47b   :  { %v2005_v43 = vadd.f32 %v1986_v41, %v345_v56  ;;  %v2006_v51 = vadd.f32 %v1999_v63, %v346_v36  ;;  %v1962_v40 = vpop.f32.mrf.mxu0  ;;  %v1975_v54 = vpop.f32.mrf.mxu1  ;;  %v1930_v56 = vadd.f32 %v1912_v7, %v4133_v20  ;;  %v5611_v7 = vld [vmem:[#allocation24_spill] sm:$0xff] }
 0x47d   :  { %v2009_v23 = vmul.f32 0.5, %v2005_v43  ;;  %3318 = vtanh.f32 %v2006_v51  ;;  %v3311_v6 = vpop.eup %3310  ;;  %v1934_v54 = vmul.f32 0.5, %v1930_v56  ;;  %v5618_v56 = vld [vmem:[#allocation31_spill] sm:$0xff] }
 0x47e   :  { %v2013_v62 = vmul.f32 0.5, %v3311_v6  ;;  %v3313_v44 = vpop.eup %3312 }
 0x47f   :  { %v3315_v42 = vpop.eup %3314  ;;  %v2014_v0 = vmul.f32 0.5, %v3313_v44  ;;  %3320 = vtanh.f32 %v2009_v23 }
 0x480   :  { %v2016_v2 = vadd.f32 0.5, %v2013_v62  ;;  %v3317_v12 = vpop.eup %3316  ;;  %3322 = vtanh.f32 %v1931_v5  ;;  %v1938_v55 = vmul.f32 0.5, %v3315_v42 }
 0x481   :  { %v2017_v21 = vadd.f32 0.5, %v2014_v0  ;;  %v1939_v51 = vmul.f32 0.5, %v3317_v12  ;;  %v5607_v12 = vld [vmem:[#allocation20_spill] sm:$0xff] }
 0x482   :  { %v1988_v25 = vpop.f32.mrf.mxu2  ;;  %v2001_v33 = vpop.f32.mrf.mxu3  ;;  %v1941_v41 = vadd.f32 0.5, %v1938_v55  ;;  %v5614_v55 = vld [vmem:[#allocation27_spill] sm:$0xff] }
 0x483   :  { %v3319_v14 = vpop.eup %3318  ;;  %v2020_v16 = vmul.f32 %v2017_v21, %v4524_v32  ;;  %v1942_v63 = vadd.f32 0.5, %v1939_v51  ;;  %v5608_v25 = vld [vmem:[#allocation21_spill] sm:$0xff]  ;;  %v5609_v33 = vld [vmem:[#allocation22_spill] sm:$0xff]  ;;  %v5615_v51 = vld [vmem:[#allocation28_spill] sm:$0xff] }
 0x484   :  { %v2021_v28 = vmul.f32 %v3319_v14, %v2016_v2  ;;  %v5610_v14 = vld [vmem:[#allocation23_spill] sm:$0xff]  ;;  %v5612_v21 = vld [vmem:[#allocation25_spill] sm:$0xff] }
 0x485   :  { %v3321_v61 = vpop.eup %3320  ;;  %v1945_v50 = vmul.f32 %v1942_v63, %v4528_v46  ;;  %v5620_v63 = vld [vmem:[#allocation33_spill] sm:$0xff] }
 0x486   :  { %v4651_v36 = vadd.f32 %v2021_v28, %v2020_v16  ;;  %v3323_v43 = vpop.eup %3322  ;;  %v2015_v40 = vmul.f32 0.5, %v3321_v61  ;;  %v5613_v28 = vld [vmem:[#allocation26_spill] sm:$0xff]  ;;  %v5616_v16 = vld [vmem:[#allocation29_spill] sm:$0xff] }
 0x487   :  { %v1946_v37 = vmul.f32 %v3323_v43, %v1941_v41  ;;  %v5617_v61 = vld [vmem:[#allocation30_spill] sm:$0xff]  ;;  %v5619_v41 = vld [vmem:[#allocation32_spill] sm:$0xff] }
 0x488   :  { %3324 = vtanh.f32 %v4651_v36  ;;  %v2018_v19 = vadd.f32 0.5, %v2015_v40  ;;  %v5621_v43 = vld [vmem:[#allocation34_spill] sm:$0xff]  ;;  %v5622_v40 = vld [vmem:[#allocation35_spill] sm:$0xff] }
 0x489   :  { %3326 = vtanh.f32 %v1934_v54  ;;  %v4655_v32 = vadd.f32 %v1946_v37, %v1945_v50  ;;  %v5623_v54 = vld [vmem:[#allocation36_spill] sm:$0xff]  ;;  %v5624_v50 = vld [vmem:[#allocation37_spill] sm:$0xff]  ;;  %v5625_v37 = vld [vmem:[#allocation38_spill] sm:$0xff] }
 0x48b   :  { %3328 = vtanh.f32 %v4655_v32 }
 0x48e   :  { %v3325_v23 = vpop.eup %3324 }
 0x48f   :  { %v2024_v6 = vmul.f32 %v3325_v23, %v2018_v19  ;;  %v3327_v44 = vpop.eup %3326  ;;  %v5626_v19 = vld [vmem:[#allocation39_spill] sm:$0xff]  ;;  %v5627_v23 = vld [vmem:[#allocation40_spill] sm:$0xff] }
 0x490   :  { %v1940_v46 = vmul.f32 0.5, %v3327_v44  ;;  %v5630_v44 = vld [vmem:[#allocation43_spill] sm:$0xff] }
 0x491   :  { %v2025_v62 = vpack.c.bf16 %v2024_v6, %v2024_v6  ;;  %v3329_v5 = vpop.eup %3328  ;;  %v5628_v6 = vld [vmem:[#allocation41_spill] sm:$0xff] }
 0x492   :  { %v1943_v42 = vadd.f32 0.5, %v1940_v46  ;;  %v5631_v46 = vld [vmem:[#allocation44_spill] sm:$0xff] }
 0x493   :  { %2034 = vmatmul.bf16.vlgmr.msra.gmra.mxu0 %v2025_v62  ;;  %2047 = vmatmul.bf16.vlgmr.msra.gmra.mxu1 %v2025_v62 }
 0x494   :  { %2060 = vmatmul.bf16.vlgmr.msra.gmra.mxu2 %v2025_v62  ;;  %2073 = vmatmul.bf16.vlgmr.msra.gmra.mxu3 %v2025_v62  ;;  %v1949_v2 = vmul.f32 %v3329_v5, %v1943_v42  ;;  %v5632_v5 = vld [vmem:[#allocation45_spill] sm:$0xff]  ;;  %v5633_v42 = vld [vmem:[#allocation46_spill] sm:$0xff] }
 0x495   :  { %2153 = vmatpush.bf16.msra.mxu0 %v3642_v4  ;;  %2166 = vmatpush.bf16.msra.mxu1 %v3644_v8 }
 0x496   :  { %2179 = vmatpush.bf16.msra.mxu2 %v3646_v9  ;;  %2192 = vmatpush.bf16.msra.mxu3 %v3649_v13  ;;  %v1950_v0 = vpack.c.bf16 %v1949_v2, %v1949_v2  ;;  %v5634_v2 = vld [vmem:[#allocation47_spill] sm:$0xff] }
 0x499   :  { %2154 = vmatpush.bf16.msra.mxu0 %v3653_v17  ;;  %2167 = vmatpush.bf16.msra.mxu1 %v3655_v18 }
 0x49a   :  { %2180 = vmatpush.bf16.msra.mxu2 %v3658_v22  ;;  %2193 = vmatpush.bf16.msra.mxu3 %v3660_v26 }
 0x49d   :  { %2155 = vmatpush.bf16.msra.mxu0 %v3663_v30  ;;  %2168 = vmatpush.bf16.msra.mxu1 %v3667_v34 }
 0x49e   :  { %2181 = vmatpush.bf16.msra.mxu2 %v3669_v35  ;;  %2194 = vmatpush.bf16.msra.mxu3 %v3672_v39 }
 0x4a1   :  { %2156 = vmatpush.bf16.msra.mxu0 %v3675_v45  ;;  %2169 = vmatpush.bf16.msra.mxu1 %v3679_v47 }
 0x4a2   :  { %2182 = vmatpush.bf16.msra.mxu2 %v3681_v48  ;;  %2195 = vmatpush.bf16.msra.mxu3 %v3684_v52 }
 0x4a3   :  { %2086 = vmatmul.bf16.vlgmr.msrb.gmra.mxu0 %v1950_v0  ;;  %2099 = vmatmul.bf16.vlgmr.msrb.gmra.mxu1 %v1950_v0 }
 0x4a4   :  { %2112 = vmatmul.bf16.vlgmr.msrb.gmra.mxu2 %v1950_v0  ;;  %2125 = vmatmul.bf16.vlgmr.msrb.gmra.mxu3 %v1950_v0  ;;  %v5635_v0 = vld [vmem:[#allocation48_spill] sm:$0xff] }
 0x4a5   :  { %2157 = vmatpush.bf16.msra.mxu0 %v3690_v58  ;;  %2170 = vmatpush.bf16.msra.mxu1 %v3694_v59 }
 0x4a6   :  { %2183 = vmatpush.bf16.msra.mxu2 %v3696_v60  ;;  %2196 = vmatpush.bf16.msra.mxu3 %v3699_v1 }
 0x4a9   :  { %2158 = vmatpush.bf16.msra.mxu0 %v3702_v10  ;;  %2171 = vmatpush.bf16.msra.mxu1 %v3706_v11 }
 0x4aa   :  { %2184 = vmatpush.bf16.msra.mxu2 %v5527_v49  ;;  %2197 = vmatpush.bf16.msra.mxu3 %v5607_v12 }
 0x4ad   :  { %2159 = vmatpush.bf16.msra.mxu0 %v5608_v25  ;;  %2172 = vmatpush.bf16.msra.mxu1 %v5609_v33  ;;  %v5684_v33 = vld [vmem:[#allocation90_spill] sm:$0xff] }
 0x4ae   :  { %2185 = vmatpush.bf16.msra.mxu2 %v5610_v14  ;;  %2198 = vmatpush.bf16.msra.mxu3 %v5611_v7 }
 0x4b1   :  { %2160 = vmatpush.bf16.msra.mxu0 %v5612_v21  ;;  %2173 = vmatpush.bf16.msra.mxu1 %v5613_v28 }
 0x4b2   :  { %2186 = vmatpush.bf16.msra.mxu2 %v5614_v55  ;;  %2199 = vmatpush.bf16.msra.mxu3 %v5615_v51  ;;  %v5683_v51 = vld [vmem:[#allocation81_spill] sm:$0xff] }
 0x4b4   :  { %2161 = vmatmul.bf16.vlgmr.msra.gmra.mxu0 %v2025_v62  ;;  %2174 = vmatmul.bf16.vlgmr.msra.gmra.mxu1 %v2025_v62 }
 0x4b5   :  { %2228 = vmatpush.bf16.msrb.mxu0 %v5616_v16  ;;  %2241 = vmatpush.bf16.msrb.mxu1 %v5617_v61 }
 0x4b6   :  { %2187 = vmatmul.bf16.vlgmr.msra.gmra.mxu2 %v2025_v62  ;;  %2200 = vmatmul.bf16.vlgmr.msra.gmra.mxu3 %v2025_v62  ;;  %v5629_v62 = vld [vmem:[#allocation42_spill] sm:$0xff] }
 0x4b7   :  { %2254 = vmatpush.bf16.msrb.mxu2 %v5618_v56  ;;  %2267 = vmatpush.bf16.msrb.mxu3 %v5619_v41 }
 0x4b9   :  { %2229 = vmatpush.bf16.msrb.mxu0 %v5620_v63  ;;  %2242 = vmatpush.bf16.msrb.mxu1 %v5621_v43  ;;  %v231_v63 = vpop.permute.xlu0 %230 }
 0x4ba   :  { %v274_v55 = vmul.f32 %v5683_v51, %v231_v63  ;;  %v275_v25 = vmul.f32 %v5684_v33, %v231_v63 }
 0x4bb   :  { %2255 = vmatpush.bf16.msrb.mxu2 %v5622_v40  ;;  %2268 = vmatpush.bf16.msrb.mxu3 %v5623_v54 }
 0x4bd   :  { %2230 = vmatpush.bf16.msrb.mxu0 %v5624_v50  ;;  %2243 = vmatpush.bf16.msrb.mxu1 %v5625_v37  ;;  %v5636_v37 = vld [vmem:[#allocation49_spill] sm:$0xff] }
 0x4bf   :  { %2256 = vmatpush.bf16.msrb.mxu2 %v5626_v19  ;;  %2269 = vmatpush.bf16.msrb.mxu3 %v5627_v23  ;;  %v5637_v19 = vld [vmem:[#allocation50_spill] sm:$0xff]  ;;  %v5638_v23 = vld [vmem:[#allocation51_spill] sm:$0xff] }
 0x4c1   :  { %2231 = vmatpush.bf16.msrb.mxu0 %v5628_v6  ;;  %2244 = vmatpush.bf16.msrb.mxu1 %v5629_v62  ;;  %v5639_v6 = vld [vmem:[#allocation52_spill] sm:$0xff]  ;;  %v5640_v62 = vld [vmem:[#allocation53_spill] sm:$0xff] }
 0x4c3   :  { %2257 = vmatpush.bf16.msrb.mxu2 %v5630_v44  ;;  %2270 = vmatpush.bf16.msrb.mxu3 %v5631_v46  ;;  %v5641_v44 = vld [vmem:[#allocation54_spill] sm:$0xff]  ;;  %v5642_v46 = vld [vmem:[#allocation55_spill] sm:$0xff] }
 0x4c5   :  { %2232 = vmatpush.bf16.msrb.mxu0 %v5632_v5  ;;  %2245 = vmatpush.bf16.msrb.mxu1 %v5633_v42  ;;  %v5643_v5 = vld [vmem:[#allocation56_spill] sm:$0xff]  ;;  %v5644_v42 = vld [vmem:[#allocation57_spill] sm:$0xff] }
 0x4c7   :  { %2258 = vmatpush.bf16.msrb.mxu2 %v5634_v2  ;;  %2271 = vmatpush.bf16.msrb.mxu3 %v5635_v0  ;;  %v5645_v2 = vld [vmem:[#allocation58_spill] sm:$0xff]  ;;  %v5646_v0 = vld [vmem:[#allocation61_spill] sm:$0xff] }
 0x4c9   :  { %2233 = vmatpush.bf16.msrb.mxu0 %v5636_v37  ;;  %2246 = vmatpush.bf16.msrb.mxu1 %v5637_v19  ;;  %v5647_v37 = vld [vmem:[#allocation62_spill] sm:$0xff]  ;;  %v5648_v19 = vld [vmem:[#allocation59_spill] sm:$0xff] }
 0x4cb   :  { %2259 = vmatpush.bf16.msrb.mxu2 %v5638_v23  ;;  %2272 = vmatpush.bf16.msrb.mxu3 %v5639_v6  ;;  %v5649_v23 = vld [vmem:[#allocation60_spill] sm:$0xff]  ;;  %v5650_v6 = vld [vmem:[#allocation63_spill] sm:$0xff] }
 0x4cd   :  { %2234 = vmatpush.bf16.msrb.mxu0 %v5640_v62  ;;  %2247 = vmatpush.bf16.msrb.mxu1 %v5641_v44  ;;  %v5651_v62 = vld [vmem:[#allocation64_spill] sm:$0xff]  ;;  %v5652_v44 = vld [vmem:[#allocation65_spill] sm:$0xff] }
 0x4cf   :  { %2260 = vmatpush.bf16.msrb.mxu2 %v5642_v46  ;;  %2273 = vmatpush.bf16.msrb.mxu3 %v5643_v5  ;;  %v5653_v46 = vld [vmem:[#allocation66_spill] sm:$0xff]  ;;  %v5654_v5 = vld [vmem:[#allocation67_spill] sm:$0xff] }
 0x4d1   :  { %2235 = vmatpush.bf16.msrb.mxu0 %v5644_v42  ;;  %2248 = vmatpush.bf16.msrb.mxu1 %v5645_v2  ;;  %v5655_v42 = vld [vmem:[#allocation68_spill] sm:$0xff]  ;;  %v5656_v2 = vld [vmem:[#allocation69_spill] sm:$0xff] }
 0x4d3   :  { %2261 = vmatpush.bf16.msrb.mxu2 %v5648_v19  ;;  %2274 = vmatpush.bf16.msrb.mxu3 %v5649_v23  ;;  %v5659_v19 = vld [vmem:[#allocation72_spill] sm:$0xff]  ;;  %v5660_v23 = vld [vmem:[#allocation73_spill] sm:$0xff] }
 0x4d5   :  { %2280 = vmatpush.bf16.msra.mxu0 %v5646_v0  ;;  %2293 = vmatpush.bf16.msra.mxu1 %v5647_v37  ;;  %v5657_v0 = vld [vmem:[#allocation70_spill] sm:$0xff]  ;;  %v5658_v37 = vld [vmem:[#allocation71_spill] sm:$0xff] }
 0x4d7   :  { %2306 = vmatpush.bf16.msra.mxu2 %v5650_v6  ;;  %2319 = vmatpush.bf16.msra.mxu3 %v5651_v62  ;;  %v5661_v6 = vld [vmem:[#allocation74_spill] sm:$0xff]  ;;  %v5662_v62 = vld [vmem:[#allocation75_spill] sm:$0xff] }
 0x4d9   :  { %2281 = vmatpush.bf16.msra.mxu0 %v5652_v44  ;;  %2294 = vmatpush.bf16.msra.mxu1 %v5653_v46  ;;  %v5663_v44 = vld [vmem:[#allocation79_spill] sm:$0xff]  ;;  %v5664_v46 = vld [vmem:[#allocation80_spill] sm:$0xff] }
 0x4db   :  { %2307 = vmatpush.bf16.msra.mxu2 %v5654_v5  ;;  %2320 = vmatpush.bf16.msra.mxu3 %v5655_v42  ;;  %v5665_v5 = vld [vmem:[#allocation82_spill] sm:$0xff]  ;;  %v5666_v42 = vld [vmem:[#allocation83_spill] sm:$0xff] }
 0x4dd   :  { %2282 = vmatpush.bf16.msra.mxu0 %v5656_v2  ;;  %2295 = vmatpush.bf16.msra.mxu1 %v5657_v0  ;;  %v5667_v2 = vld [vmem:[#allocation85_spill] sm:$0xff]  ;;  %v5668_v0 = vld [vmem:[#allocation86_spill] sm:$0xff] }
 0x4df   :  { %2308 = vmatpush.bf16.msra.mxu2 %v5658_v37  ;;  %2321 = vmatpush.bf16.msra.mxu3 %v5659_v19  ;;  %v5669_v37 = vld [vmem:[#allocation88_spill] sm:$0xff]  ;;  %v5670_v19 = vld [vmem:[#allocation89_spill] sm:$0xff] }
 0x4e1   :  { %2283 = vmatpush.bf16.msra.mxu0 %v5660_v23  ;;  %2296 = vmatpush.bf16.msra.mxu1 %v5661_v6  ;;  %v5671_v23 = vld [vmem:[#allocation93_spill] sm:$0xff]  ;;  %v5672_v6 = vld [vmem:[#allocation94_spill] sm:$0xff] }
 0x4e3   :  { %2309 = vmatpush.bf16.msra.mxu2 %v5662_v62  ;;  %2322 = vmatpush.bf16.msra.mxu3 %v5663_v44  ;;  %v5673_v62 = vld [vmem:[#allocation96_spill] sm:$0xff]  ;;  %v5674_v44 = vld [vmem:[#allocation97_spill] sm:$0xff] }
 0x4e5   :  { %2284 = vmatpush.bf16.msra.mxu0 %v5664_v46  ;;  %2297 = vmatpush.bf16.msra.mxu1 %v5665_v5  ;;  %v5675_v46 = vld [vmem:[#allocation98_spill] sm:$0xff]  ;;  %v5676_v5 = vld [vmem:[#allocation99_spill] sm:$0xff] }
 0x4e7   :  { %2310 = vmatpush.bf16.msra.mxu2 %v5666_v42  ;;  %2323 = vmatpush.bf16.msra.mxu3 %v5667_v2  ;;  %v5677_v42 = vld [vmem:[#allocation100_spill] sm:$0xff]  ;;  %v5678_v2 = vld [vmem:[#allocation101_spill] sm:$0xff] }
 0x4e9   :  { %2285 = vmatpush.bf16.msra.mxu0 %v5668_v0  ;;  %2298 = vmatpush.bf16.msra.mxu1 %v5669_v37  ;;  %v5679_v0 = vld [vmem:[#allocation103_spill] sm:$0xff] }
 0x4eb   :  { %2311 = vmatpush.bf16.msra.mxu2 %v5670_v19  ;;  %2324 = vmatpush.bf16.msra.mxu3 %v5671_v23 }
 0x4ed   :  { %2286 = vmatpush.bf16.msra.mxu0 %v5672_v6  ;;  %2299 = vmatpush.bf16.msra.mxu1 %v5673_v62 }
 0x4ef   :  { %2312 = vmatpush.bf16.msra.mxu2 %v5674_v44  ;;  %2325 = vmatpush.bf16.msra.mxu3 %v5675_v46  ;;  %v153_v46 = vpop.permute.xlu2 %152 }
 0x4f0   :  { %v199_v7 = vmul.f32 %v5525_v38, %v153_v46  ;;  %v200_v14 = vmul.f32 %v5444_v15, %v153_v46 }
 0x4f1   :  { %2287 = vmatpush.bf16.msra.mxu0 %v5676_v5  ;;  %2300 = vmatpush.bf16.msra.mxu1 %v5677_v42  ;;  %v5680_v42 = vld [vmem:[#allocation76_spill] sm:$0xff] }
 0x4f2   :  { %v197_v56 = vmul.f32 %v5680_v42, %v153_v46  ;;  %v276_v42 = vmul.f32 %v5284_v31, %v231_v63 }
 0x4f3   :  { %2313 = vmatpush.bf16.msra.mxu2 %v5678_v2  ;;  %2326 = vmatpush.bf16.msra.mxu3 %v5679_v0  ;;  %v5681_v2 = vld [vmem:[#allocation77_spill] sm:$0xff]  ;;  %v5682_v0 = vld [vmem:[#allocation78_spill] sm:$0xff] }
 0x4f4   :  { %v198_v61 = vmul.f32 %v5681_v2, %v153_v46  ;;  %v273_v16 = vmul.f32 %v5682_v0, %v231_v63 }
 0x510   :  { %v2035_v37 = vpop.f32.mrf.mxu0  ;;  %v2048_v19 = vpop.f32.mrf.mxu1 }
 0x517   :  { %v4754_v50 = vpop.f32.mrf.mxu2  ;;  %v2074_v23 = vpop.f32.mrf.mxu3 }
 0x518   :  { %v2037_v6 = vpop.f32.mrf.mxu0  ;;  %v2050_v54 = vpop.f32.mrf.mxu1 }
 0x519   :  { %v305_v6 = vadd.f32 %v273_v16, %v197_v56  ;;  %v306_v54 = vadd.f32 %v274_v55, %v198_v61 }
 0x51b   :  { %v347_v0 = vadd.f32 %v5285_v29, %v305_v6  ;;  %v348_v51 = vadd.f32 %v5605_v24, %v306_v54 }
 0x51f   :  { %v2063_v62 = vpop.f32.mrf.mxu2  ;;  %v2076_v40 = vpop.f32.mrf.mxu3 }
 0x520   :  { %v2087_v44 = vpop.f32.mrf.mxu0  ;;  %v2100_v43 = vpop.f32.mrf.mxu1 }
 0x521   :  { %v2088_v62 = vadd.f32 %v2087_v44, %v2035_v37  ;;  %v2101_v40 = vadd.f32 %v2100_v43, %v2048_v19  ;;  %v307_v37 = vadd.f32 %v275_v25, %v199_v7  ;;  %v308_v19 = vadd.f32 %v276_v42, %v200_v14 }
 0x523   :  { %v2131_v61 = vadd.f32 %v2101_v40, %v4118_v3 }
 0x525   :  { %v2135_v63 = vmul.f32 0.5, %v2131_v61 }
 0x527   :  { %v2113_v5 = vpop.f32.mrf.mxu2  ;;  %v2126_v41 = vpop.f32.mrf.mxu3 }
 0x528   :  { %v2089_v28 = vpop.f32.mrf.mxu0  ;;  %v2102_v21 = vpop.f32.mrf.mxu1  ;;  %v2127_v25 = vadd.f32 %v2126_v41, %v2074_v23 }
 0x529   :  { %v5685_v28 = vld [vmem:[#allocation104_spill] sm:$0xff] }
 0x52a   :  { %v2130_v21 = vadd.f32 %v2088_v62, %v5685_v28 }
 0x52c   :  { %v2134_v15 = vmul.f32 0.5, %v2130_v21  ;;  %v2133_v21 = vadd.f32 %v2127_v25, %v4130_v53 }
 0x52f   :  { %v2115_v12 = vpop.f32.mrf.mxu2  ;;  %v2128_v2 = vpop.f32.mrf.mxu3 }
 0x530   :  { %v349_v12 = vadd.f32 %v5287_v27, %v307_v37  ;;  %v350_v2 = vadd.f32 %v3992_v57, %v308_v19  ;;  %v2114_v19 = vadd.f32 %v2113_v5, %v4754_v50 }
 0x531   :  { %v2162_v16 = vpop.f32.mrf.mxu0  ;;  %v2175_v55 = vpop.f32.mrf.mxu1 }
 0x532   :  { %v2205_v56 = vadd.f32 %v2162_v16, %v347_v0  ;;  %v2206_v43 = vadd.f32 %v2175_v55, %v348_v51 }
 0x534   :  { %v2209_v44 = vmul.f32 0.5, %v2205_v56  ;;  %v2210_v46 = vmul.f32 0.5, %v2206_v43 }
 0x536   :  { %3330 = vtanh.f32 %v2209_v44 }
 0x537   :  { %3332 = vtanh.f32 %v2210_v46 }
 0x538   :  { %3334 = vtanh.f32 %v2134_v15 }
 0x539   :  { %v2188_v6 = vpop.f32.mrf.mxu2  ;;  %v2201_v54 = vpop.f32.mrf.mxu3  ;;  %3336 = vtanh.f32 %v2135_v63 }
 0x53a   :  { %v2207_v62 = vadd.f32 %v2188_v6, %v349_v12  ;;  %v2208_v28 = vadd.f32 %v2201_v54, %v350_v2  ;;  %v2164_v40 = vpop.f32.mrf.mxu0  ;;  %v2177_v0 = vpop.f32.mrf.mxu1  ;;  %v2132_v12 = vadd.f32 %v2114_v19, %v4133_v20  ;;  %v5712_v19 = vld [vmem:[#allocation46_spill] sm:$0xff] }
 0x53c   :  { %v2211_v14 = vmul.f32 0.5, %v2207_v62  ;;  %3338 = vtanh.f32 %v2208_v28  ;;  %v3331_v7 = vpop.eup %3330  ;;  %v2136_v0 = vmul.f32 0.5, %v2132_v12  ;;  %v5719_v12 = vld [vmem:[#allocation53_spill] sm:$0xff] }
 0x53d   :  { %v2215_v51 = vmul.f32 0.5, %v3331_v7  ;;  %v3333_v42 = vpop.eup %3332 }
 0x53e   :  { %v3335_v16 = vpop.eup %3334  ;;  %v2216_v61 = vmul.f32 0.5, %v3333_v42  ;;  %3340 = vtanh.f32 %v2211_v14 }
 0x53f   :  { %v2218_v55 = vadd.f32 0.5, %v2215_v51  ;;  %v3337_v56 = vpop.eup %3336  ;;  %3342 = vtanh.f32 %v2133_v21  ;;  %v2140_v23 = vmul.f32 0.5, %v3335_v16 }
 0x540   :  { %v2219_v44 = vadd.f32 0.5, %v2216_v61  ;;  %v2141_v28 = vmul.f32 0.5, %v3337_v56  ;;  %v5707_v61 = vld [vmem:[#allocation41_spill] sm:$0xff]  ;;  %v5708_v56 = vld [vmem:[#allocation42_spill] sm:$0xff] }
 0x541   :  { %v2190_v43 = vpop.f32.mrf.mxu2  ;;  %v2203_v15 = vpop.f32.mrf.mxu3  ;;  %v2143_v6 = vadd.f32 0.5, %v2140_v23  ;;  %v5715_v23 = vld [vmem:[#allocation49_spill] sm:$0xff] }
 0x542   :  { %v3339_v37 = vpop.eup %3338  ;;  %v2222_v46 = vmul.f32 %v2219_v44, %v4651_v36  ;;  %v2144_v54 = vadd.f32 0.5, %v2141_v28  ;;  %v5709_v43 = vld [vmem:[#allocation43_spill] sm:$0xff]  ;;  %v5710_v15 = vld [vmem:[#allocation44_spill] sm:$0xff]  ;;  %v5716_v28 = vld [vmem:[#allocation50_spill] sm:$0xff] }
 0x543   :  { %v2223_v41 = vmul.f32 %v3339_v37, %v2218_v55  ;;  %v5706_v55 = vld [vmem:[#allocation40_spill] sm:$0xff]  ;;  %v5711_v37 = vld [vmem:[#allocation45_spill] sm:$0xff]  ;;  %v5713_v44 = vld [vmem:[#allocation47_spill] sm:$0xff] }
 0x544   :  { %v3341_v63 = vpop.eup %3340  ;;  %v2147_v50 = vmul.f32 %v2144_v54, %v4655_v32  ;;  %v118_v32 = vld [vmem:[%s4942_s0 + $0x38] sm:$0xff] }
 0x545   :  { %v4774_v2 = vadd.f32 %v2223_v41, %v2222_v46  ;;  %v3343_v62 = vpop.eup %3342  ;;  %v2217_v40 = vmul.f32 0.5, %v3341_v63  ;;  %157 = vperm.xlu1 %3217, %v118_v32   ;;  %234 = vperm.xlu2 %3218, %v118_v32   ;;  %v5714_v41 = vld [vmem:[#allocation48_spill] sm:$0xff]  ;;  %v5717_v46 = vld [vmem:[#allocation51_spill] sm:$0xff]  ;;  %v5732_v32 = vld [vmem:[#allocation66_spill] sm:$0xff] }
 0x546   :  { %v2148_v5 = vmul.f32 %v3343_v62, %v2143_v6  ;;  %v5718_v63 = vld [vmem:[#allocation52_spill] sm:$0xff]  ;;  %v5720_v6 = vld [vmem:[#allocation54_spill] sm:$0xff]  ;;  %v5721_v54 = vld [vmem:[#allocation55_spill] sm:$0xff] }
 0x547   :  { %3344 = vtanh.f32 %v4774_v2  ;;  %v2220_v25 = vadd.f32 0.5, %v2217_v40  ;;  %v5722_v62 = vld [vmem:[#allocation56_spill] sm:$0xff]  ;;  %v5723_v40 = vld [vmem:[#allocation57_spill] sm:$0xff] }
 0x548   :  { %3346 = vtanh.f32 %v2136_v0  ;;  %v4778_v36 = vadd.f32 %v2148_v5, %v2147_v50  ;;  %v5724_v0 = vld [vmem:[#allocation58_spill] sm:$0xff]  ;;  %v5725_v50 = vld [vmem:[#allocation61_spill] sm:$0xff] }
 0x549   :  { %v5726_v5 = vld [vmem:[#allocation62_spill] sm:$0xff] }
 0x54a   :  { %3348 = vtanh.f32 %v4778_v36 }
 0x54d   :  { %v3345_v14 = vpop.eup %3344 }
 0x54e   :  { %v2226_v7 = vmul.f32 %v3345_v14, %v2220_v25  ;;  %v3347_v42 = vpop.eup %3346  ;;  %v5727_v25 = vld [vmem:[#allocation59_spill] sm:$0xff]  ;;  %v5728_v14 = vld [vmem:[#allocation60_spill] sm:$0xff] }
 0x54f   :  { %v2142_v21 = vmul.f32 0.5, %v3347_v42  ;;  %v5731_v42 = vld [vmem:[#allocation65_spill] sm:$0xff] }
 0x550   :  { %v2227_v51 = vpack.c.bf16 %v2226_v7, %v2226_v7  ;;  %v3349_v16 = vpop.eup %3348  ;;  %v5729_v7 = vld [vmem:[#allocation63_spill] sm:$0xff] }
 0x552   :  { %2236 = vmatmul.bf16.vlgmr.msrb.gmra.mxu0 %v2227_v51  ;;  %2249 = vmatmul.bf16.vlgmr.msrb.gmra.mxu1 %v2227_v51 }
 0x553   :  { %2262 = vmatmul.bf16.vlgmr.msrb.gmra.mxu2 %v2227_v51  ;;  %2275 = vmatmul.bf16.vlgmr.msrb.gmra.mxu3 %v2227_v51 }
 0x554   :  { %2355 = vmatpush.bf16.msrb.mxu0 %v3642_v4  ;;  %2368 = vmatpush.bf16.msrb.mxu1 %v3644_v8  ;;  %v2145_v4 = vadd.f32 0.5, %v2142_v21  ;;  %v5733_v21 = vld [vmem:[#allocation67_spill] sm:$0xff] }
 0x555   :  { %2381 = vmatpush.bf16.msrb.mxu2 %v3646_v9  ;;  %2394 = vmatpush.bf16.msrb.mxu3 %v3649_v13  ;;  %v5686_v13 = vld [vmem:[#allocation20_spill] sm:$0xff] }
 0x556   :  { %v2151_v8 = vmul.f32 %v3349_v16, %v2145_v4  ;;  %v5734_v16 = vld [vmem:[#allocation68_spill] sm:$0xff]  ;;  %v5735_v4 = vld [vmem:[#allocation69_spill] sm:$0xff] }
 0x558   :  { %2356 = vmatpush.bf16.msrb.mxu0 %v3653_v17  ;;  %2369 = vmatpush.bf16.msrb.mxu1 %v3655_v18  ;;  %v2152_v9 = vpack.c.bf16 %v2151_v8, %v2151_v8  ;;  %v5687_v17 = vld [vmem:[#allocation21_spill] sm:$0xff]  ;;  %v5688_v18 = vld [vmem:[#allocation22_spill] sm:$0xff] }
 0x559   :  { %2382 = vmatpush.bf16.msrb.mxu2 %v3658_v22  ;;  %2395 = vmatpush.bf16.msrb.mxu3 %v3660_v26  ;;  %v5689_v22 = vld [vmem:[#allocation23_spill] sm:$0xff]  ;;  %v5690_v26 = vld [vmem:[#allocation24_spill] sm:$0xff]  ;;  %v5736_v8 = vld [vmem:[#allocation70_spill] sm:$0xff] }
 0x55c   :  { %2357 = vmatpush.bf16.msrb.mxu0 %v3663_v30  ;;  %2370 = vmatpush.bf16.msrb.mxu1 %v3667_v34  ;;  %v5691_v30 = vld [vmem:[#allocation25_spill] sm:$0xff]  ;;  %v5692_v34 = vld [vmem:[#allocation26_spill] sm:$0xff] }
 0x55d   :  { %2383 = vmatpush.bf16.msrb.mxu2 %v3669_v35  ;;  %2396 = vmatpush.bf16.msrb.mxu3 %v3672_v39  ;;  %v5693_v35 = vld [vmem:[#allocation27_spill] sm:$0xff]  ;;  %v5694_v39 = vld [vmem:[#allocation28_spill] sm:$0xff] }
 0x560   :  { %2358 = vmatpush.bf16.msrb.mxu0 %v3675_v45  ;;  %2371 = vmatpush.bf16.msrb.mxu1 %v3679_v47  ;;  %v5695_v45 = vld [vmem:[#allocation29_spill] sm:$0xff]  ;;  %v5696_v47 = vld [vmem:[#allocation30_spill] sm:$0xff] }
 0x561   :  { %2384 = vmatpush.bf16.msrb.mxu2 %v3681_v48  ;;  %2397 = vmatpush.bf16.msrb.mxu3 %v3684_v52  ;;  %v5697_v48 = vld [vmem:[#allocation31_spill] sm:$0xff]  ;;  %v5698_v52 = vld [vmem:[#allocation32_spill] sm:$0xff] }
 0x562   :  { %2288 = vmatmul.bf16.vlgmr.msra.gmra.mxu0 %v2152_v9  ;;  %2301 = vmatmul.bf16.vlgmr.msra.gmra.mxu1 %v2152_v9 }
 0x563   :  { %2314 = vmatmul.bf16.vlgmr.msra.gmra.mxu2 %v2152_v9  ;;  %2327 = vmatmul.bf16.vlgmr.msra.gmra.mxu3 %v2152_v9  ;;  %v5737_v9 = vld [vmem:[#allocation71_spill] sm:$0xff] }
 0x564   :  { %2359 = vmatpush.bf16.msrb.mxu0 %v3690_v58  ;;  %2372 = vmatpush.bf16.msrb.mxu1 %v3694_v59  ;;  %v5699_v58 = vld [vmem:[#allocation33_spill] sm:$0xff]  ;;  %v5700_v59 = vld [vmem:[#allocation34_spill] sm:$0xff] }
 0x565   :  { %2385 = vmatpush.bf16.msrb.mxu2 %v3696_v60  ;;  %2398 = vmatpush.bf16.msrb.mxu3 %v3699_v1  ;;  %v5701_v60 = vld [vmem:[#allocation35_spill] sm:$0xff]  ;;  %v5702_v1 = vld [vmem:[#allocation36_spill] sm:$0xff] }
 0x568   :  { %2360 = vmatpush.bf16.msrb.mxu0 %v3702_v10  ;;  %2373 = vmatpush.bf16.msrb.mxu1 %v3706_v11  ;;  %v5703_v10 = vld [vmem:[#allocation37_spill] sm:$0xff]  ;;  %v5704_v11 = vld [vmem:[#allocation38_spill] sm:$0xff] }
 0x569   :  { %2386 = vmatpush.bf16.msrb.mxu2 %v5527_v49  ;;  %2399 = vmatpush.bf16.msrb.mxu3 %v5686_v13  ;;  %v5705_v49 = vld [vmem:[#allocation39_spill] sm:$0xff]  ;;  %v5738_v13 = vld [vmem:[#allocation72_spill] sm:$0xff] }
 0x56c   :  { %2361 = vmatpush.bf16.msrb.mxu0 %v5687_v17  ;;  %2374 = vmatpush.bf16.msrb.mxu1 %v5688_v18  ;;  %v5739_v17 = vld [vmem:[#allocation73_spill] sm:$0xff]  ;;  %v5740_v18 = vld [vmem:[#allocation74_spill] sm:$0xff] }
 0x56d   :  { %2387 = vmatpush.bf16.msrb.mxu2 %v5689_v22  ;;  %2400 = vmatpush.bf16.msrb.mxu3 %v5690_v26  ;;  %v5741_v22 = vld [vmem:[#allocation75_spill] sm:$0xff] }
 0x56e   :  { %v5742_v26 = vld [vmem:[#allocation79_spill] sm:$0xff] }
 0x570   :  { %2362 = vmatpush.bf16.msrb.mxu0 %v5691_v30  ;;  %2375 = vmatpush.bf16.msrb.mxu1 %v5692_v34  ;;  %v5743_v30 = vld [vmem:[#allocation80_spill] sm:$0xff]  ;;  %v5744_v34 = vld [vmem:[#allocation82_spill] sm:$0xff] }
 0x571   :  { %2388 = vmatpush.bf16.msrb.mxu2 %v5693_v35  ;;  %2401 = vmatpush.bf16.msrb.mxu3 %v5694_v39  ;;  %v5745_v35 = vld [vmem:[#allocation83_spill] sm:$0xff]  ;;  %v5746_v39 = vld [vmem:[#allocation85_spill] sm:$0xff] }
 0x573   :  { %2363 = vmatmul.bf16.vlgmr.msrb.gmra.mxu0 %v2227_v51  ;;  %2376 = vmatmul.bf16.vlgmr.msrb.gmra.mxu1 %v2227_v51 }
 0x574   :  { %2430 = vmatpush.bf16.msra.mxu0 %v5695_v45  ;;  %2443 = vmatpush.bf16.msra.mxu1 %v5696_v47  ;;  %v5747_v45 = vld [vmem:[#allocation86_spill] sm:$0xff]  ;;  %v5748_v47 = vld [vmem:[#allocation88_spill] sm:$0xff] }
 0x575   :  { %2389 = vmatmul.bf16.vlgmr.msrb.gmra.mxu2 %v2227_v51  ;;  %2402 = vmatmul.bf16.vlgmr.msrb.gmra.mxu3 %v2227_v51  ;;  %v5730_v51 = vld [vmem:[#allocation64_spill] sm:$0xff] }
 0x576   :  { %2456 = vmatpush.bf16.msra.mxu2 %v5697_v48  ;;  %2469 = vmatpush.bf16.msra.mxu3 %v5698_v52  ;;  %v5749_v48 = vld [vmem:[#allocation89_spill] sm:$0xff] }
 0x577   :  { %v5750_v52 = vld [vmem:[#allocation93_spill] sm:$0xff] }
 0x578   :  { %2431 = vmatpush.bf16.msra.mxu0 %v5699_v58  ;;  %2444 = vmatpush.bf16.msra.mxu1 %v5700_v59  ;;  %v5751_v58 = vld [vmem:[#allocation94_spill] sm:$0xff]  ;;  %v5752_v59 = vld [vmem:[#allocation96_spill] sm:$0xff] }
 0x57a   :  { %2457 = vmatpush.bf16.msra.mxu2 %v5701_v60  ;;  %2470 = vmatpush.bf16.msra.mxu3 %v5702_v1  ;;  %v5753_v60 = vld [vmem:[#allocation97_spill] sm:$0xff]  ;;  %v5754_v1 = vld [vmem:[#allocation98_spill] sm:$0xff] }
 0x57c   :  { %2432 = vmatpush.bf16.msra.mxu0 %v5703_v10  ;;  %2445 = vmatpush.bf16.msra.mxu1 %v5704_v11  ;;  %v5755_v10 = vld [vmem:[#allocation99_spill] sm:$0xff]  ;;  %v5756_v11 = vld [vmem:[#allocation100_spill] sm:$0xff] }
 0x57e   :  { %2458 = vmatpush.bf16.msra.mxu2 %v5705_v49  ;;  %2471 = vmatpush.bf16.msra.mxu3 %v5706_v55  ;;  %v5757_v49 = vld [vmem:[#allocation101_spill] sm:$0xff]  ;;  %v5758_v55 = vld [vmem:[#allocation103_spill] sm:$0xff] }
 0x580   :  { %2433 = vmatpush.bf16.msra.mxu0 %v5707_v61  ;;  %2446 = vmatpush.bf16.msra.mxu1 %v5708_v56 }
 0x582   :  { %2459 = vmatpush.bf16.msra.mxu2 %v5709_v43  ;;  %2472 = vmatpush.bf16.msra.mxu3 %v5710_v15 }
 0x584   :  { %2434 = vmatpush.bf16.msra.mxu0 %v5711_v37  ;;  %2447 = vmatpush.bf16.msra.mxu1 %v5712_v19 }
 0x586   :  { %2460 = vmatpush.bf16.msra.mxu2 %v5713_v44  ;;  %2473 = vmatpush.bf16.msra.mxu3 %v5714_v41 }
 0x588   :  { %2435 = vmatpush.bf16.msra.mxu0 %v5715_v23  ;;  %2448 = vmatpush.bf16.msra.mxu1 %v5716_v28 }
 0x58a   :  { %2461 = vmatpush.bf16.msra.mxu2 %v5717_v46  ;;  %2474 = vmatpush.bf16.msra.mxu3 %v5718_v63 }
 0x58c   :  { %2436 = vmatpush.bf16.msra.mxu0 %v5719_v12  ;;  %2449 = vmatpush.bf16.msra.mxu1 %v5720_v6  ;;  %v5759_v12 = vld [vmem:[#allocation78_spill] sm:$0xff] }
 0x58e   :  { %2462 = vmatpush.bf16.msra.mxu2 %v5721_v54  ;;  %2475 = vmatpush.bf16.msra.mxu3 %v5722_v62  ;;  %v5760_v54 = vld [vmem:[#allocation81_spill] sm:$0xff] }
 0x590   :  { %2437 = vmatpush.bf16.msra.mxu0 %v5723_v40  ;;  %2450 = vmatpush.bf16.msra.mxu1 %v5724_v0  ;;  %v5761_v40 = vld [vmem:[#allocation76_spill] sm:$0xff] }
 0x592   :  { %2463 = vmatpush.bf16.msra.mxu2 %v5727_v25  ;;  %2476 = vmatpush.bf16.msra.mxu3 %v5728_v14 }
 0x594   :  { %2482 = vmatpush.bf16.msrb.mxu0 %v5725_v50  ;;  %2495 = vmatpush.bf16.msrb.mxu1 %v5726_v5  ;;  %v5762_v50 = vld [vmem:[#allocation77_spill] sm:$0xff] }
 0x596   :  { %2508 = vmatpush.bf16.msrb.mxu2 %v5729_v7  ;;  %2521 = vmatpush.bf16.msrb.mxu3 %v5730_v51 }
 0x598   :  { %2483 = vmatpush.bf16.msrb.mxu0 %v5731_v42  ;;  %2496 = vmatpush.bf16.msrb.mxu1 %v5732_v32 }
 0x59a   :  { %2509 = vmatpush.bf16.msrb.mxu2 %v5733_v21  ;;  %2522 = vmatpush.bf16.msrb.mxu3 %v5734_v16 }
 0x59c   :  { %2484 = vmatpush.bf16.msrb.mxu0 %v5735_v4  ;;  %2497 = vmatpush.bf16.msrb.mxu1 %v5736_v8 }
 0x59e   :  { %2510 = vmatpush.bf16.msrb.mxu2 %v5737_v9  ;;  %2523 = vmatpush.bf16.msrb.mxu3 %v5738_v13 }
 0x59f   :  { %v235_v46 = vpop.permute.xlu2 %234 }
 0x5a0   :  { %2485 = vmatpush.bf16.msrb.mxu0 %v5739_v17  ;;  %2498 = vmatpush.bf16.msrb.mxu1 %v5740_v18  ;;  %v277_v6 = vmul.f32 %v5759_v12, %v235_v46  ;;  %v278_v62 = vmul.f32 %v5760_v54, %v235_v46  ;;  %v279_v9 = vmul.f32 %v5684_v33, %v235_v46  ;;  %v5763_v18 = vld [vmem:[#allocation87_spill] sm:$0xff] }
 0x5a1   :  { %v280_v13 = vmul.f32 %v5284_v31, %v235_v46 }
 0x5a2   :  { %2511 = vmatpush.bf16.msrb.mxu2 %v5741_v22  ;;  %2524 = vmatpush.bf16.msrb.mxu3 %v5742_v26 }
 0x5a4   :  { %2486 = vmatpush.bf16.msrb.mxu0 %v5743_v30  ;;  %2499 = vmatpush.bf16.msrb.mxu1 %v5744_v34  ;;  %v5764_v34 = vld [vmem:[#allocation104_spill] sm:$0xff] }
 0x5a6   :  { %2512 = vmatpush.bf16.msrb.mxu2 %v5745_v35  ;;  %2525 = vmatpush.bf16.msrb.mxu3 %v5746_v39 }
 0x5a8   :  { %2487 = vmatpush.bf16.msrb.mxu0 %v5747_v45  ;;  %2500 = vmatpush.bf16.msrb.mxu1 %v5748_v47 }
 0x5aa   :  { %2513 = vmatpush.bf16.msrb.mxu2 %v5749_v48  ;;  %2526 = vmatpush.bf16.msrb.mxu3 %v5750_v52 }
 0x5ac   :  { %2488 = vmatpush.bf16.msrb.mxu0 %v5751_v58  ;;  %2501 = vmatpush.bf16.msrb.mxu1 %v5752_v59 }
 0x5ae   :  { %2514 = vmatpush.bf16.msrb.mxu2 %v5753_v60  ;;  %2527 = vmatpush.bf16.msrb.mxu3 %v5754_v1 }
 0x5b0   :  { %2489 = vmatpush.bf16.msrb.mxu0 %v5755_v10  ;;  %2502 = vmatpush.bf16.msrb.mxu1 %v5756_v11 }
 0x5b2   :  { %2515 = vmatpush.bf16.msrb.mxu2 %v5757_v49  ;;  %2528 = vmatpush.bf16.msrb.mxu3 %v5758_v55 }
 0x5b7   :  { %v158_v63 = vpop.permute.xlu1 %157 }
 0x5b8   :  { %v201_v0 = vmul.f32 %v5761_v40, %v158_v63  ;;  %v202_v5 = vmul.f32 %v5762_v50, %v158_v63  ;;  %v203_v17 = vmul.f32 %v5525_v38, %v158_v63  ;;  %v204_v22 = vmul.f32 %v5763_v18, %v158_v63 }
 0x5ba   :  { %v309_v42 = vadd.f32 %v277_v6, %v201_v0  ;;  %v310_v32 = vadd.f32 %v278_v62, %v202_v5  ;;  %v311_v52 = vadd.f32 %v279_v9, %v203_v17 }
 0x5bc   :  { %v351_v4 = vadd.f32 %v5285_v29, %v309_v42  ;;  %v352_v8 = vadd.f32 %v5605_v24, %v310_v32  ;;  %v312_v24 = vadd.f32 %v280_v13, %v204_v22  ;;  %v353_v38 = vadd.f32 %v5287_v27, %v311_v52  ;;  %v3190_v52 = vld [vmem:[%s4949_s7 + $0x18] sm:$0xff] }
 0x5be   :  { %v354_v60 = vadd.f32 %v3992_v57, %v312_v24  ;;  %v3189_v24 = vld [vmem:[%s4949_s7 + $0x10] sm:$0xff] }
 0x5cf   :  { %v2237_v61 = vpop.f32.mrf.mxu0  ;;  %v2250_v56 = vpop.f32.mrf.mxu1 }
 0x5d6   :  { %v4880_v43 = vpop.f32.mrf.mxu2  ;;  %v2276_v15 = vpop.f32.mrf.mxu3 }
 0x5d7   :  { %v2239_v37 = vpop.f32.mrf.mxu0  ;;  %v2252_v19 = vpop.f32.mrf.mxu1 }
 0x5de   :  { %v2265_v44 = vpop.f32.mrf.mxu2  ;;  %v2278_v41 = vpop.f32.mrf.mxu3 }
 0x5df   :  { %v2289_v23 = vpop.f32.mrf.mxu0  ;;  %v2302_v28 = vpop.f32.mrf.mxu1 }
 0x5e0   :  { %v2290_v21 = vadd.f32 %v2289_v23, %v2237_v61  ;;  %v2303_v16 = vadd.f32 %v2302_v28, %v2250_v56 }
 0x5e2   :  { %v2332_v35 = vadd.f32 %v2290_v21, %v5764_v34  ;;  %v2333_v47 = vadd.f32 %v2303_v16, %v4118_v3 }
 0x5e4   :  { %v2336_v59 = vmul.f32 0.5, %v2332_v35  ;;  %v2337_v31 = vmul.f32 0.5, %v2333_v47  ;;  %v3194_v35 = vld [vmem:[%s4949_s7 + $0x38] sm:$0xff]  ;;  %v3191_v47 = vld [vmem:[%s4949_s7 + $0x20] sm:$0xff] }
 0x5e6   :  { %v2315_v25 = vpop.f32.mrf.mxu2  ;;  %v2328_v14 = vpop.f32.mrf.mxu3 }
 0x5e7   :  { %v2291_v7 = vpop.f32.mrf.mxu0  ;;  %v2304_v51 = vpop.f32.mrf.mxu1  ;;  %v2329_v56 = vadd.f32 %v2328_v14, %v2276_v15  ;;  %v2316_v54 = vadd.f32 %v2315_v25, %v4880_v43 }
 0x5e9   :  { %v2335_v23 = vadd.f32 %v2329_v56, %v4130_v53  ;;  %v2334_v14 = vadd.f32 %v2316_v54, %v4133_v20 }
 0x5eb   :  { %v2338_v16 = vmul.f32 0.5, %v2334_v14 }
 0x5ee   :  { %v2317_v26 = vpop.f32.mrf.mxu2  ;;  %v2330_v30 = vpop.f32.mrf.mxu3 }
 0x5f0   :  { %v2364_v39 = vpop.f32.mrf.mxu0  ;;  %v2377_v45 = vpop.f32.mrf.mxu1 }
 0x5f1   :  { %v2407_v48 = vadd.f32 %v2364_v39, %v351_v4  ;;  %v2408_v29 = vadd.f32 %v2377_v45, %v352_v8  ;;  %v3193_v39 = vld [vmem:[%s4949_s7 + $0x30] sm:$0xff]  ;;  %v3192_v45 = vld [vmem:[%s4949_s7 + $0x28] sm:$0xff] }
 0x5f3   :  { %v2411_v58 = vmul.f32 0.5, %v2407_v48  ;;  %v2412_v33 = vmul.f32 0.5, %v2408_v29 }
 0x5f5   :  { %3350 = vtanh.f32 %v2411_v58 }
 0x5f6   :  { %3352 = vtanh.f32 %v2412_v33 }
 0x5f7   :  { %3354 = vtanh.f32 %v2336_v59  ;;  %v3188_v59 = vld [vmem:[%s4949_s7 + $0x8] sm:$0xff] }
 0x5f8   :  { %v2390_v1 = vpop.f32.mrf.mxu2  ;;  %v2403_v10 = vpop.f32.mrf.mxu3  ;;  %3356 = vtanh.f32 %v2337_v31 }
 0x5f9   :  { %v2409_v11 = vadd.f32 %v2390_v1, %v353_v38  ;;  %v2410_v49 = vadd.f32 %v2403_v10, %v354_v60  ;;  %v2366_v55 = vpop.f32.mrf.mxu0  ;;  %v2379_v61 = vpop.f32.mrf.mxu1  ;;  %v3187_v60 = vld [vmem:[%s4949_s7] sm:$0xff]  ;;  %s3567_s7 = smov [#allocation12]  }
 0x5fa   :  { %s2656_s21 = sshll.u32 %s3567_s7, 4  ;;  %s2657_s21 = int_to_ptr.vmem [resolvable:$true] %s2656_s21 }
 0x5fb   :  { %v2413_v37 = vmul.f32 0.5, %v2409_v11  ;;  %3358 = vtanh.f32 %v2410_v49  ;;  %v3351_v19 = vpop.eup %3350 }
 0x5fc   :  { %v2417_v44 = vmul.f32 0.5, %v3351_v19  ;;  %v3353_v41 = vpop.eup %3352 }
 0x5fd   :  { %v3355_v27 = vpop.eup %3354  ;;  %v2418_v57 = vmul.f32 0.5, %v3353_v41  ;;  %3360 = vtanh.f32 %v2413_v37 }
 0x5fe   :  { %v2420_v28 = vadd.f32 0.5, %v2417_v44  ;;  %v3357_v46 = vpop.eup %3356  ;;  %3362 = vtanh.f32 %v2335_v23  ;;  %v2342_v40 = vmul.f32 0.5, %v3355_v27 }
 0x5ff   :  { %v2421_v62 = vadd.f32 0.5, %v2418_v57  ;;  %v2343_v0 = vmul.f32 0.5, %v3357_v46 }
 0x600   :  { %v2392_v63 = vpop.f32.mrf.mxu2  ;;  %v2405_v12 = vpop.f32.mrf.mxu3  ;;  %v2345_v51 = vadd.f32 0.5, %v2342_v40 }
 0x601   :  { %v3359_v6 = vpop.eup %3358  ;;  %v2424_v50 = vmul.f32 %v2421_v62, %v4774_v2  ;;  %v2346_v42 = vadd.f32 0.5, %v2343_v0 }
 0x602   :  { %v2425_v15 = vmul.f32 %v3359_v6, %v2420_v28 }
 0x603   :  { %v3361_v5 = vpop.eup %3360  ;;  %v2349_v4 = vmul.f32 %v2346_v42, %v4778_v36 }
 0x604   :  { %v2426_v7 = vadd.f32 %v2425_v15, %v2424_v50  ;;  %v3363_v32 = vpop.eup %3362  ;;  %v2419_v21 = vmul.f32 0.5, %v3361_v5 }
 0x605   :  { %v2350_v43 = vmul.f32 %v3363_v32, %v2345_v51 }
 0x606   :  { %3364 = vtanh.f32 %v2426_v7  ;;  %v2422_v25 = vadd.f32 0.5, %v2419_v21 }
 0x607   :  { %3366 = vtanh.f32 %v2338_v16  ;;  %v4901_v13 = vadd.f32 %v2350_v43, %v2349_v4  ;;  %v3219_v4 = vld [vmem:[%s4950_s8] ss:$0 sm:$0xff] }
 0x609   :  { %3368 = vtanh.f32 %v4901_v13 }
 0x60c   :  { %v3365_v8 = vpop.eup %3364 }
 0x60d   :  { %v2428_v9 = vmul.f32 %v3365_v8, %v2422_v25  ;;  %v3367_v17 = vpop.eup %3366 }
 0x60e   :  { %v2344_v18 = vmul.f32 0.5, %v3367_v17 }
 0x60f   :  { %v2429_v2 = vpack.c.bf16 %v2428_v9, %v2428_v9  ;;  %v3369_v22 = vpop.eup %3368 }
 0x610   :  { %v2347_v26 = vadd.f32 0.5, %v2344_v18 }
 0x611   :  { %2438 = vmatmul.bf16.vlgmr.msra.gmra.mxu0 %v2429_v2  ;;  %2451 = vmatmul.bf16.vlgmr.msra.gmra.mxu1 %v2429_v2 }
 0x612   :  { %2464 = vmatmul.bf16.vlgmr.msra.gmra.mxu2 %v2429_v2  ;;  %2477 = vmatmul.bf16.vlgmr.msra.gmra.mxu3 %v2429_v2  ;;  %v2353_v30 = vmul.f32 %v3369_v22, %v2347_v26 }
 0x613   :  { %2626 = vmatpush.bf16.msra.mxu0 %v3194_v35 }
 0x614   :  { %v2354_v36 = vpack.c.bf16 %v2353_v30, %v2353_v30 }
 0x617   :  { %2627 = vmatpush.bf16.msra.mxu0 %v3193_v39 }
 0x61b   :  { %2628 = vmatpush.bf16.msra.mxu0 %v3192_v45 }
 0x61f   :  { %2629 = vmatpush.bf16.msra.mxu0 %v3191_v47 }
 0x621   :  { %2490 = vmatmul.bf16.vlgmr.msrb.gmra.mxu0 %v2354_v36  ;;  %2503 = vmatmul.bf16.vlgmr.msrb.gmra.mxu1 %v2354_v36 }
 0x622   :  { %2516 = vmatmul.bf16.vlgmr.msrb.gmra.mxu2 %v2354_v36  ;;  %2529 = vmatmul.bf16.vlgmr.msrb.gmra.mxu3 %v2354_v36 }
 0x623   :  { %2630 = vmatpush.bf16.msra.mxu0 %v3190_v52 }
 0x627   :  { %2631 = vmatpush.bf16.msra.mxu0 %v3189_v24 }
 0x62b   :  { %2632 = vmatpush.bf16.msra.mxu0 %v3188_v59 }
 0x62f   :  { %2633 = vmatpush.bf16.msra.mxu0 %v3187_v60 }
 0x68e   :  { %v2439_v48 = vpop.f32.mrf.mxu0  ;;  %v2452_v29 = vpop.f32.mrf.mxu1 }
 0x695   :  { %v2465_v58 = vpop.f32.mrf.mxu2  ;;  %v2478_v33 = vpop.f32.mrf.mxu3 }
 0x696   :  { %v2441_v31 = vpop.f32.mrf.mxu0  ;;  %v2454_v38 = vpop.f32.mrf.mxu1 }
 0x69d   :  { %v2467_v1 = vpop.f32.mrf.mxu2  ;;  %v2480_v10 = vpop.f32.mrf.mxu3 }
 0x69e   :  { %v2491_v11 = vpop.f32.mrf.mxu0  ;;  %v2504_v49 = vpop.f32.mrf.mxu1 }
 0x69f   :  { %v2492_v55 = vadd.f32 %v2491_v11, %v2439_v48  ;;  %v2505_v61 = vadd.f32 %v2504_v49, %v2452_v29 }
 0x6a1   :  { %v2534_v56 = vadd.f32 %v2492_v55, %v5764_v34  ;;  %v2535_v37 = vadd.f32 %v2505_v61, %v4118_v3 }
 0x6a3   :  { %v2538_v19 = vmul.f32 0.5, %v2534_v56  ;;  %v2539_v44 = vmul.f32 0.5, %v2535_v37 }
 0x6a5   :  { %3370 = vtanh.f32 %v2538_v19  ;;  %v2517_v41 = vpop.f32.mrf.mxu2  ;;  %v2530_v23 = vpop.f32.mrf.mxu3 }
 0x6a6   :  { %3372 = vtanh.f32 %v2539_v44  ;;  %v2518_v27 = vadd.f32 %v2517_v41, %v2465_v58  ;;  %v2531_v28 = vadd.f32 %v2530_v23, %v2478_v33  ;;  %v2493_v57 = vpop.f32.mrf.mxu0  ;;  %v2506_v46 = vpop.f32.mrf.mxu1 }
 0x6a8   :  { %v2536_v63 = vadd.f32 %v2518_v27, %v4133_v20  ;;  %v2537_v12 = vadd.f32 %v2531_v28, %v4130_v53 }
 0x6aa   :  { %v2540_v6 = vmul.f32 0.5, %v2536_v63  ;;  %3374 = vtanh.f32 %v2537_v12 }
 0x6ab   :  { %v3371_v54 = vpop.eup %3370 }
 0x6ac   :  { %v3373_v34 = vpop.eup %3372  ;;  %v2544_v62 = vmul.f32 0.5, %v3371_v54  ;;  %3376 = vtanh.f32 %v2540_v6 }
 0x6ad   :  { %v2545_v3 = vmul.f32 0.5, %v3373_v34  ;;  %v2519_v15 = vpop.f32.mrf.mxu2  ;;  %v2532_v40 = vpop.f32.mrf.mxu3 }
 0x6ae   :  { %v2547_v0 = vadd.f32 0.5, %v2544_v62 }
 0x6af   :  { %v2548_v50 = vadd.f32 0.5, %v2545_v3 }
 0x6b0   :  { %v3375_v5 = vpop.eup %3374 }
 0x6b1   :  { %v2551_v14 = vmul.f32 %v2548_v50, %v4901_v13  ;;  %v2552_v7 = vmul.f32 %v3375_v5, %v2547_v0 }
 0x6b2   :  { %v3377_v51 = vpop.eup %3376 }
 0x6b3   :  { %v2553_v42 = vadd.f32 %v2552_v7, %v2551_v14  ;;  %v2546_v20 = vmul.f32 0.5, %v3377_v51 }
 0x6b5   :  { %3378 = vtanh.f32 %v2553_v42  ;;  %v2549_v53 = vadd.f32 0.5, %v2546_v20 }
 0x6bb   :  { %v3379_v32 = vpop.eup %3378 }
 0x6bc   :  { %v2555_v21 = vmul.f32 %v3379_v32, %v2549_v53 }
 0x6be   :  { %v2557_v16 = vpack.c.bf16 %v2555_v21, %v2555_v21  ;;  %2556 = vst [vmem:[#allocation12] sm:$0xff] %v2555_v21 }
 0x6bf   :  { %2661 = dma.vmem_to_hbm [thread:$0]  %s2657_s21, 128, %s2659_s24, [#allocation13]  }
 0x6c0   :  { %2634 = vmatmul.bf16.vlgmr.msra.gmra.mxu0 %v2557_v16 }
 0x73d   :  { %v2635_v43 = vpop.f32.mrf.mxu0 }
 0x73e   :  { %v2636_v25 = vadd.f32 %v3219_v4, %v2635_v43 }
 0x740   :  { %2639 = vst [vmem:[#allocation11] sm:$0xff] %v2636_v25 }
 0x741   :  { %2650 = dma.vmem_to_hbm [thread:$0]  %s2646_s3, 128, %s2648_s30, [#allocation4]  }
 0x745   :  { %v2637_v8 = vpop.f32.mrf.mxu0 }
 0x746   :  { %3554 = dma.done.wait [#allocation4], 128  }
 0x747   :  { %3555 = vsyncadd [#allocation4], 4294967168 }
 0x748   :  { %3556 = dma.done.wait [#allocation13], 128  }
 0x749   :  { %3557 = vsyncadd [#allocation13], 4294967168 }
 0x74a   :  { %2670 = vsyncpa [#allocation3], 1 }
 0x74b   :  { %2671 = vsyncpa [#allocation6], 1 }
 0x74c   :  { %2672 = vsyncpa [#allocation9], 1 }
 0x74d   :  { %2673 = vsyncpa [#allocation4], 1 }
 0x74e   :  { %2674 = vsyncpa [#allocation13], 1 }

</bundles_post_ra>
